<compile_context>
chip_gen: v7x
topology: tpu7x:2x2x1
jax: 0.10.0
libtpu: 0.0.40
codegen_flags: <defaults>
</compile_context>

<pallas_src>
import functools
import math

import jax
import jax.numpy as jnp
import numpy as np
from jax.experimental import pallas as pl
from jax.experimental.pallas import tpu as pltpu

NEG_SLOPE = 0.2
ACT_GAIN = math.sqrt(2.0)


def _leaky(x):
    return jnp.where(x >= 0.0, x, NEG_SLOPE * x)


def _round_up(x, m):
    return ((x + m - 1) // m) * m


def _images_per_block(n, hw, target_m=256):
    """Largest divisor of n such that nb*hw is around target_m (fills the MXU M dim)."""
    want = min(n, max(1, -(-target_m // hw)))
    for nb in range(want, 0, -1):
        if n % nb == 0:
            return nb
    return 1


def _cout_block(cp):
    if cp <= 256:
        return cp
    return 256 if cp % 256 == 0 else 128


# ----------------------------------------------------------------------------
# Phase split: 3x3 / stride-2 / pad-1 conv input rearranged so the kernel only needs static slices.
#   ph[2a+b][n, i, j, :] = xpad1[n, 2i+a, 2j+b, :]   (xpad1 = x zero-padded by 1 spatially)
# ----------------------------------------------------------------------------
def _phase_split(x):
    N, H, W, C = x.shape
    Hh = (H - 1) // 2 + 2  # = Ho + 1
    Wh = (W - 1) // 2 + 2  # = Wo + 1
    xp = jnp.pad(x, ((0, 0), (1, 2 * Hh - H - 1), (1, 2 * Wh - W - 1), (0, 0)))
    phases = [xp[:, a::2, b::2, :] for a in range(2) for b in range(2)]
    return phases, Hh, Wh


# ----------------------------------------------------------------------------
# Shared hot loop: 9 bf16 MXU matmuls (one per 3x3 tap), f32 accumulator, UNSCALED weights.
# ----------------------------------------------------------------------------
def _conv3x3_s2_taps(phase_refs, w_ref, nb, ho, wo):
    cin = phase_refs[0].shape[-1]
    cout = w_ref.shape[-1]
    m = nb * ho * wo
    acc = jnp.zeros((m, cout), jnp.float32)
    for kh in range(3):
        for kw in range(3):
            p = (kh % 2) * 2 + (kw % 2)
            oh, ow = kh // 2, kw // 2
            # NOTE: the ow==1 taps read a +1 sublane-offset slice (Mosaic relayouts them); a
            # pltpu.roll on the aligned load would route that through the XLU instead, but the
            # direct slice is kept for robustness.
            patch = phase_refs[p][:, oh:oh + ho, ow:ow + wo, :]          # (nb, ho, wo, cin) bf16
            acc += jnp.dot(patch.reshape(m, cin), w_ref[kh * 3 + kw],
                           preferred_element_type=jnp.float32)
    return acc


# ----------------------------------------------------------------------------
# Kernel 1: conv (3x3, stride 2, pad 1) + bias + scaled LeakyReLU.
#   bias was pre-divided by the equal-lr scale; the scale is folded into out_gain.
# ----------------------------------------------------------------------------
def conv_lrelu_kernel(p0, p1, p2, p3, w_ref, b_ref, o_ref, *, out_gain):
    nb, ho, wo, cout = o_ref.shape
    acc = _conv3x3_s2_taps((p0, p1, p2, p3), w_ref, nb, ho, wo)
    y = _leaky(acc + b_ref[0, :]) * out_gain
    o_ref[...] = y.reshape(nb, ho, wo, cout).astype(o_ref.dtype)


def conv_layer(x, w9, b_scaled, out_gain):
    """x: (N,H,W,Cp) bf16; w9: (9,Cp,Cp) bf16 (unscaled); b_scaled: (1,Cp) f32 (= bias / scale)."""
    N, H, W, Cp = x.shape
    Ho, Wo = (H - 1) // 2 + 1, (W - 1) // 2 + 1
    phases, Hh, Wh = _phase_split(x)
    nb = _images_per_block(N, Ho * Wo)
    cb = _cout_block(Cp)

    phase_spec = pl.BlockSpec((nb, Hh, Wh, Cp), lambda n, j: (n, 0, 0, 0))
    return pl.pallas_call(
        functools.partial(conv_lrelu_kernel, out_gain=out_gain),
        out_shape=jax.ShapeDtypeStruct((N, Ho, Wo, Cp), x.dtype),
        grid=(N // nb, Cp // cb),
        in_specs=[phase_spec] * 4 + [
            pl.BlockSpec((9, Cp, cb), lambda n, j: (0, 0, j)),
            pl.BlockSpec((1, cb), lambda n, j: (0, j)),
        ],
        out_specs=pl.BlockSpec((nb, Ho, Wo, cb), lambda n, j: (n, 0, 0, j)),
        compiler_params=pltpu.CompilerParams(
            dimension_semantics=("parallel", "parallel"),
            vmem_limit_bytes=64 * 1024 * 1024,
        ),
    )(*phases, w9, b_scaled)


# ----------------------------------------------------------------------------
# Kernel 2: conv3 + bias + scaled LeakyReLU + AdaptiveAvgPool2d(1) + EqualLinear(fused_lrelu),
#           all fused so the layer-3 feature map never hits HBM.
# ----------------------------------------------------------------------------
def conv_pool_fc_kernel(p0, p1, p2, p3, w_ref, b_ref, fcw_ref, fcb_ref, o_ref, *,
                        ho, wo, conv_gain, fc_gain):
    nb = o_ref.shape[0]
    cout = w_ref.shape[-1]
    outp = fcw_ref.shape[-1]
    acc = _conv3x3_s2_taps((p0, p1, p2, p3), w_ref, nb, ho, wo)
    y = _leaky(acc + b_ref[0, :]) * conv_gain                    # (nb*ho*wo, cout) f32
    pooled = jnp.mean(y.reshape(nb, ho * wo, cout), axis=1)      # adaptive avg pool -> (nb, cout)
    z = jnp.dot(pooled, fcw_ref[...], preferred_element_type=jnp.float32)  # tiny FC, kept f32
    z = _leaky(z + fcb_ref[0, :]) * fc_gain                      # fused_leaky_relu
    o_ref[...] = z.reshape(nb, 1, outp).astype(o_ref.dtype)


def conv_pool_fc(x, w9, b_scaled, conv_gain, fcw, fcb_scaled, fc_gain):
    N, H, W, Cp = x.shape
    Ho, Wo = (H - 1) // 2 + 1, (W - 1) // 2 + 1
    phases, Hh, Wh = _phase_split(x)
    nb = _images_per_block(N, Ho * Wo)
    OutP = fcw.shape[1]

    phase_spec = pl.BlockSpec((nb, Hh, Wh, Cp), lambda n: (n, 0, 0, 0))
    out = pl.pallas_call(
        functools.partial(conv_pool_fc_kernel, ho=Ho, wo=Wo,
                          conv_gain=conv_gain, fc_gain=fc_gain),
        out_shape=jax.ShapeDtypeStruct((N, 1, OutP), jnp.float32),
        grid=(N // nb,),
        in_specs=[phase_spec] * 4 + [
            pl.BlockSpec((9, Cp, Cp), lambda n: (0, 0, 0)),
            pl.BlockSpec((1, Cp), lambda n: (0, 0)),
            pl.BlockSpec((Cp, OutP), lambda n: (0, 0)),
            pl.BlockSpec((1, OutP), lambda n: (0, 0)),
        ],
        out_specs=pl.BlockSpec((nb, 1, OutP), lambda n: (n, 0, 0)),
        compiler_params=pltpu.CompilerParams(
            dimension_semantics=("parallel",),
            vmem_limit_bytes=64 * 1024 * 1024,
        ),
    )(*phases, w9, b_scaled, fcw, fcb_scaled)
    return out[:, 0, :]


# ----------------------------------------------------------------------------
# Parameter prep: pad channels to lane multiples, bf16 conv weights, scale folding.
# ----------------------------------------------------------------------------
def _prepare_params(params, cin, cout_fc):
    cp = _round_up(cin, 128)
    outp = _round_up(cout_fc, 128)
    conv_scale = 1.0 / math.sqrt(cin * 9)   # equalized-lr conv scale (true Cin)
    fc_scale = 1.0 / math.sqrt(cin)         # EqualLinear scale (lr_mul = 1)

    conv = []
    for w, b in params["conv"]:
        wp = jnp.zeros((3, 3, cp, cp), jnp.float32).at[:, :, :cin, :cin].set(w)
        bp = jnp.zeros((1, cp), jnp.float32).at[0, :cin].set(b / conv_scale)
        conv.append((wp.reshape(9, cp, cp).astype(jnp.bfloat16), bp))

    fcw = jnp.zeros((cp, outp), jnp.float32).at[:cin, :cout_fc].set(params["fc_w_t"])
    fcb = jnp.zeros((1, outp), jnp.float32).at[0, :cout_fc].set(params["fc_b"] / fc_scale)
    return dict(conv=conv, fcw=fcw, fcb=fcb, cp=cp,
                conv_gain=ACT_GAIN * conv_scale, fc_gain=ACT_GAIN * fc_scale)


# ----------------------------------------------------------------------------
# ToStyle forward
# ----------------------------------------------------------------------------
def to_style_forward(x_nchw, params):
    N, C, H, W = x_nchw.shape
    out_channels = params["fc_b"].shape[0]
    prep = _prepare_params(params, C, out_channels)
    cp = prep["cp"]

    x = jnp.transpose(x_nchw, (0, 2, 3, 1))                              # NCHW -> NHWC
    x = jnp.pad(x, ((0, 0), (0, 0), (0, 0), (0, cp - C))).astype(jnp.bfloat16)

    for w9, bp in prep["conv"][:2]:
        x = conv_layer(x, w9, bp, prep["conv_gain"])
    w9, bp = prep["conv"][2]
    out = conv_pool_fc(x, w9, bp, prep["conv_gain"], prep["fcw"], prep["fcb"], prep["fc_gain"])
    return out[:, :out_channels]


def init_params(key, in_channels, out_channels):
    ks = jax.random.split(key, 8)
    conv = []
    for i in range(3):
        w = jax.random.normal(ks[i], (3, 3, in_channels, in_channels), jnp.float32)
        b = 0.1 * jax.random.normal(ks[3 + i], (in_channels,), jnp.float32)
        conv.append((w, b))
    fc_w = jax.random.normal(ks[6], (out_channels, in_channels), jnp.float32)  # (Out, In) torch layout
    fc_b = 0.1 * jax.random.normal(ks[7], (out_channels,), jnp.float32)
    return {"conv": conv, "fc_w_t": fc_w.T, "fc_b": fc_b}


# ----------------------------------------------------------------------------
# Pure-JAX f32 reference (for correctness check)
# ----------------------------------------------------------------------------
def reference(x_nchw, params):
    x = jnp.transpose(x_nchw, (0, 2, 3, 1))
    for w, b in params["conv"]:
        cin = w.shape[2]
        y = jax.lax.conv_general_dilated(
            x, w * (1.0 / math.sqrt(cin * 9)),
            window_strides=(2, 2), padding=((1, 1), (1, 1)),
            dimension_numbers=("NHWC", "HWIO", "NHWC"),
        ) + b
        x = _leaky(y) * ACT_GAIN
    pooled = jnp.mean(x, axis=(1, 2))
    c = pooled.shape[1]
    y = pooled @ (params["fc_w_t"] * (1.0 / math.sqrt(c))) + params["fc_b"]
    return _leaky(y) * ACT_GAIN


if __name__ == "__main__":
    key = jax.random.PRNGKey(0)
    k_x, k_p = jax.random.split(key)

    N, C, H, W = 2, 4, 16, 16
    OUT = 8
    x = jax.random.normal(k_x, (N, C, H, W), jnp.float32)   # NCHW, like the PyTorch module
    params = init_params(k_p, C, OUT)

    fwd = jax.jit(to_style_forward)
    out = jax.block_until_ready(fwd(x, params))
    ref = jax.block_until_ready(reference(x, params))

    assert out.shape == (N, OUT), out.shape
    # bf16 MXU path vs pure-f32 reference -> loosened tolerance.
    np.testing.assert_allclose(np.asarray(out), np.asarray(ref), rtol=5e-2, atol=5e-2)

    print("KERNEL_OK")
</pallas_src>

<mosaic_0001>
module attributes {stable_mosaic.version = 11 : i64} {
  func.func @conv_lrelu_kernel(%arg0: i32, %arg1: i32, %arg2: memref<2x9x9x128xbf16, #tpu.memory_space<vmem>>, %arg3: memref<2x9x9x128xbf16, #tpu.memory_space<vmem>>, %arg4: memref<2x9x9x128xbf16, #tpu.memory_space<vmem>>, %arg5: memref<2x9x9x128xbf16, #tpu.memory_space<vmem>>, %arg6: memref<9x128x128xbf16, #tpu.memory_space<vmem>>, %arg7: memref<1x128xf32, #tpu.memory_space<vmem>>, %arg8: memref<2x8x8x128xbf16, #tpu.memory_space<vmem>>) attributes {dimension_semantics = [#tpu.dimension_semantics<parallel>, #tpu.dimension_semantics<parallel>], iteration_bounds = array<i64: 1, 1>, scalar_prefetch = 0 : i64, scratch_operands = 0 : i64, tpu.core_type = #tpu.core_type<tc>, window_params = [{transform_indices = @transform_0, window_bounds = array<i64: 2, 9, 9, 128>}, {transform_indices = @transform_1, window_bounds = array<i64: 2, 9, 9, 128>}, {transform_indices = @transform_2, window_bounds = array<i64: 2, 9, 9, 128>}, {transform_indices = @transform_3, window_bounds = array<i64: 2, 9, 9, 128>}, {transform_indices = @transform_4, window_bounds = array<i64: 9, 128, 128>}, {transform_indices = @transform_5, window_bounds = array<i64: 1, 128>}, {transform_indices = @transform_6, window_bounds = array<i64: 2, 8, 8, 128>}]} {
    %cst = arith.constant 0.000000e+00 : f32
    %0 = vector.broadcast %cst : f32 to vector<128x128xf32>
    %c0 = arith.constant 0 : index
    %c0_0 = arith.constant 0 : index
    %c0_1 = arith.constant 0 : index
    %c0_2 = arith.constant 0 : index
    %1 = vector.load %arg2[%c0, %c0_0, %c0_1, %c0_2] : memref<2x9x9x128xbf16, #tpu.memory_space<vmem>>, vector<2x8x8x128xbf16>
    %2 = vector.shape_cast %1 : vector<2x8x8x128xbf16> to vector<128x128xbf16>
    %c0_3 = arith.constant 0 : index
    %c0_4 = arith.constant 0 : index
    %c0_5 = arith.constant 0 : index
    %3 = vector.load %arg6[%c0_3, %c0_4, %c0_5] : memref<9x128x128xbf16, #tpu.memory_space<vmem>>, vector<1x128x128xbf16>
    %4 = vector.shape_cast %3 : vector<1x128x128xbf16> to vector<128x128xbf16>
    %cst_6 = arith.constant dense<0.000000e+00> : vector<128x128xf32>
    %5 = tpu.matmul %2, %4, %cst_6 {dimension_numbers = #tpu.dot_dimension_numbers<[1], [0], [0], [1], [0, 0, 1, 1], [], []>} : vector<128x128xbf16>, vector<128x128xbf16>, vector<128x128xf32> -> vector<128x128xf32>
    %6 = arith.addf %0, %5 : vector<128x128xf32>
    %c0_7 = arith.constant 0 : index
    %c0_8 = arith.constant 0 : index
    %c0_9 = arith.constant 0 : index
    %c0_10 = arith.constant 0 : index
    %7 = vector.load %arg3[%c0_7, %c0_8, %c0_9, %c0_10] : memref<2x9x9x128xbf16, #tpu.memory_space<vmem>>, vector<2x8x8x128xbf16>
    %8 = vector.shape_cast %7 : vector<2x8x8x128xbf16> to vector<128x128xbf16>
    %c1 = arith.constant 1 : index
    %c0_11 = arith.constant 0 : index
    %c0_12 = arith.constant 0 : index
    %9 = vector.load %arg6[%c1, %c0_11, %c0_12] : memref<9x128x128xbf16, #tpu.memory_space<vmem>>, vector<1x128x128xbf16>
    %10 = vector.shape_cast %9 : vector<1x128x128xbf16> to vector<128x128xbf16>
    %cst_13 = arith.constant dense<0.000000e+00> : vector<128x128xf32>
    %11 = tpu.matmul %8, %10, %cst_13 {dimension_numbers = #tpu.dot_dimension_numbers<[1], [0], [0], [1], [0, 0, 1, 1], [], []>} : vector<128x128xbf16>, vector<128x128xbf16>, vector<128x128xf32> -> vector<128x128xf32>
    %12 = arith.addf %6, %11 : vector<128x128xf32>
    %c0_14 = arith.constant 0 : index
    %c0_15 = arith.constant 0 : index
    %c1_16 = arith.constant 1 : index
    %c0_17 = arith.constant 0 : index
    %13 = vector.load %arg2[%c0_14, %c0_15, %c1_16, %c0_17] : memref<2x9x9x128xbf16, #tpu.memory_space<vmem>>, vector<2x8x8x128xbf16>
    %14 = vector.shape_cast %13 : vector<2x8x8x128xbf16> to vector<128x128xbf16>
    %c2 = arith.constant 2 : index
    %c0_18 = arith.constant 0 : index
    %c0_19 = arith.constant 0 : index
    %15 = vector.load %arg6[%c2, %c0_18, %c0_19] : memref<9x128x128xbf16, #tpu.memory_space<vmem>>, vector<1x128x128xbf16>
    %16 = vector.shape_cast %15 : vector<1x128x128xbf16> to vector<128x128xbf16>
    %cst_20 = arith.constant dense<0.000000e+00> : vector<128x128xf32>
    %17 = tpu.matmul %14, %16, %cst_20 {dimension_numbers = #tpu.dot_dimension_numbers<[1], [0], [0], [1], [0, 0, 1, 1], [], []>} : vector<128x128xbf16>, vector<128x128xbf16>, vector<128x128xf32> -> vector<128x128xf32>
    %18 = arith.addf %12, %17 : vector<128x128xf32>
    %c0_21 = arith.constant 0 : index
    %c0_22 = arith.constant 0 : index
    %c0_23 = arith.constant 0 : index
    %c0_24 = arith.constant 0 : index
    %19 = vector.load %arg4[%c0_21, %c0_22, %c0_23, %c0_24] : memref<2x9x9x128xbf16, #tpu.memory_space<vmem>>, vector<2x8x8x128xbf16>
    %20 = vector.shape_cast %19 : vector<2x8x8x128xbf16> to vector<128x128xbf16>
    %c3 = arith.constant 3 : index
    %c0_25 = arith.constant 0 : index
    %c0_26 = arith.constant 0 : index
    %21 = vector.load %arg6[%c3, %c0_25, %c0_26] : memref<9x128x128xbf16, #tpu.memory_space<vmem>>, vector<1x128x128xbf16>
    %22 = vector.shape_cast %21 : vector<1x128x128xbf16> to vector<128x128xbf16>
    %cst_27 = arith.constant dense<0.000000e+00> : vector<128x128xf32>
    %23 = tpu.matmul %20, %22, %cst_27 {dimension_numbers = #tpu.dot_dimension_numbers<[1], [0], [0], [1], [0, 0, 1, 1], [], []>} : vector<128x128xbf16>, vector<128x128xbf16>, vector<128x128xf32> -> vector<128x128xf32>
    %24 = arith.addf %18, %23 : vector<128x128xf32>
    %c0_28 = arith.constant 0 : index
    %c0_29 = arith.constant 0 : index
    %c0_30 = arith.constant 0 : index
    %c0_31 = arith.constant 0 : index
    %25 = vector.load %arg5[%c0_28, %c0_29, %c0_30, %c0_31] : memref<2x9x9x128xbf16, #tpu.memory_space<vmem>>, vector<2x8x8x128xbf16>
    %26 = vector.shape_cast %25 : vector<2x8x8x128xbf16> to vector<128x128xbf16>
    %c4 = arith.constant 4 : index
    %c0_32 = arith.constant 0 : index
    %c0_33 = arith.constant 0 : index
    %27 = vector.load %arg6[%c4, %c0_32, %c0_33] : memref<9x128x128xbf16, #tpu.memory_space<vmem>>, vector<1x128x128xbf16>
    %28 = vector.shape_cast %27 : vector<1x128x128xbf16> to vector<128x128xbf16>
    %cst_34 = arith.constant dense<0.000000e+00> : vector<128x128xf32>
    %29 = tpu.matmul %26, %28, %cst_34 {dimension_numbers = #tpu.dot_dimension_numbers<[1], [0], [0], [1], [0, 0, 1, 1], [], []>} : vector<128x128xbf16>, vector<128x128xbf16>, vector<128x128xf32> -> vector<128x128xf32>
    %30 = arith.addf %24, %29 : vector<128x128xf32>
    %c0_35 = arith.constant 0 : index
    %c0_36 = arith.constant 0 : index
    %c1_37 = arith.constant 1 : index
    %c0_38 = arith.constant 0 : index
    %31 = vector.load %arg4[%c0_35, %c0_36, %c1_37, %c0_38] : memref<2x9x9x128xbf16, #tpu.memory_space<vmem>>, vector<2x8x8x128xbf16>
    %32 = vector.shape_cast %31 : vector<2x8x8x128xbf16> to vector<128x128xbf16>
    %c5 = arith.constant 5 : index
    %c0_39 = arith.constant 0 : index
    %c0_40 = arith.constant 0 : index
    %33 = vector.load %arg6[%c5, %c0_39, %c0_40] : memref<9x128x128xbf16, #tpu.memory_space<vmem>>, vector<1x128x128xbf16>
    %34 = vector.shape_cast %33 : vector<1x128x128xbf16> to vector<128x128xbf16>
    %cst_41 = arith.constant dense<0.000000e+00> : vector<128x128xf32>
    %35 = tpu.matmul %32, %34, %cst_41 {dimension_numbers = #tpu.dot_dimension_numbers<[1], [0], [0], [1], [0, 0, 1, 1], [], []>} : vector<128x128xbf16>, vector<128x128xbf16>, vector<128x128xf32> -> vector<128x128xf32>
    %36 = arith.addf %30, %35 : vector<128x128xf32>
    %c0_42 = arith.constant 0 : index
    %c1_43 = arith.constant 1 : index
    %c0_44 = arith.constant 0 : index
    %c0_45 = arith.constant 0 : index
    %37 = vector.load %arg2[%c0_42, %c1_43, %c0_44, %c0_45] : memref<2x9x9x128xbf16, #tpu.memory_space<vmem>>, vector<2x8x8x128xbf16>
    %38 = vector.shape_cast %37 : vector<2x8x8x128xbf16> to vector<128x128xbf16>
    %c6 = arith.constant 6 : index
    %c0_46 = arith.constant 0 : index
    %c0_47 = arith.constant 0 : index
    %39 = vector.load %arg6[%c6, %c0_46, %c0_47] : memref<9x128x128xbf16, #tpu.memory_space<vmem>>, vector<1x128x128xbf16>
    %40 = vector.shape_cast %39 : vector<1x128x128xbf16> to vector<128x128xbf16>
    %cst_48 = arith.constant dense<0.000000e+00> : vector<128x128xf32>
    %41 = tpu.matmul %38, %40, %cst_48 {dimension_numbers = #tpu.dot_dimension_numbers<[1], [0], [0], [1], [0, 0, 1, 1], [], []>} : vector<128x128xbf16>, vector<128x128xbf16>, vector<128x128xf32> -> vector<128x128xf32>
    %42 = arith.addf %36, %41 : vector<128x128xf32>
    %c0_49 = arith.constant 0 : index
    %c1_50 = arith.constant 1 : index
    %c0_51 = arith.constant 0 : index
    %c0_52 = arith.constant 0 : index
    %43 = vector.load %arg3[%c0_49, %c1_50, %c0_51, %c0_52] : memref<2x9x9x128xbf16, #tpu.memory_space<vmem>>, vector<2x8x8x128xbf16>
    %44 = vector.shape_cast %43 : vector<2x8x8x128xbf16> to vector<128x128xbf16>
    %c7 = arith.constant 7 : index
    %c0_53 = arith.constant 0 : index
    %c0_54 = arith.constant 0 : index
    %45 = vector.load %arg6[%c7, %c0_53, %c0_54] : memref<9x128x128xbf16, #tpu.memory_space<vmem>>, vector<1x128x128xbf16>
    %46 = vector.shape_cast %45 : vector<1x128x128xbf16> to vector<128x128xbf16>
    %cst_55 = arith.constant dense<0.000000e+00> : vector<128x128xf32>
    %47 = tpu.matmul %44, %46, %cst_55 {dimension_numbers = #tpu.dot_dimension_numbers<[1], [0], [0], [1], [0, 0, 1, 1], [], []>} : vector<128x128xbf16>, vector<128x128xbf16>, vector<128x128xf32> -> vector<128x128xf32>
    %48 = arith.addf %42, %47 : vector<128x128xf32>
    %c0_56 = arith.constant 0 : index
    %c1_57 = arith.constant 1 : index
    %c1_58 = arith.constant 1 : index
    %c0_59 = arith.constant 0 : index
    %49 = vector.load %arg2[%c0_56, %c1_57, %c1_58, %c0_59] : memref<2x9x9x128xbf16, #tpu.memory_space<vmem>>, vector<2x8x8x128xbf16>
    %50 = vector.shape_cast %49 : vector<2x8x8x128xbf16> to vector<128x128xbf16>
    %c8 = arith.constant 8 : index
    %c0_60 = arith.constant 0 : index
    %c0_61 = arith.constant 0 : index
    %51 = vector.load %arg6[%c8, %c0_60, %c0_61] : memref<9x128x128xbf16, #tpu.memory_space<vmem>>, vector<1x128x128xbf16>
    %52 = vector.shape_cast %51 : vector<1x128x128xbf16> to vector<128x128xbf16>
    %cst_62 = arith.constant dense<0.000000e+00> : vector<128x128xf32>
    %53 = tpu.matmul %50, %52, %cst_62 {dimension_numbers = #tpu.dot_dimension_numbers<[1], [0], [0], [1], [0, 0, 1, 1], [], []>} : vector<128x128xbf16>, vector<128x128xbf16>, vector<128x128xf32> -> vector<128x128xf32>
    %54 = arith.addf %48, %53 : vector<128x128xf32>
    %c0_63 = arith.constant 0 : index
    %c0_64 = arith.constant 0 : index
    %55 = vector.load %arg7[%c0_63, %c0_64] : memref<1x128xf32, #tpu.memory_space<vmem>>, vector<1x128xf32>
    %56 = vector.shape_cast %55 : vector<1x128xf32> to vector<128xf32>
    %57 = vector.shape_cast %56 : vector<128xf32> to vector<1x128xf32>
    %58 = vector.broadcast %57 : vector<1x128xf32> to vector<128x128xf32>
    %59 = arith.addf %54, %58 : vector<128x128xf32>
    %cst_65 = arith.constant 0.000000e+00 : f32
    %60 = vector.broadcast %cst_65 : f32 to vector<128x128xf32>
    %61 = arith.cmpf oge, %59, %60 : vector<128x128xf32>
    %cst_66 = arith.constant 2.000000e-01 : f32
    %62 = vector.broadcast %cst_66 : f32 to vector<128x128xf32>
    %63 = arith.mulf %62, %59 : vector<128x128xf32>
    %64 = arith.select %61, %59, %63 : vector<128x128xi1>, vector<128x128xf32>
    %cst_67 = arith.constant 0.235702261 : f32
    %65 = vector.broadcast %cst_67 : f32 to vector<128x128xf32>
    %66 = arith.mulf %64, %65 : vector<128x128xf32>
    %67 = vector.shape_cast %66 : vector<128x128xf32> to vector<2x8x8x128xf32>
    %68 = arith.truncf %67 : vector<2x8x8x128xf32> to vector<2x8x8x128xbf16>
    %c0_68 = arith.constant 0 : index
    %c0_69 = arith.constant 0 : index
    %c0_70 = arith.constant 0 : index
    %c0_71 = arith.constant 0 : index
    %69 = vector.load %arg8[%c0_68, %c0_69, %c0_70, %c0_71] : memref<2x8x8x128xbf16, #tpu.memory_space<vmem>>, vector<2x8x8x128xbf16>
    tpu.vector_store %arg8[%c0_68, %c0_69, %c0_70, %c0_71], %68 {strides = array<i32>} : memref<2x8x8x128xbf16, #tpu.memory_space<vmem>>, vector<2x8x8x128xbf16>,
    return
  }
  func.func @transform_0(%arg0: i32, %arg1: i32) -> (i32, i32, i32, i32) {
    %c0_i32 = arith.constant 0 : i32
    %c0_i32_0 = arith.constant 0 : i32
    %c0_i32_1 = arith.constant 0 : i32
    %c0_i32_2 = arith.constant 0 : i32
    return %arg0, %c0_i32, %c0_i32_0, %c0_i32_1 : i32, i32, i32, i32
  }
  func.func @transform_1(%arg0: i32, %arg1: i32) -> (i32, i32, i32, i32) {
    %c0_i32 = arith.constant 0 : i32
    %c0_i32_0 = arith.constant 0 : i32
    %c0_i32_1 = arith.constant 0 : i32
    %c0_i32_2 = arith.constant 0 : i32
    return %arg0, %c0_i32, %c0_i32_0, %c0_i32_1 : i32, i32, i32, i32
  }
  func.func @transform_2(%arg0: i32, %arg1: i32) -> (i32, i32, i32, i32) {
    %c0_i32 = arith.constant 0 : i32
    %c0_i32_0 = arith.constant 0 : i32
    %c0_i32_1 = arith.constant 0 : i32
    %c0_i32_2 = arith.constant 0 : i32
    return %arg0, %c0_i32, %c0_i32_0, %c0_i32_1 : i32, i32, i32, i32
  }
  func.func @transform_3(%arg0: i32, %arg1: i32) -> (i32, i32, i32, i32) {
    %c0_i32 = arith.constant 0 : i32
    %c0_i32_0 = arith.constant 0 : i32
    %c0_i32_1 = arith.constant 0 : i32
    %c0_i32_2 = arith.constant 0 : i32
    return %arg0, %c0_i32, %c0_i32_0, %c0_i32_1 : i32, i32, i32, i32
  }
  func.func @transform_4(%arg0: i32, %arg1: i32) -> (i32, i32, i32) {
    %c0_i32 = arith.constant 0 : i32
    %c0_i32_0 = arith.constant 0 : i32
    %c0_i32_1 = arith.constant 0 : i32
    return %c0_i32, %c0_i32_0, %arg1 : i32, i32, i32
  }
  func.func @transform_5(%arg0: i32, %arg1: i32) -> (i32, i32) {
    %c0_i32 = arith.constant 0 : i32
    %c0_i32_0 = arith.constant 0 : i32
    return %c0_i32, %arg1 : i32, i32
  }
  func.func @transform_6(%arg0: i32, %arg1: i32) -> (i32, i32, i32, i32) {
    %c0_i32 = arith.constant 0 : i32
    %c0_i32_0 = arith.constant 0 : i32
    %c0_i32_1 = arith.constant 0 : i32
    return %arg0, %c0_i32, %c0_i32_0, %arg1 : i32, i32, i32, i32
  }
}

module attributes {stable_mosaic.version = 11 : i64} {
  func.func @conv_lrelu_kernel(%arg0: i32, %arg1: i32, %arg2: memref<2x5x5x128xbf16, #tpu.memory_space<vmem>>, %arg3: memref<2x5x5x128xbf16, #tpu.memory_space<vmem>>, %arg4: memref<2x5x5x128xbf16, #tpu.memory_space<vmem>>, %arg5: memref<2x5x5x128xbf16, #tpu.memory_space<vmem>>, %arg6: memref<9x128x128xbf16, #tpu.memory_space<vmem>>, %arg7: memref<1x128xf32, #tpu.memory_space<vmem>>, %arg8: memref<2x4x4x128xbf16, #tpu.memory_space<vmem>>) attributes {dimension_semantics = [#tpu.dimension_semantics<parallel>, #tpu.dimension_semantics<parallel>], iteration_bounds = array<i64: 1, 1>, scalar_prefetch = 0 : i64, scratch_operands = 0 : i64, tpu.core_type = #tpu.core_type<tc>, window_params = [{transform_indices = @transform_0, window_bounds = array<i64: 2, 5, 5, 128>}, {transform_indices = @transform_1, window_bounds = array<i64: 2, 5, 5, 128>}, {transform_indices = @transform_2, window_bounds = array<i64: 2, 5, 5, 128>}, {transform_indices = @transform_3, window_bounds = array<i64: 2, 5, 5, 128>}, {transform_indices = @transform_4, window_bounds = array<i64: 9, 128, 128>}, {transform_indices = @transform_5, window_bounds = array<i64: 1, 128>}, {transform_indices = @transform_6, window_bounds = array<i64: 2, 4, 4, 128>}]} {
    %cst = arith.constant 0.000000e+00 : f32
    %0 = vector.broadcast %cst : f32 to vector<32x128xf32>
    %c0 = arith.constant 0 : index
    %c0_0 = arith.constant 0 : index
    %c0_1 = arith.constant 0 : index
    %c0_2 = arith.constant 0 : index
    %1 = vector.load %arg2[%c0, %c0_0, %c0_1, %c0_2] : memref<2x5x5x128xbf16, #tpu.memory_space<vmem>>, vector<2x4x4x128xbf16>
    %2 = vector.shape_cast %1 : vector<2x4x4x128xbf16> to vector<32x128xbf16>
    %c0_3 = arith.constant 0 : index
    %c0_4 = arith.constant 0 : index
    %c0_5 = arith.constant 0 : index
    %3 = vector.load %arg6[%c0_3, %c0_4, %c0_5] : memref<9x128x128xbf16, #tpu.memory_space<vmem>>, vector<1x128x128xbf16>
    %4 = vector.shape_cast %3 : vector<1x128x128xbf16> to vector<128x128xbf16>
    %cst_6 = arith.constant dense<0.000000e+00> : vector<32x128xf32>
    %5 = tpu.matmul %2, %4, %cst_6 {dimension_numbers = #tpu.dot_dimension_numbers<[1], [0], [0], [1], [0, 0, 1, 1], [], []>} : vector<32x128xbf16>, vector<128x128xbf16>, vector<32x128xf32> -> vector<32x128xf32>
    %6 = arith.addf %0, %5 : vector<32x128xf32>
    %c0_7 = arith.constant 0 : index
    %c0_8 = arith.constant 0 : index
    %c0_9 = arith.constant 0 : index
    %c0_10 = arith.constant 0 : index
    %7 = vector.load %arg3[%c0_7, %c0_8, %c0_9, %c0_10] : memref<2x5x5x128xbf16, #tpu.memory_space<vmem>>, vector<2x4x4x128xbf16>
    %8 = vector.shape_cast %7 : vector<2x4x4x128xbf16> to vector<32x128xbf16>
    %c1 = arith.constant 1 : index
    %c0_11 = arith.constant 0 : index
    %c0_12 = arith.constant 0 : index
    %9 = vector.load %arg6[%c1, %c0_11, %c0_12] : memref<9x128x128xbf16, #tpu.memory_space<vmem>>, vector<1x128x128xbf16>
    %10 = vector.shape_cast %9 : vector<1x128x128xbf16> to vector<128x128xbf16>
    %cst_13 = arith.constant dense<0.000000e+00> : vector<32x128xf32>
    %11 = tpu.matmul %8, %10, %cst_13 {dimension_numbers = #tpu.dot_dimension_numbers<[1], [0], [0], [1], [0, 0, 1, 1], [], []>} : vector<32x128xbf16>, vector<128x128xbf16>, vector<32x128xf32> -> vector<32x128xf32>
    %12 = arith.addf %6, %11 : vector<32x128xf32>
    %c0_14 = arith.constant 0 : index
    %c0_15 = arith.constant 0 : index
    %c1_16 = arith.constant 1 : index
    %c0_17 = arith.constant 0 : index
    %13 = vector.load %arg2[%c0_14, %c0_15, %c1_16, %c0_17] : memref<2x5x5x128xbf16, #tpu.memory_space<vmem>>, vector<2x4x4x128xbf16>
    %14 = vector.shape_cast %13 : vector<2x4x4x128xbf16> to vector<32x128xbf16>
    %c2 = arith.constant 2 : index
    %c0_18 = arith.constant 0 : index
    %c0_19 = arith.constant 0 : index
    %15 = vector.load %arg6[%c2, %c0_18, %c0_19] : memref<9x128x128xbf16, #tpu.memory_space<vmem>>, vector<1x128x128xbf16>
    %16 = vector.shape_cast %15 : vector<1x128x128xbf16> to vector<128x128xbf16>
    %cst_20 = arith.constant dense<0.000000e+00> : vector<32x128xf32>
    %17 = tpu.matmul %14, %16, %cst_20 {dimension_numbers = #tpu.dot_dimension_numbers<[1], [0], [0], [1], [0, 0, 1, 1], [], []>} : vector<32x128xbf16>, vector<128x128xbf16>, vector<32x128xf32> -> vector<32x128xf32>
    %18 = arith.addf %12, %17 : vector<32x128xf32>
    %c0_21 = arith.constant 0 : index
    %c0_22 = arith.constant 0 : index
    %c0_23 = arith.constant 0 : index
    %c0_24 = arith.constant 0 : index
    %19 = vector.load %arg4[%c0_21, %c0_22, %c0_23, %c0_24] : memref<2x5x5x128xbf16, #tpu.memory_space<vmem>>, vector<2x4x4x128xbf16>
    %20 = vector.shape_cast %19 : vector<2x4x4x128xbf16> to vector<32x128xbf16>
    %c3 = arith.constant 3 : index
    %c0_25 = arith.constant 0 : index
    %c0_26 = arith.constant 0 : index
    %21 = vector.load %arg6[%c3, %c0_25, %c0_26] : memref<9x128x128xbf16, #tpu.memory_space<vmem>>, vector<1x128x128xbf16>
    %22 = vector.shape_cast %21 : vector<1x128x128xbf16> to vector<128x128xbf16>
    %cst_27 = arith.constant dense<0.000000e+00> : vector<32x128xf32>
    %23 = tpu.matmul %20, %22, %cst_27 {dimension_numbers = #tpu.dot_dimension_numbers<[1], [0], [0], [1], [0, 0, 1, 1], [], []>} : vector<32x128xbf16>, vector<128x128xbf16>, vector<32x128xf32> -> vector<32x128xf32>
    %24 = arith.addf %18, %23 : vector<32x128xf32>
    %c0_28 = arith.constant 0 : index
    %c0_29 = arith.constant 0 : index
    %c0_30 = arith.constant 0 : index
    %c0_31 = arith.constant 0 : index
    %25 = vector.load %arg5[%c0_28, %c0_29, %c0_30, %c0_31] : memref<2x5x5x128xbf16, #tpu.memory_space<vmem>>, vector<2x4x4x128xbf16>
    %26 = vector.shape_cast %25 : vector<2x4x4x128xbf16> to vector<32x128xbf16>
    %c4 = arith.constant 4 : index
    %c0_32 = arith.constant 0 : index
    %c0_33 = arith.constant 0 : index
    %27 = vector.load %arg6[%c4, %c0_32, %c0_33] : memref<9x128x128xbf16, #tpu.memory_space<vmem>>, vector<1x128x128xbf16>
    %28 = vector.shape_cast %27 : vector<1x128x128xbf16> to vector<128x128xbf16>
    %cst_34 = arith.constant dense<0.000000e+00> : vector<32x128xf32>
    %29 = tpu.matmul %26, %28, %cst_34 {dimension_numbers = #tpu.dot_dimension_numbers<[1], [0], [0], [1], [0, 0, 1, 1], [], []>} : vector<32x128xbf16>, vector<128x128xbf16>, vector<32x128xf32> -> vector<32x128xf32>
    %30 = arith.addf %24, %29 : vector<32x128xf32>
    %c0_35 = arith.constant 0 : index
    %c0_36 = arith.constant 0 : index
    %c1_37 = arith.constant 1 : index
    %c0_38 = arith.constant 0 : index
    %31 = vector.load %arg4[%c0_35, %c0_36, %c1_37, %c0_38] : memref<2x5x5x128xbf16, #tpu.memory_space<vmem>>, vector<2x4x4x128xbf16>
    %32 = vector.shape_cast %31 : vector<2x4x4x128xbf16> to vector<32x128xbf16>
    %c5 = arith.constant 5 : index
    %c0_39 = arith.constant 0 : index
    %c0_40 = arith.constant 0 : index
    %33 = vector.load %arg6[%c5, %c0_39, %c0_40] : memref<9x128x128xbf16, #tpu.memory_space<vmem>>, vector<1x128x128xbf16>
    %34 = vector.shape_cast %33 : vector<1x128x128xbf16> to vector<128x128xbf16>
    %cst_41 = arith.constant dense<0.000000e+00> : vector<32x128xf32>
    %35 = tpu.matmul %32, %34, %cst_41 {dimension_numbers = #tpu.dot_dimension_numbers<[1], [0], [0], [1], [0, 0, 1, 1], [], []>} : vector<32x128xbf16>, vector<128x128xbf16>, vector<32x128xf32> -> vector<32x128xf32>
    %36 = arith.addf %30, %35 : vector<32x128xf32>
    %c0_42 = arith.constant 0 : index
    %c1_43 = arith.constant 1 : index
    %c0_44 = arith.constant 0 : index
    %c0_45 = arith.constant 0 : index
    %37 = vector.load %arg2[%c0_42, %c1_43, %c0_44, %c0_45] : memref<2x5x5x128xbf16, #tpu.memory_space<vmem>>, vector<2x4x4x128xbf16>
    %38 = vector.shape_cast %37 : vector<2x4x4x128xbf16> to vector<32x128xbf16>
    %c6 = arith.constant 6 : index
    %c0_46 = arith.constant 0 : index
    %c0_47 = arith.constant 0 : index
    %39 = vector.load %arg6[%c6, %c0_46, %c0_47] : memref<9x128x128xbf16, #tpu.memory_space<vmem>>, vector<1x128x128xbf16>
    %40 = vector.shape_cast %39 : vector<1x128x128xbf16> to vector<128x128xbf16>
    %cst_48 = arith.constant dense<0.000000e+00> : vector<32x128xf32>
    %41 = tpu.matmul %38, %40, %cst_48 {dimension_numbers = #tpu.dot_dimension_numbers<[1], [0], [0], [1], [0, 0, 1, 1], [], []>} : vector<32x128xbf16>, vector<128x128xbf16>, vector<32x128xf32> -> vector<32x128xf32>
    %42 = arith.addf %36, %41 : vector<32x128xf32>
    %c0_49 = arith.constant 0 : index
    %c1_50 = arith.constant 1 : index
    %c0_51 = arith.constant 0 : index
    %c0_52 = arith.constant 0 : index
    %43 = vector.load %arg3[%c0_49, %c1_50, %c0_51, %c0_52] : memref<2x5x5x128xbf16, #tpu.memory_space<vmem>>, vector<2x4x4x128xbf16>
    %44 = vector.shape_cast %43 : vector<2x4x4x128xbf16> to vector<32x128xbf16>
    %c7 = arith.constant 7 : index
    %c0_53 = arith.constant 0 : index
    %c0_54 = arith.constant 0 : index
    %45 = vector.load %arg6[%c7, %c0_53, %c0_54] : memref<9x128x128xbf16, #tpu.memory_space<vmem>>, vector<1x128x128xbf16>
    %46 = vector.shape_cast %45 : vector<1x128x128xbf16> to vector<128x128xbf16>
    %cst_55 = arith.constant dense<0.000000e+00> : vector<32x128xf32>
    %47 = tpu.matmul %44, %46, %cst_55 {dimension_numbers = #tpu.dot_dimension_numbers<[1], [0], [0], [1], [0, 0, 1, 1], [], []>} : vector<32x128xbf16>, vector<128x128xbf16>, vector<32x128xf32> -> vector<32x128xf32>
    %48 = arith.addf %42, %47 : vector<32x128xf32>
    %c0_56 = arith.constant 0 : index
    %c1_57 = arith.constant 1 : index
    %c1_58 = arith.constant 1 : index
    %c0_59 = arith.constant 0 : index
    %49 = vector.load %arg2[%c0_56, %c1_57, %c1_58, %c0_59] : memref<2x5x5x128xbf16, #tpu.memory_space<vmem>>, vector<2x4x4x128xbf16>
    %50 = vector.shape_cast %49 : vector<2x4x4x128xbf16> to vector<32x128xbf16>
    %c8 = arith.constant 8 : index
    %c0_60 = arith.constant 0 : index
    %c0_61 = arith.constant 0 : index
    %51 = vector.load %arg6[%c8, %c0_60, %c0_61] : memref<9x128x128xbf16, #tpu.memory_space<vmem>>, vector<1x128x128xbf16>
    %52 = vector.shape_cast %51 : vector<1x128x128xbf16> to vector<128x128xbf16>
    %cst_62 = arith.constant dense<0.000000e+00> : vector<32x128xf32>
    %53 = tpu.matmul %50, %52, %cst_62 {dimension_numbers = #tpu.dot_dimension_numbers<[1], [0], [0], [1], [0, 0, 1, 1], [], []>} : vector<32x128xbf16>, vector<128x128xbf16>, vector<32x128xf32> -> vector<32x128xf32>
    %54 = arith.addf %48, %53 : vector<32x128xf32>
    %c0_63 = arith.constant 0 : index
    %c0_64 = arith.constant 0 : index
    %55 = vector.load %arg7[%c0_63, %c0_64] : memref<1x128xf32, #tpu.memory_space<vmem>>, vector<1x128xf32>
    %56 = vector.shape_cast %55 : vector<1x128xf32> to vector<128xf32>
    %57 = vector.shape_cast %56 : vector<128xf32> to vector<1x128xf32>
    %58 = vector.broadcast %57 : vector<1x128xf32> to vector<32x128xf32>
    %59 = arith.addf %54, %58 : vector<32x128xf32>
    %cst_65 = arith.constant 0.000000e+00 : f32
    %60 = vector.broadcast %cst_65 : f32 to vector<32x128xf32>
    %61 = arith.cmpf oge, %59, %60 : vector<32x128xf32>
    %cst_66 = arith.constant 2.000000e-01 : f32
    %62 = vector.broadcast %cst_66 : f32 to vector<32x128xf32>
    %63 = arith.mulf %62, %59 : vector<32x128xf32>
    %64 = arith.select %61, %59, %63 : vector<32x128xi1>, vector<32x128xf32>
    %cst_67 = arith.constant 0.235702261 : f32
    %65 = vector.broadcast %cst_67 : f32 to vector<32x128xf32>
    %66 = arith.mulf %64, %65 : vector<32x128xf32>
    %67 = vector.shape_cast %66 : vector<32x128xf32> to vector<2x4x4x128xf32>
    %68 = arith.truncf %67 : vector<2x4x4x128xf32> to vector<2x4x4x128xbf16>
    %c0_68 = arith.constant 0 : index
    %c0_69 = arith.constant 0 : index
    %c0_70 = arith.constant 0 : index
    %c0_71 = arith.constant 0 : index
    %69 = vector.load %arg8[%c0_68, %c0_69, %c0_70, %c0_71] : memref<2x4x4x128xbf16, #tpu.memory_space<vmem>>, vector<2x4x4x128xbf16>
    tpu.vector_store %arg8[%c0_68, %c0_69, %c0_70, %c0_71], %68 {strides = array<i32>} : memref<2x4x4x128xbf16, #tpu.memory_space<vmem>>, vector<2x4x4x128xbf16>,
    return
  }
  func.func @transform_0(%arg0: i32, %arg1: i32) -> (i32, i32, i32, i32) {
    %c0_i32 = arith.constant 0 : i32
    %c0_i32_0 = arith.constant 0 : i32
    %c0_i32_1 = arith.constant 0 : i32
    %c0_i32_2 = arith.constant 0 : i32
    return %arg0, %c0_i32, %c0_i32_0, %c0_i32_1 : i32, i32, i32, i32
  }
  func.func @transform_1(%arg0: i32, %arg1: i32) -> (i32, i32, i32, i32) {
    %c0_i32 = arith.constant 0 : i32
    %c0_i32_0 = arith.constant 0 : i32
    %c0_i32_1 = arith.constant 0 : i32
    %c0_i32_2 = arith.constant 0 : i32
    return %arg0, %c0_i32, %c0_i32_0, %c0_i32_1 : i32, i32, i32, i32
  }
  func.func @transform_2(%arg0: i32, %arg1: i32) -> (i32, i32, i32, i32) {
    %c0_i32 = arith.constant 0 : i32
    %c0_i32_0 = arith.constant 0 : i32
    %c0_i32_1 = arith.constant 0 : i32
    %c0_i32_2 = arith.constant 0 : i32
    return %arg0, %c0_i32, %c0_i32_0, %c0_i32_1 : i32, i32, i32, i32
  }
  func.func @transform_3(%arg0: i32, %arg1: i32) -> (i32, i32, i32, i32) {
    %c0_i32 = arith.constant 0 : i32
    %c0_i32_0 = arith.constant 0 : i32
    %c0_i32_1 = arith.constant 0 : i32
    %c0_i32_2 = arith.constant 0 : i32
    return %arg0, %c0_i32, %c0_i32_0, %c0_i32_1 : i32, i32, i32, i32
  }
  func.func @transform_4(%arg0: i32, %arg1: i32) -> (i32, i32, i32) {
    %c0_i32 = arith.constant 0 : i32
    %c0_i32_0 = arith.constant 0 : i32
    %c0_i32_1 = arith.constant 0 : i32
    return %c0_i32, %c0_i32_0, %arg1 : i32, i32, i32
  }
  func.func @transform_5(%arg0: i32, %arg1: i32) -> (i32, i32) {
    %c0_i32 = arith.constant 0 : i32
    %c0_i32_0 = arith.constant 0 : i32
    return %c0_i32, %arg1 : i32, i32
  }
  func.func @transform_6(%arg0: i32, %arg1: i32) -> (i32, i32, i32, i32) {
    %c0_i32 = arith.constant 0 : i32
    %c0_i32_0 = arith.constant 0 : i32
    %c0_i32_1 = arith.constant 0 : i32
    return %arg0, %c0_i32, %c0_i32_0, %arg1 : i32, i32, i32, i32
  }
}

module attributes {stable_mosaic.version = 11 : i64} {
  func.func @conv_pool_fc_kernel(%arg0: i32, %arg1: memref<2x3x3x128xbf16, #tpu.memory_space<vmem>>, %arg2: memref<2x3x3x128xbf16, #tpu.memory_space<vmem>>, %arg3: memref<2x3x3x128xbf16, #tpu.memory_space<vmem>>, %arg4: memref<2x3x3x128xbf16, #tpu.memory_space<vmem>>, %arg5: memref<9x128x128xbf16, #tpu.memory_space<vmem>>, %arg6: memref<1x128xf32, #tpu.memory_space<vmem>>, %arg7: memref<128x128xf32, #tpu.memory_space<vmem>>, %arg8: memref<1x128xf32, #tpu.memory_space<vmem>>, %arg9: memref<2x1x128xf32, #tpu.memory_space<vmem>>) attributes {dimension_semantics = [#tpu.dimension_semantics<parallel>], iteration_bounds = array<i64: 1>, scalar_prefetch = 0 : i64, scratch_operands = 0 : i64, tpu.core_type = #tpu.core_type<tc>, window_params = [{transform_indices = @transform_0, window_bounds = array<i64: 2, 3, 3, 128>}, {transform_indices = @transform_1, window_bounds = array<i64: 2, 3, 3, 128>}, {transform_indices = @transform_2, window_bounds = array<i64: 2, 3, 3, 128>}, {transform_indices = @transform_3, window_bounds = array<i64: 2, 3, 3, 128>}, {pipeline_mode = #tpu.pipeline_mode<synchronous>, transform_indices = @transform_4, window_bounds = array<i64: 9, 128, 128>}, {pipeline_mode = #tpu.pipeline_mode<synchronous>, transform_indices = @transform_5, window_bounds = array<i64: 1, 128>}, {pipeline_mode = #tpu.pipeline_mode<synchronous>, transform_indices = @transform_6, window_bounds = array<i64: 128, 128>}, {pipeline_mode = #tpu.pipeline_mode<synchronous>, transform_indices = @transform_7, window_bounds = array<i64: 1, 128>}, {transform_indices = @transform_8, window_bounds = array<i64: 2, 1, 128>}]} {
    %cst = arith.constant 0.000000e+00 : f32
    %0 = vector.broadcast %cst : f32 to vector<8x128xf32>
    %c0 = arith.constant 0 : index
    %c0_0 = arith.constant 0 : index
    %c0_1 = arith.constant 0 : index
    %c0_2 = arith.constant 0 : index
    %1 = vector.load %arg1[%c0, %c0_0, %c0_1, %c0_2] : memref<2x3x3x128xbf16, #tpu.memory_space<vmem>>, vector<2x2x2x128xbf16>
    %2 = vector.shape_cast %1 : vector<2x2x2x128xbf16> to vector<8x128xbf16>
    %c0_3 = arith.constant 0 : index
    %c0_4 = arith.constant 0 : index
    %c0_5 = arith.constant 0 : index
    %3 = vector.load %arg5[%c0_3, %c0_4, %c0_5] : memref<9x128x128xbf16, #tpu.memory_space<vmem>>, vector<1x128x128xbf16>
    %4 = vector.shape_cast %3 : vector<1x128x128xbf16> to vector<128x128xbf16>
    %cst_6 = arith.constant dense<0.000000e+00> : vector<8x128xf32>
    %5 = tpu.matmul %2, %4, %cst_6 {dimension_numbers = #tpu.dot_dimension_numbers<[1], [0], [0], [1], [0, 0, 1, 1], [], []>} : vector<8x128xbf16>, vector<128x128xbf16>, vector<8x128xf32> -> vector<8x128xf32>
    %6 = arith.addf %0, %5 : vector<8x128xf32>
    %c0_7 = arith.constant 0 : index
    %c0_8 = arith.constant 0 : index
    %c0_9 = arith.constant 0 : index
    %c0_10 = arith.constant 0 : index
    %7 = vector.load %arg2[%c0_7, %c0_8, %c0_9, %c0_10] : memref<2x3x3x128xbf16, #tpu.memory_space<vmem>>, vector<2x2x2x128xbf16>
    %8 = vector.shape_cast %7 : vector<2x2x2x128xbf16> to vector<8x128xbf16>
    %c1 = arith.constant 1 : index
    %c0_11 = arith.constant 0 : index
    %c0_12 = arith.constant 0 : index
    %9 = vector.load %arg5[%c1, %c0_11, %c0_12] : memref<9x128x128xbf16, #tpu.memory_space<vmem>>, vector<1x128x128xbf16>
    %10 = vector.shape_cast %9 : vector<1x128x128xbf16> to vector<128x128xbf16>
    %cst_13 = arith.constant dense<0.000000e+00> : vector<8x128xf32>
    %11 = tpu.matmul %8, %10, %cst_13 {dimension_numbers = #tpu.dot_dimension_numbers<[1], [0], [0], [1], [0, 0, 1, 1], [], []>} : vector<8x128xbf16>, vector<128x128xbf16>, vector<8x128xf32> -> vector<8x128xf32>
    %12 = arith.addf %6, %11 : vector<8x128xf32>
    %c0_14 = arith.constant 0 : index
    %c0_15 = arith.constant 0 : index
    %c1_16 = arith.constant 1 : index
    %c0_17 = arith.constant 0 : index
    %13 = vector.load %arg1[%c0_14, %c0_15, %c1_16, %c0_17] : memref<2x3x3x128xbf16, #tpu.memory_space<vmem>>, vector<2x2x2x128xbf16>
    %14 = vector.shape_cast %13 : vector<2x2x2x128xbf16> to vector<8x128xbf16>
    %c2 = arith.constant 2 : index
    %c0_18 = arith.constant 0 : index
    %c0_19 = arith.constant 0 : index
    %15 = vector.load %arg5[%c2, %c0_18, %c0_19] : memref<9x128x128xbf16, #tpu.memory_space<vmem>>, vector<1x128x128xbf16>
    %16 = vector.shape_cast %15 : vector<1x128x128xbf16> to vector<128x128xbf16>
    %cst_20 = arith.constant dense<0.000000e+00> : vector<8x128xf32>
    %17 = tpu.matmul %14, %16, %cst_20 {dimension_numbers = #tpu.dot_dimension_numbers<[1], [0], [0], [1], [0, 0, 1, 1], [], []>} : vector<8x128xbf16>, vector<128x128xbf16>, vector<8x128xf32> -> vector<8x128xf32>
    %18 = arith.addf %12, %17 : vector<8x128xf32>
    %c0_21 = arith.constant 0 : index
    %c0_22 = arith.constant 0 : index
    %c0_23 = arith.constant 0 : index
    %c0_24 = arith.constant 0 : index
    %19 = vector.load %arg3[%c0_21, %c0_22, %c0_23, %c0_24] : memref<2x3x3x128xbf16, #tpu.memory_space<vmem>>, vector<2x2x2x128xbf16>
    %20 = vector.shape_cast %19 : vector<2x2x2x128xbf16> to vector<8x128xbf16>
    %c3 = arith.constant 3 : index
    %c0_25 = arith.constant 0 : index
    %c0_26 = arith.constant 0 : index
    %21 = vector.load %arg5[%c3, %c0_25, %c0_26] : memref<9x128x128xbf16, #tpu.memory_space<vmem>>, vector<1x128x128xbf16>
    %22 = vector.shape_cast %21 : vector<1x128x128xbf16> to vector<128x128xbf16>
    %cst_27 = arith.constant dense<0.000000e+00> : vector<8x128xf32>
    %23 = tpu.matmul %20, %22, %cst_27 {dimension_numbers = #tpu.dot_dimension_numbers<[1], [0], [0], [1], [0, 0, 1, 1], [], []>} : vector<8x128xbf16>, vector<128x128xbf16>, vector<8x128xf32> -> vector<8x128xf32>
    %24 = arith.addf %18, %23 : vector<8x128xf32>
    %c0_28 = arith.constant 0 : index
    %c0_29 = arith.constant 0 : index
    %c0_30 = arith.constant 0 : index
    %c0_31 = arith.constant 0 : index
    %25 = vector.load %arg4[%c0_28, %c0_29, %c0_30, %c0_31] : memref<2x3x3x128xbf16, #tpu.memory_space<vmem>>, vector<2x2x2x128xbf16>
    %26 = vector.shape_cast %25 : vector<2x2x2x128xbf16> to vector<8x128xbf16>
    %c4 = arith.constant 4 : index
    %c0_32 = arith.constant 0 : index
    %c0_33 = arith.constant 0 : index
    %27 = vector.load %arg5[%c4, %c0_32, %c0_33] : memref<9x128x128xbf16, #tpu.memory_space<vmem>>, vector<1x128x128xbf16>
    %28 = vector.shape_cast %27 : vector<1x128x128xbf16> to vector<128x128xbf16>
    %cst_34 = arith.constant dense<0.000000e+00> : vector<8x128xf32>
    %29 = tpu.matmul %26, %28, %cst_34 {dimension_numbers = #tpu.dot_dimension_numbers<[1], [0], [0], [1], [0, 0, 1, 1], [], []>} : vector<8x128xbf16>, vector<128x128xbf16>, vector<8x128xf32> -> vector<8x128xf32>
    %30 = arith.addf %24, %29 : vector<8x128xf32>
    %c0_35 = arith.constant 0 : index
    %c0_36 = arith.constant 0 : index
    %c1_37 = arith.constant 1 : index
    %c0_38 = arith.constant 0 : index
    %31 = vector.load %arg3[%c0_35, %c0_36, %c1_37, %c0_38] : memref<2x3x3x128xbf16, #tpu.memory_space<vmem>>, vector<2x2x2x128xbf16>
    %32 = vector.shape_cast %31 : vector<2x2x2x128xbf16> to vector<8x128xbf16>
    %c5 = arith.constant 5 : index
    %c0_39 = arith.constant 0 : index
    %c0_40 = arith.constant 0 : index
    %33 = vector.load %arg5[%c5, %c0_39, %c0_40] : memref<9x128x128xbf16, #tpu.memory_space<vmem>>, vector<1x128x128xbf16>
    %34 = vector.shape_cast %33 : vector<1x128x128xbf16> to vector<128x128xbf16>
    %cst_41 = arith.constant dense<0.000000e+00> : vector<8x128xf32>
    %35 = tpu.matmul %32, %34, %cst_41 {dimension_numbers = #tpu.dot_dimension_numbers<[1], [0], [0], [1], [0, 0, 1, 1], [], []>} : vector<8x128xbf16>, vector<128x128xbf16>, vector<8x128xf32> -> vector<8x128xf32>
    %36 = arith.addf %30, %35 : vector<8x128xf32>
    %c0_42 = arith.constant 0 : index
    %c1_43 = arith.constant 1 : index
    %c0_44 = arith.constant 0 : index
    %c0_45 = arith.constant 0 : index
    %37 = vector.load %arg1[%c0_42, %c1_43, %c0_44, %c0_45] : memref<2x3x3x128xbf16, #tpu.memory_space<vmem>>, vector<2x2x2x128xbf16>
    %38 = vector.shape_cast %37 : vector<2x2x2x128xbf16> to vector<8x128xbf16>
    %c6 = arith.constant 6 : index
    %c0_46 = arith.constant 0 : index
    %c0_47 = arith.constant 0 : index
    %39 = vector.load %arg5[%c6, %c0_46, %c0_47] : memref<9x128x128xbf16, #tpu.memory_space<vmem>>, vector<1x128x128xbf16>
    %40 = vector.shape_cast %39 : vector<1x128x128xbf16> to vector<128x128xbf16>
    %cst_48 = arith.constant dense<0.000000e+00> : vector<8x128xf32>
    %41 = tpu.matmul %38, %40, %cst_48 {dimension_numbers = #tpu.dot_dimension_numbers<[1], [0], [0], [1], [0, 0, 1, 1], [], []>} : vector<8x128xbf16>, vector<128x128xbf16>, vector<8x128xf32> -> vector<8x128xf32>
    %42 = arith.addf %36, %41 : vector<8x128xf32>
    %c0_49 = arith.constant 0 : index
    %c1_50 = arith.constant 1 : index
    %c0_51 = arith.constant 0 : index
    %c0_52 = arith.constant 0 : index
    %43 = vector.load %arg2[%c0_49, %c1_50, %c0_51, %c0_52] : memref<2x3x3x128xbf16, #tpu.memory_space<vmem>>, vector<2x2x2x128xbf16>
    %44 = vector.shape_cast %43 : vector<2x2x2x128xbf16> to vector<8x128xbf16>
    %c7 = arith.constant 7 : index
    %c0_53 = arith.constant 0 : index
    %c0_54 = arith.constant 0 : index
    %45 = vector.load %arg5[%c7, %c0_53, %c0_54] : memref<9x128x128xbf16, #tpu.memory_space<vmem>>, vector<1x128x128xbf16>
    %46 = vector.shape_cast %45 : vector<1x128x128xbf16> to vector<128x128xbf16>
    %cst_55 = arith.constant dense<0.000000e+00> : vector<8x128xf32>
    %47 = tpu.matmul %44, %46, %cst_55 {dimension_numbers = #tpu.dot_dimension_numbers<[1], [0], [0], [1], [0, 0, 1, 1], [], []>} : vector<8x128xbf16>, vector<128x128xbf16>, vector<8x128xf32> -> vector<8x128xf32>
    %48 = arith.addf %42, %47 : vector<8x128xf32>
    %c0_56 = arith.constant 0 : index
    %c1_57 = arith.constant 1 : index
    %c1_58 = arith.constant 1 : index
    %c0_59 = arith.constant 0 : index
    %49 = vector.load %arg1[%c0_56, %c1_57, %c1_58, %c0_59] : memref<2x3x3x128xbf16, #tpu.memory_space<vmem>>, vector<2x2x2x128xbf16>
    %50 = vector.shape_cast %49 : vector<2x2x2x128xbf16> to vector<8x128xbf16>
    %c8 = arith.constant 8 : index
    %c0_60 = arith.constant 0 : index
    %c0_61 = arith.constant 0 : index
    %51 = vector.load %arg5[%c8, %c0_60, %c0_61] : memref<9x128x128xbf16, #tpu.memory_space<vmem>>, vector<1x128x128xbf16>
    %52 = vector.shape_cast %51 : vector<1x128x128xbf16> to vector<128x128xbf16>
    %cst_62 = arith.constant dense<0.000000e+00> : vector<8x128xf32>
    %53 = tpu.matmul %50, %52, %cst_62 {dimension_numbers = #tpu.dot_dimension_numbers<[1], [0], [0], [1], [0, 0, 1, 1], [], []>} : vector<8x128xbf16>, vector<128x128xbf16>, vector<8x128xf32> -> vector<8x128xf32>
    %54 = arith.addf %48, %53 : vector<8x128xf32>
    %c0_63 = arith.constant 0 : index
    %c0_64 = arith.constant 0 : index
    %55 = vector.load %arg6[%c0_63, %c0_64] : memref<1x128xf32, #tpu.memory_space<vmem>>, vector<1x128xf32>
    %56 = vector.shape_cast %55 : vector<1x128xf32> to vector<128xf32>
    %57 = vector.shape_cast %56 : vector<128xf32> to vector<1x128xf32>
    %58 = vector.broadcast %57 : vector<1x128xf32> to vector<8x128xf32>
    %59 = arith.addf %54, %58 : vector<8x128xf32>
    %cst_65 = arith.constant 0.000000e+00 : f32
    %60 = vector.broadcast %cst_65 : f32 to vector<8x128xf32>
    %61 = arith.cmpf oge, %59, %60 : vector<8x128xf32>
    %cst_66 = arith.constant 2.000000e-01 : f32
    %62 = vector.broadcast %cst_66 : f32 to vector<8x128xf32>
    %63 = arith.mulf %62, %59 : vector<8x128xf32>
    %64 = arith.select %61, %59, %63 : vector<8x128xi1>, vector<8x128xf32>
    %cst_67 = arith.constant 0.235702261 : f32
    %65 = vector.broadcast %cst_67 : f32 to vector<8x128xf32>
    %66 = arith.mulf %64, %65 : vector<8x128xf32>
    %67 = vector.shape_cast %66 : vector<8x128xf32> to vector<2x4x128xf32>
    %cst_68 = arith.constant dense<0.000000e+00> : vector<2x128xf32>
    %68 = vector.multi_reduction <add>, %67, %cst_68 [1] : vector<2x4x128xf32> to vector<2x128xf32>
    %cst_69 = arith.constant 4.000000e+00 : f32
    %69 = vector.broadcast %cst_69 : f32 to vector<2x128xf32>
    %70 = arith.divf %68, %69 : vector<2x128xf32>
    %c0_70 = arith.constant 0 : index
    %c0_71 = arith.constant 0 : index
    %71 = vector.load %arg7[%c0_70, %c0_71] : memref<128x128xf32, #tpu.memory_space<vmem>>, vector<128x128xf32>
    %cst_72 = arith.constant dense<0.000000e+00> : vector<2x128xf32>
    %72 = tpu.matmul %70, %71, %cst_72 {dimension_numbers = #tpu.dot_dimension_numbers<[1], [0], [0], [1], [0, 0, 1, 1], [], []>} : vector<2x128xf32>, vector<128x128xf32>, vector<2x128xf32> -> vector<2x128xf32>
    %c0_73 = arith.constant 0 : index
    %c0_74 = arith.constant 0 : index
    %73 = vector.load %arg8[%c0_73, %c0_74] : memref<1x128xf32, #tpu.memory_space<vmem>>, vector<1x128xf32>
    %74 = vector.shape_cast %73 : vector<1x128xf32> to vector<128xf32>
    %75 = vector.shape_cast %74 : vector<128xf32> to vector<1x128xf32>
    %76 = vector.broadcast %75 : vector<1x128xf32> to vector<2x128xf32>
    %77 = arith.addf %72, %76 : vector<2x128xf32>
    %cst_75 = arith.constant 0.000000e+00 : f32
    %78 = vector.broadcast %cst_75 : f32 to vector<2x128xf32>
    %79 = arith.cmpf oge, %77, %78 : vector<2x128xf32>
    %cst_76 = arith.constant 2.000000e-01 : f32
    %80 = vector.broadcast %cst_76 : f32 to vector<2x128xf32>
    %81 = arith.mulf %80, %77 : vector<2x128xf32>
    %82 = arith.select %79, %77, %81 : vector<2x128xi1>, vector<2x128xf32>
    %cst_77 = arith.constant 0.707106769 : f32
    %83 = vector.broadcast %cst_77 : f32 to vector<2x128xf32>
    %84 = arith.mulf %82, %83 : vector<2x128xf32>
    %85 = vector.shape_cast %84 : vector<2x128xf32> to vector<2x1x128xf32>
    %c0_78 = arith.constant 0 : index
    %c0_79 = arith.constant 0 : index
    %c0_80 = arith.constant 0 : index
    %86 = vector.load %arg9[%c0_78, %c0_79, %c0_80] : memref<2x1x128xf32, #tpu.memory_space<vmem>>, vector<2x1x128xf32>
    tpu.vector_store %arg9[%c0_78, %c0_79, %c0_80], %85 {strides = array<i32>} : memref<2x1x128xf32, #tpu.memory_space<vmem>>, vector<2x1x128xf32>,
    return
  }
  func.func @transform_0(%arg0: i32) -> (i32, i32, i32, i32) {
    %c0_i32 = arith.constant 0 : i32
    %c0_i32_0 = arith.constant 0 : i32
    %c0_i32_1 = arith.constant 0 : i32
    %c0_i32_2 = arith.constant 0 : i32
    return %arg0, %c0_i32, %c0_i32_0, %c0_i32_1 : i32, i32, i32, i32
  }
  func.func @transform_1(%arg0: i32) -> (i32, i32, i32, i32) {
    %c0_i32 = arith.constant 0 : i32
    %c0_i32_0 = arith.constant 0 : i32
    %c0_i32_1 = arith.constant 0 : i32
    %c0_i32_2 = arith.constant 0 : i32
    return %arg0, %c0_i32, %c0_i32_0, %c0_i32_1 : i32, i32, i32, i32
  }
  func.func @transform_2(%arg0: i32) -> (i32, i32, i32, i32) {
    %c0_i32 = arith.constant 0 : i32
    %c0_i32_0 = arith.constant 0 : i32
    %c0_i32_1 = arith.constant 0 : i32
    %c0_i32_2 = arith.constant 0 : i32
    return %arg0, %c0_i32, %c0_i32_0, %c0_i32_1 : i32, i32, i32, i32
  }
  func.func @transform_3(%arg0: i32) -> (i32, i32, i32, i32) {
    %c0_i32 = arith.constant 0 : i32
    %c0_i32_0 = arith.constant 0 : i32
    %c0_i32_1 = arith.constant 0 : i32
    %c0_i32_2 = arith.constant 0 : i32
    return %arg0, %c0_i32, %c0_i32_0, %c0_i32_1 : i32, i32, i32, i32
  }
  func.func @transform_4(%arg0: i32) -> (i32, i32, i32) {
    %c0_i32 = arith.constant 0 : i32
    %c0_i32_0 = arith.constant 0 : i32
    %c0_i32_1 = arith.constant 0 : i32
    %c0_i32_2 = arith.constant 0 : i32
    return %c0_i32, %c0_i32_0, %c0_i32_1 : i32, i32, i32
  }
  func.func @transform_5(%arg0: i32) -> (i32, i32) {
    %c0_i32 = arith.constant 0 : i32
    %c0_i32_0 = arith.constant 0 : i32
    %c0_i32_1 = arith.constant 0 : i32
    return %c0_i32, %c0_i32_0 : i32, i32
  }
  func.func @transform_6(%arg0: i32) -> (i32, i32) {
    %c0_i32 = arith.constant 0 : i32
    %c0_i32_0 = arith.constant 0 : i32
    %c0_i32_1 = arith.constant 0 : i32
    return %c0_i32, %c0_i32_0 : i32, i32
  }
  func.func @transform_7(%arg0: i32) -> (i32, i32) {
    %c0_i32 = arith.constant 0 : i32
    %c0_i32_0 = arith.constant 0 : i32
    %c0_i32_1 = arith.constant 0 : i32
    return %c0_i32, %c0_i32_0 : i32, i32
  }
  func.func @transform_8(%arg0: i32) -> (i32, i32, i32) {
    %c0_i32 = arith.constant 0 : i32
    %c0_i32_0 = arith.constant 0 : i32
    %c0_i32_1 = arith.constant 0 : i32
    return %arg0, %c0_i32, %c0_i32_0 : i32, i32, i32
  }
}

</mosaic_0001>

<bundles_post_ra>
// kernel: to_style_forward.3
= control target key start
LH: loop header
LB: loop body
LE: loop exit
PB: predicated region body
PF: predicated region fallthrough
CT: control target
= control target key end

     0   :  { %11 = vsyncpa [#allocation3], 0  ;;  %s4469_s0 = inlined_call_operand.hbm [shape: bf16[2,9,9,128], index: 0, kind: input, shape index: {}]   ;;  %s4470_s1 = inlined_call_operand.hbm [shape: bf16[2,9,9,128], index: 1, kind: input, shape index: {}]   ;;  %s4471_s2 = inlined_call_operand.hbm [shape: bf16[2,9,9,128], index: 2, kind: input, shape index: {}]   ;;  %s4472_s3 = inlined_call_operand.hbm [shape: bf16[2,9,9,128], index: 3, kind: input, shape index: {}]   ;;  %s4473_s4 = inlined_call_operand.hbm [shape: bf16[9,128,128], index: 4, kind: input, shape index: {}]   ;;  %s4474_s5 = inlined_call_operand.hbm [shape: f32[1,128], index: 5, kind: input, shape index: {}]   ;;  %s4475_s6 = inlined_call_operand.hbm [shape: bf16[2,8,8,128], index: 6, kind: output, shape index: {}]  }
   0x1   :  { %12 = vsyncpa [#allocation6], 0 }
   0x2   :  { %13 = vsyncpa [#allocation9], 0 }
   0x3   :  { %14 = vsyncpa [#allocation12], 0 }
   0x4   :  { %15 = vsyncpa [#allocation4], 0  ;;  %s4127_s21 = smov [#allocation5]   ;;  %s4128_s23 = smov [#allocation8]  }
   0x5   :  { %s33_s22 = sshll.u32 %s4127_s21, 4  ;;  %s57_s24 = sshll.u32 %s4128_s23, 4  ;;  %s34_s22 = int_to_ptr.vmem [resolvable:$true] %s33_s22  ;;  %s4171_s24 = int_to_ptr.vmem [resolvable:$true] %s57_s24 }
   0x6   :  { %s3963_s27 = scalar_lea.hbm %s4470_s1, 2304 }
   0x7   :  { %p3964_p0 = scmp.ne.s32.totalorder %s4470_s1, %s3963_s27  ;;  %p3967_p1 = scmp.lt.u32.totalorder %s3963_s27, %s4470_s1 }
   0x9   :  { %p3969_p2 = pnand %p3967_p1, %p3964_p0 }
   0xb   :  { %3972 = shalt.err (!%p3969_p2)
}
   0xc   :  { %s3973_s8 = scalar_lea.vmem %s34_s22, 2304  ;;  %p3978_p4 = scmp.lt.s32.totalorder %s34_s22, %s34_s22 }
   0xd   :  { %p3974_p3 = scmp.ne.s32.totalorder %s34_s22, %s3973_s8  ;;  %p3979_p5 = scmp.lt.s32.totalorder %s3973_s8, %s3973_s8 }
   0xf   :  { %p3980_p6 = por %p3979_p5, %p3978_p4 }
  0x11   :  { %p3981_p7 = pnand %p3980_p6, %p3974_p3 }
  0x13   :  { %3984 = shalt.err (!%p3981_p7)
}
  0x14   :  { %s4129_s9 = smov 64   ;;  %s4130_s10 = smov 4  }
  0x15   :  { %39 = dma.hbm_to_vmem [thread:$0]  %s4470_s1, 2304, %s34_s22, [#allocation6], %s4129_s9, %s4129_s9, %s4130_s10  }
  0x16   :  { %s3985_s15 = scalar_lea.hbm %s4472_s3, 2304 }
  0x17   :  { %p3986_p8 = scmp.ne.s32.totalorder %s4472_s3, %s3985_s15  ;;  %p3989_p9 = scmp.lt.u32.totalorder %s3985_s15, %s4472_s3 }
  0x19   :  { %p3991_p10 = pnand %p3989_p9, %p3986_p8 }
  0x1b   :  { %3994 = shalt.err (!%p3991_p10)
}
  0x1c   :  { %s3995_s20 = scalar_lea.vmem %s4171_s24, 2304  ;;  %p4000_p12 = scmp.lt.s32.totalorder %s4171_s24, %s4171_s24 }
  0x1d   :  { %p3996_p11 = scmp.ne.s32.totalorder %s4171_s24, %s3995_s20  ;;  %p4001_p13 = scmp.lt.s32.totalorder %s3995_s20, %s3995_s20 }
  0x1f   :  { %p4002_p0 = por %p4001_p13, %p4000_p12 }
  0x21   :  { %p4003_p1 = pnand %p4002_p0, %p3996_p11 }
  0x23   :  { %4006 = shalt.err (!%p4003_p1)
}
  0x24   :  { %63 = dma.hbm_to_vmem [thread:$0]  %s4472_s3, 2304, %s4171_s24, [#allocation9], %s4129_s9, %s4129_s9, %s4130_s10  }
  0x25   :  { %s4131_s22 = smov [#allocation2]   ;;  %s4132_s25 = smov [#allocation7]  }
  0x26   :  { %s21_s23 = sshll.u32 %s4131_s22, 4  ;;  %s45_s26 = sshll.u32 %s4132_s25, 4  ;;  %s22_s23 = int_to_ptr.vmem [resolvable:$true] %s21_s23  ;;  %s4208_s26 = int_to_ptr.vmem [resolvable:$true] %s45_s26 }
  0x27   :  { %s4007_s29 = scalar_lea.hbm %s4469_s0, 2304 }
  0x28   :  { %p4008_p2 = scmp.ne.s32.totalorder %s4469_s0, %s4007_s29  ;;  %p4011_p3 = scmp.lt.u32.totalorder %s4007_s29, %s4469_s0 }
  0x2a   :  { %p4013_p4 = pnand %p4011_p3, %p4008_p2 }
  0x2c   :  { %4016 = shalt.err (!%p4013_p4)
}
  0x2d   :  { %s4017_s3 = scalar_lea.vmem %s22_s23, 2304  ;;  %p4022_p6 = scmp.lt.s32.totalorder %s22_s23, %s22_s23 }
  0x2e   :  { %p4018_p5 = scmp.ne.s32.totalorder %s22_s23, %s4017_s3  ;;  %p4023_p7 = scmp.lt.s32.totalorder %s4017_s3, %s4017_s3 }
  0x30   :  { %p4024_p8 = por %p4023_p7, %p4022_p6 }
  0x32   :  { %p4025_p9 = pnand %p4024_p8, %p4018_p5 }
  0x34   :  { %4028 = shalt.err (!%p4025_p9)
}
  0x35   :  { %27 = dma.hbm_to_vmem [thread:$0]  %s4469_s0, 2304, %s22_s23, [#allocation3], %s4129_s9, %s4129_s9, %s4130_s10  }
  0x36   :  { %s4029_s15 = scalar_lea.hbm %s4471_s2, 2304 }
  0x37   :  { %p4030_p10 = scmp.ne.s32.totalorder %s4471_s2, %s4029_s15  ;;  %p4033_p11 = scmp.lt.u32.totalorder %s4029_s15, %s4471_s2 }
  0x39   :  { %p4035_p12 = pnand %p4033_p11, %p4030_p10 }
  0x3b   :  { %4038 = shalt.err (!%p4035_p12)
}
  0x3c   :  { %s4039_s20 = scalar_lea.vmem %s4208_s26, 2304  ;;  %p4044_p0 = scmp.lt.s32.totalorder %s4208_s26, %s4208_s26 }
  0x3d   :  { %p4040_p13 = scmp.ne.s32.totalorder %s4208_s26, %s4039_s20  ;;  %p4045_p1 = scmp.lt.s32.totalorder %s4039_s20, %s4039_s20 }
  0x3f   :  { %p4046_p2 = por %p4045_p1, %p4044_p0 }
  0x41   :  { %p4047_p3 = pnand %p4046_p2, %p4040_p13 }
  0x43   :  { %4050 = shalt.err (!%p4047_p3)
}
  0x44   :  { %51 = dma.hbm_to_vmem [thread:$0]  %s4471_s2, 2304, %s4208_s26, [#allocation6], %s4129_s9, %s4129_s9, %s4130_s10  }
  0x45   :  { %s4133_s21 = smov [#allocation10]   ;;  %s4134_s23 = smov [#allocation11]  }
  0x46   :  { %s69_s22 = sshll.u32 %s4133_s21, 4  ;;  %s82_s25 = sshll.u32 %s4134_s23, 4  ;;  %s70_s22 = int_to_ptr.vmem [resolvable:$true] %s69_s22  ;;  %s83_s25 = int_to_ptr.vmem [resolvable:$true] %s82_s25 }
  0x47   :  { %s4051_s29 = scalar_lea.hbm %s4473_s4, 9216 }
  0x48   :  { %p4052_p4 = scmp.ne.s32.totalorder %s4473_s4, %s4051_s29  ;;  %p4055_p5 = scmp.lt.u32.totalorder %s4051_s29, %s4473_s4 }
  0x4a   :  { %p4057_p6 = pnand %p4055_p5, %p4052_p4 }
  0x4c   :  { %4060 = shalt.err (!%p4057_p6)
}
  0x4d   :  { %s4061_s2 = scalar_lea.vmem %s70_s22, 9216  ;;  %p4066_p8 = scmp.lt.s32.totalorder %s70_s22, %s70_s22 }
  0x4e   :  { %p4062_p7 = scmp.ne.s32.totalorder %s70_s22, %s4061_s2  ;;  %p4067_p9 = scmp.lt.s32.totalorder %s4061_s2, %s4061_s2 }
  0x50   :  { %p4068_p10 = por %p4067_p9, %p4066_p8 }
  0x52   :  { %p4069_p11 = pnand %p4068_p10, %p4062_p7 }
  0x54   :  { %4072 = shalt.err (!%p4069_p11)
}
  0x55   :  { %75 = dma.hbm_to_vmem [thread:$0]  %s4473_s4, 9216, %s70_s22, [#allocation9], %s4129_s9, %s4129_s9, %s4130_s10  }
  0x56   :  { %s4073_s13 = scalar_lea.hbm %s4474_s5, 16 }
  0x57   :  { %p4074_p12 = scmp.ne.s32.totalorder %s4474_s5, %s4073_s13  ;;  %p4077_p13 = scmp.lt.u32.totalorder %s4073_s13, %s4474_s5 }
  0x59   :  { %p4079_p0 = pnand %p4077_p13, %p4074_p12 }
  0x5b   :  { %4082 = shalt.err (!%p4079_p0)
}
  0x5c   :  { %s4083_s18 = scalar_lea.vmem %s83_s25, 16  ;;  %s4087_s19 = scalar_lea.vmem %s83_s25, 32 }
  0x5d   :  { %p4084_p1 = scmp.ne.s32.totalorder %s83_s25, %s4083_s18  ;;  %p4088_p2 = scmp.lt.s32.totalorder %s83_s25, %s83_s25 }
  0x5e   :  { %p4089_p3 = scmp.lt.s32.totalorder %s4087_s19, %s4083_s18 }
  0x60   :  { %p4090_p4 = por %p4089_p3, %p4088_p2 }
  0x62   :  { %p4091_p5 = pnand %p4090_p4, %p4084_p1 }
  0x64   :  { %4094 = shalt.err (!%p4091_p5)
}
  0x65   :  { %85 = dma.hbm_to_vmem [thread:$0]  %s4474_s5, 16, %s83_s25, [#allocation12]  }
  0x66   :  { %4117 = dma.done.wait [#allocation3], 2304  }
  0x67   :  { %4118 = vsyncadd [#allocation3], 4294964992 }
  0x68   :  { %4119 = dma.done.wait [#allocation6], 4608  }
  0x69   :  { %4120 = vsyncadd [#allocation6], 4294962688 }
  0x6a   :  { %4121 = dma.done.wait [#allocation9], 11520  }
  0x6b   :  { %4122 = vsyncadd [#allocation9], 4294955776 }
  0x6c   :  { %4123 = dma.done.wait [#allocation12], 16  }
  0x6d   :  { %4124 = vsyncadd [#allocation12], 4294967280  ;;  %v3843_v0 = vld [vmem:[#allocation10 + $0x40] sm:$0xff]   ;;  %v3845_v2 = vld [vmem:[#allocation10 + $0x48] sm:$0xff]   ;;  %vm588_vm0 = vsmask.f32 3328 }
  0x6e   :  { %v3844_v1 = vld [vmem:[#allocation10 + $0x100] sm:$0xff]   ;;  %3402 = vmatprep.subr.bf16.mxu1 %v3843_v0  ;;  %v3846_v3 = vld [vmem:[#allocation10 + $0x108] sm:$0xff]   ;;  %v3847_v4 = vld [vmem:[#allocation10 + $0x50] sm:$0xff]   ;;  %vm589_vm1 = vsmask.f32 7440  ;;  %s4135_s5 = smov [#allocation13]  }
  0x6f   :  { %3530 = vmatprep.subr.bf16.mxu0 %v3844_v1  ;;  %3403 = vmatpush3.bf16.msra.mxu1 %v3843_v0  ;;  %v3848_v5 = vld [vmem:[#allocation10 + $0x110] sm:$0xff]   ;;  %v3849_v6 = vld [vmem:[#allocation10 + $0x58] sm:$0xff]   ;;  %v3851_v8 = vld [vmem:[#allocation10 + $0x60] sm:$0xff]   ;;  %s3051_s0 = sshll.u32 %s4135_s5, 4  ;;  %s3052_s0 = int_to_ptr.vmem [resolvable:$true] %s3051_s0 }
  0x70   :  { %3531 = vmatpush3.bf16.msra.mxu0 %v3844_v1  ;;  %3404 = vmatprep.subr.bf16.mxu1 %v3845_v2  ;;  %v3850_v7 = vld [vmem:[#allocation10 + $0x118] sm:$0xff]   ;;  %v3852_v9 = vld [vmem:[#allocation10 + $0x120] sm:$0xff]   ;;  %v3853_v10 = vld [vmem:[#allocation10 + $0x68] sm:$0xff]   ;;  %s4095_s1 = scalar_lea.vmem %s3052_s0, 1024  ;;  %p4100_p7 = scmp.lt.s32.totalorder %s3052_s0, %s3052_s0 }
  0x71   :  { %3532 = vmatprep.subr.bf16.mxu0 %v3846_v3  ;;  %v3854_v11 = vld [vmem:[#allocation10 + $0x128] sm:$0xff]   ;;  %v3859_v12 = vld [vmem:[#allocation5] ss:$8 sps:$4 sm:$0xff]   ;;  %v3862_v19 = vld [vmem:[#allocation10] sm:$0xff]   ;;  %p4096_p6 = scmp.ne.s32.totalorder %s3052_s0, %s4095_s1  ;;  %p4101_p8 = scmp.lt.s32.totalorder %s4095_s1, %s4095_s1 }
  0x72   :  { %v3860_v13 = vld [vmem:[#allocation8] ss:$8 sps:$4 sm:$0xff]   ;;  %3418 = vmatprep.mubr.bf16.mxu1 %v3859_v12  ;;  %v3861_v18 = vld [vmem:[#allocation5 + $0x10] ss:$8 sps:$4 sm:$0xff]   ;;  %v1510_v43 = vld [vmem:[#allocation7 + $0x4] sm:$0x1] }
  0x73   :  { %3405 = vmatpush3.bf16.msra.mxu1 %v3845_v2  ;;  %3546 = vmatprep.mubr.bf16.mxu0 %v3860_v13  ;;  %v3855_v14 = vld [vmem:[#allocation10 + $0x70] sm:$0xff]   ;;  %v3857_v16 = vld [vmem:[#allocation10 + $0x78] sm:$0xff]   ;;  %v3864_v20 = vld [vmem:[#allocation10 + $0x140] sm:$0xff]   ;;  %v1551_v48 = vshll.u32 %v1510_v43, 16  ;;  %p4102_p9 = por %p4101_p8, %p4100_p7 }
  0x74   :  { %3533 = vmatpush3.bf16.msra.mxu0 %v3846_v3  ;;  %3406 = vmatprep.subr.bf16.mxu1 %v3847_v4  ;;  %v3856_v15 = vld [vmem:[#allocation10 + $0x130] sm:$0xff]   ;;  %v3858_v17 = vld [vmem:[#allocation10 + $0x138] sm:$0xff]   ;;  %v3863_v21 = vld [vmem:[#allocation8 + $0x10] ss:$8 sps:$4 sm:$0xff]  }
  0x75   :  { %3534 = vmatprep.subr.bf16.mxu0 %v3848_v5  ;;  %v3865_v22 = vld [vmem:[#allocation10 + $0x8] sm:$0xff]   ;;  %v3867_v24 = vld [vmem:[#allocation5 + $0x20] ss:$8 sps:$4 sm:$0xff]   ;;  %v3878_v35 = vld [vmem:[#allocation10 + $0x20] sm:$0xff]   ;;  %v1553_v62 = vrot.slane %v1551_v48, 5  ;;  %p4103_p10 = pnand %p4102_p9, %p4096_p6 }
  0x76   :  { %v3866_v23 = vld [vmem:[#allocation10 + $0x148] sm:$0xff]   ;;  %v3868_v25 = vld [vmem:[#allocation8 + $0x20] ss:$8 sps:$4 sm:$0xff]   ;;  %v3880_v37 = vld [vmem:[#allocation10 + $0x160] sm:$0xff]  }
  0x77   :  { %3407 = vmatpush3.bf16.msra.mxu1 %v3847_v4  ;;  %v3869_v26 = vld [vmem:[#allocation5 + $0x30] ss:$8 sps:$4 sm:$0xff]   ;;  %v3870_v27 = vld [vmem:[#allocation10 + $0x10] sm:$0xff]   ;;  %v3873_v30 = vld [vmem:[#allocation10 + $0x18] sm:$0xff]  }
  0x78   :  { %3535 = vmatpush3.bf16.msra.mxu0 %v3848_v5  ;;  %3408 = vmatprep.subr.bf16.mxu1 %v3849_v6  ;;  %v3872_v28 = vld [vmem:[#allocation10 + $0x150] sm:$0xff]   ;;  %v3871_v29 = vld [vmem:[#allocation8 + $0x30] ss:$8 sps:$4 sm:$0xff]   ;;  %v3874_v31 = vld [vmem:[#allocation10 + $0x158] sm:$0xff]  }
  0x79   :  { %3536 = vmatprep.subr.bf16.mxu0 %v3850_v7  ;;  %v3875_v32 = vld [vmem:[#allocation5 + $0x48] ss:$8 sps:$4 sm:$0xff]   ;;  %v3877_v34 = vld [vmem:[#allocation5 + $0x58] ss:$8 sps:$4 sm:$0xff]   ;;  %v1512_v45 = vld [vmem:[#allocation7 + $0xc] sm:$0x1] }
  0x7a   :  { %v3876_v33 = vld [vmem:[#allocation8 + $0x48] ss:$8 sps:$4 sm:$0xff]   ;;  %v3879_v36 = vld [vmem:[#allocation8 + $0x58] ss:$8 sps:$4 sm:$0xff]   ;;  %v1565_v51 = vshll.u32 %v1512_v45, 16  ;;  %vm4274_vm2 = vmor %vm588_vm0, %vm589_vm1 }
  0x7b   :  { %3409 = vmatpush3.bf16.msra.mxu1 %v3849_v6  ;;  %v3881_v38 = vld [vmem:[#allocation10 + $0x28] sm:$0xff]   ;;  %v3883_v40 = vld [vmem:[#allocation5 + $0x68] ss:$8 sps:$4 sm:$0xff]   ;;  %v3886_v53 = vld [vmem:[#allocation10 + $0x30] sm:$0xff]  }
  0x7c   :  { %3537 = vmatpush3.bf16.msra.mxu0 %v3850_v7  ;;  %3410 = vmatprep.subr.bf16.mxu1 %v3851_v8  ;;  %v3882_v39 = vld [vmem:[#allocation10 + $0x168] sm:$0xff]   ;;  %v3884_v41 = vld [vmem:[#allocation8 + $0x68] ss:$8 sps:$4 sm:$0xff]   ;;  %v3888_v58 = vld [vmem:[#allocation10 + $0x170] sm:$0xff]   ;;  %v1567_v63 = vrot.slane %v1565_v51, 5 }
  0x7d   :  { %3538 = vmatprep.subr.bf16.mxu0 %v3852_v9  ;;  %v1509_v42 = vld [vmem:[#allocation7] sm:$0xf]  ;;  %v1511_v44 = vld [vmem:[#allocation7 + $0x8] sm:$0xf]  ;;  %v3889_v60 = vld [vmem:[#allocation10 + $0x38] sm:$0xff]  }
  0x7e   :  { %v1542_v46 = vshrl.u32 %v1509_v42, 16  ;;  %v1545_v47 = vshll.u32 %v1509_v42, 16  ;;  %v1556_v49 = vshrl.u32 %v1511_v44, 16  ;;  %v1559_v50 = vshll.u32 %v1511_v44, 16  ;;  %v3885_v52 = vld [vmem:[#allocation5 + $0x78] ss:$8 sps:$4 sm:$0xff]  }
  0x7f   :  { %3411 = vmatpush3.bf16.msra.mxu1 %v3851_v8  ;;  %v3887_v57 = vld [vmem:[#allocation8 + $0x78] ss:$8 sps:$4 sm:$0xff]   ;;  %v1514_v1 = vld [vmem:[#allocation7 + $0x14] sm:$0x1]  ;;  %v3890_v2 = vld [vmem:[#allocation10 + $0x178] sm:$0xff]  }
  0x80   :  { %3539 = vmatpush3.bf16.msra.mxu0 %v3852_v9  ;;  %3412 = vmatprep.subr.bf16.mxu1 %v3853_v10  ;;  %v1544_v54 = vrot.slane %v1542_v46, 4  ;;  %v1547_v55 = vrot.slane %v1545_v47, 5  ;;  %v1558_v56 = vrot.slane %v1556_v49, 4  ;;  %v1561_v59 = vrot.slane %v1559_v50, 5  ;;  %v1513_v0 = vld [vmem:[#allocation7 + $0x10] sm:$0xf] }
  0x81   :  { %3540 = vmatprep.subr.bf16.mxu0 %v3854_v11  ;;  %v3891_v3 = vld [vmem:[#allocation2] ss:$8 sps:$4 sm:$0xff]   ;;  %v1515_v6 = vld [vmem:[#allocation7 + $0x18] sm:$0xf]  ;;  %v1516_v7 = vld [vmem:[#allocation7 + $0x1c] sm:$0x1] }
  0x82   :  { %v1548_v61 = vor.u32 %v1547_v55, %v1544_v54  ;;  %v1562_v5 = vor.u32 %v1561_v59, %v1558_v56  ;;  %v1570_v8 = vshrl.u32 %v1513_v0, 16  ;;  %v1573_v9 = vshll.u32 %v1513_v0, 16  ;;  %v3896_v46 = vld [vmem:[#allocation10 + $0x188] sm:$0xff]   ;;  %v3900_v56 = vld [vmem:[#allocation10 + $0x190] sm:$0xff]  }
  0x83   :  { %3413 = vmatpush3.bf16.msra.mxu1 %v3853_v10  ;;  %v1584_v12 = vshrl.u32 %v1515_v6, 16  ;;  %v1587_v13 = vshll.u32 %v1515_v6, 16  ;;  %v1521_v59 = vld [vmem:[#allocation7 + $0x30] sm:$0xf] }
  0x84   :  { %3541 = vmatpush3.bf16.msra.mxu0 %v3854_v11  ;;  %3414 = vmatprep.subr.bf16.mxu1 %v3855_v14  ;;  %v1549_v10 = vrot.slane %v1548_v61, 4  ;;  %v1579_v11 = vshll.u32 %v1514_v1, 16  ;;  %v1523_v61 = vld [vmem:[#allocation7 + $0x38] sm:$0xf]  ;;  %v1626_v0 = vshrl.u32 %v1521_v59, 16  ;;  %v1629_v1 = vshll.u32 %v1521_v59, 16 }
  0x85   :  { %3542 = vmatprep.subr.bf16.mxu0 %v3856_v15  ;;  %v1643_v6 = vshll.u32 %v1523_v61, 16 }
  0x87   :  { %3415 = vmatpush3.bf16.msra.mxu1 %v3855_v14  ;;  %v1563_v14 = vrot.slane %v1562_v5, 4  ;;  %v1640_v5 = vshrl.u32 %v1523_v61, 16 }
  0x88   :  { %3543 = vmatpush3.bf16.msra.mxu0 %v3856_v15  ;;  %3416 = vmatprep.subr.bf16.mxu1 %v3857_v16  ;;  %v1572_v15 = vrot.slane %v1570_v8, 4 }
  0x89   :  { %3544 = vmatprep.subr.bf16.mxu0 %v3858_v17 }
  0x8b   :  { %3417 = vmatpush3.bf16.msra.mxu1 %v3857_v16  ;;  %v1575_v16 = vrot.slane %v1573_v9, 5  ;;  %v1628_v9 = vrot.slane %v1626_v0, 4 }
  0x8c   :  { %3545 = vmatpush3.bf16.msra.mxu0 %v3858_v17  ;;  %3434 = vmatprep.subr.bf16.mxu1 %v3862_v19  ;;  %v1593_v17 = vshll.u32 %v1516_v7, 16 }
  0x8d   :  { %3562 = vmatprep.subr.bf16.mxu0 %v3864_v20 }
  0x8e   :  { %3419 = vmatmul.mubr.bf16.vlgmr.msra.gmra.mrb[0].mxu1 %v3861_v18  ;;  %v1554_v18 = vsel %vm4274_vm2, %v1549_v10, %v1553_v62  ;;  %v1631_v10 = vrot.slane %v1629_v1, 5 }
  0x8f   :  { %3547 = vmatmul.mubr.bf16.vlgmr.msra.gmra.mrb[0].mxu0 %v3863_v21  ;;  %3435 = vmatpush3.bf16.msra.mxu1 %v3862_v19  ;;  %v1586_v19 = vrot.slane %v1584_v12, 4  ;;  %v1568_v21 = vsel %vm4274_vm2, %v1563_v14, %v1567_v63  ;;  %v1524_v63 = vld [vmem:[#allocation7 + $0x3c] sm:$0x1]  ;;  %v1642_v14 = vrot.slane %v1640_v5, 4 }
  0x90   :  { %3563 = vmatpush3.bf16.msra.mxu0 %v3864_v20  ;;  %3436 = vmatprep.subr.bf16.mxu1 %v3865_v22  ;;  %v1589_v20 = vrot.slane %v1587_v13, 5  ;;  %v1649_v7 = vshll.u32 %v1524_v63, 16  ;;  %v3901_v12 = vld [vmem:[#allocation10 + $0x98] sm:$0xff]  }
  0x91   :  { %3564 = vmatprep.subr.bf16.mxu0 %v3866_v23  ;;  %3422 = vmatprep.mubr.bf16.mxu1 %v3867_v24  ;;  %v3146_v24 = vcombine.low %v1554_v18, %v1568_v21  ;;  %v3903_v21 = vld [vmem:[#allocation2 + $0x48] ss:$8 sps:$4 sm:$0xff]  }
  0x92   :  { %3550 = vmatprep.mubr.bf16.mxu0 %v3868_v25  ;;  %v3893_v25 = vld [vmem:[#allocation10 + $0x80] sm:$0xff]  }
  0x93   :  { %3437 = vmatpush3.bf16.msra.mxu1 %v3865_v22  ;;  %v1576_v22 = vor.u32 %v1575_v16, %v1572_v15  ;;  %v1645_v15 = vrot.slane %v1643_v6, 5  ;;  %v1651_v16 = vrot.slane %v1649_v7, 5  ;;  %v3912_v7 = vld [vmem:[#allocation10 + $0x1b0] sm:$0xff]  }
  0x94   :  { %3565 = vmatpush3.bf16.msra.mxu0 %v3866_v23  ;;  %3438 = vmatprep.subr.bf16.mxu1 %v3870_v27  ;;  %v1581_v23 = vrot.slane %v1579_v11, 5 }
  0x95   :  { %3566 = vmatprep.subr.bf16.mxu0 %v3872_v28 }
  0x96   :  { %3423 = vmatmul.mubr.bf16.gmra.mrb[4].mxu1 %v3869_v26  ;;  %v1590_v26 = vor.u32 %v1589_v20, %v1586_v19  ;;  %v1632_v19 = vor.u32 %v1631_v10, %v1628_v9  ;;  %v1646_v20 = vor.u32 %v1645_v15, %v1642_v14  ;;  %v3913_v10 = vld [vmem:[#allocation10 + $0xb8] sm:$0xff]   ;;  %v1533_v15 = vld [vmem:[#allocation7 + $0x68] sm:$0xf] }
  0x97   :  { %3551 = vmatmul.mubr.bf16.gmra.mrb[4].mxu0 %v3871_v29  ;;  %3439 = vmatpush3.bf16.msra.mxu1 %v3870_v27  ;;  %v1595_v27 = vrot.slane %v1593_v17, 5  ;;  %v1577_v29 = vrot.slane %v1576_v22, 4  ;;  %v3902_v17 = vld [vmem:[#allocation10 + $0x198] sm:$0xff]  }
  0x98   :  { %3567 = vmatpush3.bf16.msra.mxu0 %v3872_v28  ;;  %3440 = vmatprep.subr.bf16.mxu1 %v3873_v30  ;;  %v3892_v28 = vld [vmem:[#allocation2 + $0x10] ss:$8 sps:$4 sm:$0xff]   ;;  %v1633_v22 = vrot.slane %v1632_v19, 4 }
  0x99   :  { %3568 = vmatprep.subr.bf16.mxu0 %v3874_v31  ;;  %3426 = vmatprep.mubr.bf16.mxu1 %v3875_v32  ;;  %v1517_v32 = vld [vmem:[#allocation7 + $0x20] sm:$0xf]  ;;  %v1535_v19 = vld [vmem:[#allocation7 + $0x70] sm:$0xf] }
  0x9a   :  { %3554 = vmatprep.mubr.bf16.mxu0 %v3876_v33  ;;  %v1518_v33 = vld [vmem:[#allocation7 + $0x24] sm:$0x1] }
  0x9b   :  { %3441 = vmatpush3.bf16.msra.mxu1 %v3873_v30  ;;  %v3894_v30 = vld [vmem:[#allocation10 + $0x180] sm:$0xff]   ;;  %v1607_v42 = vshll.u32 %v1518_v33, 16 }
  0x9c   :  { %3569 = vmatpush3.bf16.msra.mxu0 %v3874_v31  ;;  %3442 = vmatprep.subr.bf16.mxu1 %v3878_v35  ;;  %v1591_v31 = vrot.slane %v1590_v26, 4  ;;  %v1647_v26 = vrot.slane %v1646_v20, 4  ;;  %v1536_v20 = vld [vmem:[#allocation7 + $0x74] sm:$0x1] }
  0x9d   :  { %3570 = vmatprep.subr.bf16.mxu0 %v3880_v37  ;;  %v1609_v54 = vrot.slane %v1607_v42, 5 }
  0x9e   :  { %3427 = vmatmul.mubr.bf16.gmra.mrb[8].mxu1 %v3877_v34  ;;  %v1582_v34 = vsel %vm4274_vm2, %v1577_v29, %v1581_v23  ;;  %v1525_v23 = vld [vmem:[#allocation7 + $0x48] sm:$0xf] }
  0x9f   :  { %3555 = vmatmul.mubr.bf16.gmra.mrb[8].mxu0 %v3879_v36  ;;  %3443 = vmatpush3.bf16.msra.mxu1 %v3878_v35  ;;  %v3897_v35 = vld [vmem:[#allocation2 + $0x20] ss:$8 sps:$4 sm:$0xff]   ;;  %v1654_v29 = vshrl.u32 %v1525_v23, 16 }
  0xa0   :  { %3571 = vmatpush3.bf16.msra.mxu0 %v3880_v37  ;;  %3444 = vmatprep.subr.bf16.mxu1 %v3881_v38  ;;  %v1519_v36 = vld [vmem:[#allocation7 + $0x28] sm:$0xf]  ;;  %v1520_v37 = vld [vmem:[#allocation7 + $0x2c] sm:$0x1] }
  0xa1   :  { %3572 = vmatprep.subr.bf16.mxu0 %v3882_v39  ;;  %3430 = vmatprep.mubr.bf16.mxu1 %v3883_v40  ;;  %v1596_v40 = vsel %vm4274_vm2, %v1591_v31, %v1595_v27  ;;  %v1612_v43 = vshrl.u32 %v1519_v36, 16  ;;  %v1615_v44 = vshll.u32 %v1519_v36, 16  ;;  %v1621_v49 = vshll.u32 %v1520_v37, 16  ;;  %v1527_v27 = vld [vmem:[#allocation7 + $0x50] sm:$0xf] }
  0xa2   :  { %3558 = vmatprep.mubr.bf16.mxu0 %v3884_v41  ;;  %v3895_v41 = vld [vmem:[#allocation10 + $0x88] sm:$0xff]   ;;  %v3147_v45 = vcombine.low %v1582_v34, %v1596_v40  ;;  %v1657_v31 = vshll.u32 %v1525_v23, 16  ;;  %v1668_v33 = vshrl.u32 %v1527_v27, 16  ;;  %v3906_v34 = vld [vmem:[#allocation10 + $0x1a0] sm:$0xff]   ;;  %v1656_v36 = vrot.slane %v1654_v29, 4 }
  0xa3   :  { %3445 = vmatpush3.bf16.msra.mxu1 %v3881_v38  ;;  %v1598_v38 = vshrl.u32 %v1517_v32, 16  ;;  %v1614_v50 = vrot.slane %v1612_v43, 4  ;;  %v1617_v51 = vrot.slane %v1615_v44, 5  ;;  %v1623_v55 = vrot.slane %v1621_v49, 5  ;;  %v3904_v44 = vld [vmem:[#allocation2 + $0x58] ss:$8 sps:$4 sm:$0xff]  }
  0xa4   :  { %3573 = vmatpush3.bf16.msra.mxu0 %v3882_v39  ;;  %3446 = vmatprep.subr.bf16.mxu1 %v3886_v53  ;;  %v1601_v39 = vshll.u32 %v1517_v32, 16  ;;  %v1671_v37 = vshll.u32 %v1527_v27, 16  ;;  %v1670_v43 = vrot.slane %v1668_v33, 4  ;;  %v1529_v49 = vld [vmem:[#allocation7 + $0x58] sm:$0xf]  ;;  %v1713_v23 = vshll.u32 %v1533_v15, 16 }
  0xa5   :  { %3574 = vmatprep.subr.bf16.mxu0 %v3888_v58  ;;  %v1600_v47 = vrot.slane %v1598_v38, 4  ;;  %v1733_v29 = vshll.u32 %v1536_v20, 16 }
  0xa6   :  { %3431 = vmatmul.mubr.bf16.gmra.mrb[12].mxu1 %v3885_v52  ;;  %v1603_v48 = vrot.slane %v1601_v39, 5  ;;  %v3899_v52 = vld [vmem:[#allocation10 + $0x90] sm:$0xff]   ;;  %v3907_v39 = vld [vmem:[#allocation10 + $0xa8] sm:$0xff]  }
  0xa7   :  { %3559 = vmatmul.mubr.bf16.gmra.mrb[12].mxu0 %v3887_v57  ;;  %3447 = vmatpush3.bf16.msra.mxu1 %v3886_v53  ;;  %v1618_v57 = vor.u32 %v1617_v51, %v1614_v50  ;;  %v1530_v50 = vld [vmem:[#allocation7 + $0x5c] sm:$0x1]  ;;  %v1531_v51 = vld [vmem:[#allocation7 + $0x60] sm:$0xf] }
  0xa8   :  { %3575 = vmatpush3.bf16.msra.mxu0 %v3888_v58  ;;  %3448 = vmatprep.subr.bf16.mxu1 %v3889_v60  ;;  %v1604_v53 = vor.u32 %v1603_v48, %v1600_v47  ;;  %v3898_v58 = vld [vmem:[#allocation2 + $0x30] ss:$8 sps:$4 sm:$0xff]   ;;  %v1696_v59 = vshrl.u32 %v1531_v51, 16 }
  0xa9   :  { %3576 = vmatprep.subr.bf16.mxu0 %v3890_v2  ;;  %3450 = vmatprep.mubr.bf16.mxu1 %v3891_v3  ;;  %v1619_v3 = vrot.slane %v1618_v57, 4  ;;  %v3911_v57 = vld [vmem:[#allocation10 + $0xb0] sm:$0xff]  }
  0xaa   :  { %3578 = vmatprep.mubr.bf16.mxu0 %v3146_v24  ;;  %v1605_v62 = vrot.slane %v1604_v53, 4  ;;  %v1526_v24 = vld [vmem:[#allocation7 + $0x4c] sm:$0x1]  ;;  %v1532_v53 = vld [vmem:[#allocation7 + $0x64] sm:$0x1] }
  0xab   :  { %3449 = vmatpush3.bf16.msra.mxu1 %v3889_v60  ;;  %v1522_v60 = vld [vmem:[#allocation7 + $0x34] sm:$0x1]  ;;  %v1624_v13 = vsel %vm4274_vm2, %v1619_v3, %v1623_v55  ;;  %v1663_v32 = vshll.u32 %v1526_v24, 16  ;;  %v1685_v55 = vshll.u32 %v1529_v49, 16  ;;  %v1705_v61 = vshll.u32 %v1532_v53, 16 }
  0xac   :  { %3577 = vmatpush3.bf16.msra.mxu0 %v3890_v2  ;;  %3466 = vmatprep.subr.bf16.mxu1 %v3893_v25  ;;  %v1635_v2 = vshll.u32 %v1522_v60, 16  ;;  %v1610_v8 = vsel %vm4274_vm2, %v1605_v62, %v1609_v54  ;;  %v1682_v54 = vshrl.u32 %v1529_v49, 16  ;;  %v1699_v60 = vshll.u32 %v1531_v51, 16 }
  0xad   :  { %3594 = vmatprep.subr.bf16.mxu0 %v3894_v30  ;;  %v3148_v18 = vcombine.low %v1610_v8, %v1624_v13  ;;  %v1665_v42 = vrot.slane %v1663_v32, 5  ;;  %v1687_v0 = vrot.slane %v1685_v55, 5  ;;  %v1698_v3 = vrot.slane %v1696_v59, 4  ;;  %v3909_v13 = vld [vmem:[#allocation2 + $0x68] ss:$8 sps:$4 sm:$0xff]  }
  0xae   :  { %3451 = vmatmul.mubr.bf16.vlgmr.msra.gmra.mrb[0].mxu1 %v3892_v28  ;;  %v1637_v11 = vrot.slane %v1635_v2, 5  ;;  %v1528_v28 = vld [vmem:[#allocation7 + $0x54] sm:$0x1]  ;;  %v1684_v63 = vrot.slane %v1682_v54, 4  ;;  %v1701_v5 = vrot.slane %v1699_v60, 5  ;;  %v1707_v6 = vrot.slane %v1705_v61, 5 }
  0xaf   :  { %3579 = vmatmul.mubr.bf16.vlgmr.msra.gmra.mrb[0].mxu0 %v3147_v45  ;;  %3467 = vmatpush3.bf16.msra.mxu1 %v3893_v25  ;;  %v3905_v25 = vld [vmem:[#allocation10 + $0xa0] sm:$0xff]   ;;  %v1677_v38 = vshll.u32 %v1528_v28, 16  ;;  %v3908_v45 = vld [vmem:[#allocation10 + $0x1a8] sm:$0xff]   ;;  %v1727_v28 = vshll.u32 %v1535_v19, 16  ;;  %v1715_v32 = vrot.slane %v1713_v23, 5 }
  0xb0   :  { %3595 = vmatpush3.bf16.msra.mxu0 %v3894_v30  ;;  %3468 = vmatprep.subr.bf16.mxu1 %v3895_v41  ;;  %v1638_v30 = vsel %vm4274_vm2, %v1633_v22, %v1637_v11  ;;  %v1688_v9 = vor.u32 %v1687_v0, %v1684_v63  ;;  %v556_v0 = vld [vmem:[#allocation2] sm:$0xf] }
  0xb1   :  { %3596 = vmatprep.subr.bf16.mxu0 %v3896_v46  ;;  %3454 = vmatprep.mubr.bf16.mxu1 %v3897_v35  ;;  %v1652_v35 = vsel %vm4274_vm2, %v1647_v26, %v1651_v16  ;;  %v1679_v47 = vrot.slane %v1677_v38, 5  ;;  %v1534_v16 = vld [vmem:[#allocation7 + $0x6c] sm:$0x1]  ;;  %v1735_v38 = vrot.slane %v1733_v29, 5 }
  0xb2   :  { %3582 = vmatprep.mubr.bf16.mxu0 %v3148_v18  ;;  %v3149_v40 = vcombine.low %v1638_v30, %v1652_v35  ;;  %v1689_v14 = vrot.slane %v1688_v9, 4  ;;  %v1719_v24 = vshll.u32 %v1534_v16, 16  ;;  %v4302_v30 = vld [vmem:[#allocation10 + $0xc0] sm:$0xff]  }
  0xb3   :  { %3469 = vmatpush3.bf16.msra.mxu1 %v3895_v41  ;;  %v1659_v41 = vrot.slane %v1657_v31, 5  ;;  %v3910_v35 = vld [vmem:[#allocation2 + $0x78] ss:$8 sps:$4 sm:$0xff]  }
  0xb4   :  { %3597 = vmatpush3.bf16.msra.mxu0 %v3896_v46  ;;  %3470 = vmatprep.subr.bf16.mxu1 %v3899_v52  ;;  %v1673_v46 = vrot.slane %v1671_v37, 5  ;;  %v1721_v33 = vrot.slane %v1719_v24, 5  ;;  %v1729_v37 = vrot.slane %v1727_v28, 5  ;;  %v560_v24 = vld [vmem:[#allocation2 + $0x10] sm:$0xf] }
  0xb5   :  { %3598 = vmatprep.subr.bf16.mxu0 %v3900_v56  ;;  %v1660_v48 = vor.u32 %v1659_v41, %v1656_v36  ;;  %v4304_v36 = vld [vmem:[#allocation10 + $0x1c0] sm:$0xff]   ;;  %v1538_v41 = vld [vmem:[#allocation7 + $0x7c] sm:$0x1]  ;;  %v620_v29 = vshrl.u32 %v560_v24, 16 }
  0xb6   :  { %3455 = vmatmul.mubr.bf16.gmra.mrb[4].mxu1 %v3898_v58  ;;  %v563_v28 = vld [vmem:[#allocation2 + $0x1c] sm:$0x1] }
  0xb7   :  { %3471 = vmatpush3.bf16.msra.mxu1 %v3899_v52  ;;  %3458 = vmatprep.mubr.bf16.mxu1 %v3903_v21  ;;  %v1674_v52 = vor.u32 %v1673_v46, %v1670_v43  ;;  %v1661_v58 = vrot.slane %v1660_v48, 4  ;;  %v1710_v21 = vshrl.u32 %v1533_v15, 16 }
  0xb8   :  { %3599 = vmatpush3.bf16.msra.mxu0 %v3900_v56  ;;  %3472 = vmatprep.subr.bf16.mxu1 %v3901_v12  ;;  %v1691_v56 = vshll.u32 %v1530_v50, 16 }
  0xb9   :  { %3600 = vmatprep.subr.bf16.mxu0 %v3902_v17  ;;  %3583 = vmatmul.mubr.bf16.gmra.mrb[4].mxu0 %v3149_v40  ;;  %v1675_v62 = vrot.slane %v1674_v52, 4  ;;  %v1666_v2 = vsel %vm4274_vm2, %v1661_v58, %v1665_v42  ;;  %v1712_v27 = vrot.slane %v1710_v21, 4  ;;  %v1537_v40 = vld [vmem:[#allocation7 + $0x78] sm:$0xf]  ;;  %v1539_v42 = vld [vmem:[#allocation7 + $0x80] sm:$0xf] }
  0xba   :  { %v1693_v1 = vrot.slane %v1691_v56, 5  ;;  %v1741_v46 = vshll.u32 %v1537_v40, 16  ;;  %v1752_v49 = vshrl.u32 %v1539_v42, 16  ;;  %v1755_v50 = vshll.u32 %v1539_v42, 16  ;;  %v3915_v21 = vld [vmem:[#allocation2 + $0x8] ss:$8 sps:$4 sm:$0xff]  }
  0xbb   :  { %3473 = vmatpush3.bf16.msra.mxu1 %v3901_v12  ;;  %v1680_v8 = vsel %vm4274_vm2, %v1675_v62, %v1679_v47  ;;  %v1702_v12 = vor.u32 %v1701_v5, %v1698_v3  ;;  %v1747_v47 = vshll.u32 %v1538_v41, 16  ;;  %v559_v5 = vld [vmem:[#allocation2 + $0xc] sm:$0x1] }
  0xbc   :  { %3601 = vmatpush3.bf16.msra.mxu0 %v3902_v17  ;;  %3474 = vmatprep.subr.bf16.mxu1 %v3905_v25  ;;  %v3150_v11 = vcombine.low %v1666_v2, %v1680_v8  ;;  %v3914_v17 = vld [vmem:[#allocation10 + $0x1b8] sm:$0xff]   ;;  %v1694_v22 = vsel %vm4274_vm2, %v1689_v14, %v1693_v1  ;;  %v1743_v54 = vrot.slane %v1741_v46, 5  ;;  %v1757_v58 = vrot.slane %v1755_v50, 5  ;;  %v557_v1 = vld [vmem:[#allocation2 + $0x4] sm:$0x1] }
  0xbd   :  { %3602 = vmatprep.subr.bf16.mxu0 %v3906_v34  ;;  %v1703_v18 = vrot.slane %v1702_v12, 4  ;;  %v1749_v55 = vrot.slane %v1747_v47, 5  ;;  %v558_v2 = vld [vmem:[#allocation2 + $0x8] sm:$0xf]  ;;  %v601_v8 = vshll.u32 %v557_v1, 16  ;;  %v615_v12 = vshll.u32 %v559_v5, 16 }
  0xbe   :  { %3459 = vmatmul.mubr.bf16.gmra.mrb[8].mxu1 %v3904_v44  ;;  %3586 = vmatprep.mubr.bf16.mxu0 %v3150_v11  ;;  %v1540_v44 = vld [vmem:[#allocation7 + $0x84] sm:$0x1]  ;;  %v609_v11 = vshll.u32 %v558_v2, 16 }
  0xbf   :  { %3475 = vmatpush3.bf16.msra.mxu1 %v3905_v25  ;;  %3462 = vmatprep.mubr.bf16.mxu1 %v3909_v13  ;;  %v1724_v25 = vshrl.u32 %v1535_v19, 16  ;;  %v1708_v26 = vsel %vm4274_vm2, %v1703_v18, %v1707_v6  ;;  %v1761_v51 = vshll.u32 %v1540_v44, 16  ;;  %v592_v6 = vshrl.u32 %v556_v0, 16 }
  0xc0   :  { %3603 = vmatpush3.bf16.msra.mxu0 %v3906_v34  ;;  %3476 = vmatprep.subr.bf16.mxu1 %v3907_v39  ;;  %v3151_v31 = vcombine.low %v1694_v22, %v1708_v26  ;;  %v603_v16 = vrot.slane %v601_v8, 5  ;;  %v611_v19 = vrot.slane %v609_v11, 5  ;;  %v617_v20 = vrot.slane %v615_v12, 5  ;;  %v562_v26 = vld [vmem:[#allocation2 + $0x18] sm:$0xf] }
  0xc1   :  { %3604 = vmatprep.subr.bf16.mxu0 %v3908_v45  ;;  %v1726_v34 = vrot.slane %v1724_v25, 4  ;;  %v1763_v59 = vrot.slane %v1761_v51, 5  ;;  %v594_v14 = vrot.slane %v592_v6, 4  ;;  %v561_v25 = vld [vmem:[#allocation2 + $0x14] sm:$0x1] }
  0xc2   :  { %3587 = vmatmul.mubr.bf16.gmra.mrb[8].mxu0 %v3151_v31  ;;  %v623_v31 = vshll.u32 %v560_v24, 16 }
  0xc3   :  { %3477 = vmatpush3.bf16.msra.mxu1 %v3907_v39  ;;  %v1716_v39 = vor.u32 %v1715_v32, %v1712_v27  ;;  %v1730_v43 = vor.u32 %v1729_v37, %v1726_v34  ;;  %v629_v32 = vshll.u32 %v561_v25, 16  ;;  %v634_v34 = vshrl.u32 %v562_v26, 16 }
  0xc4   :  { %3605 = vmatpush3.bf16.msra.mxu0 %v3908_v45  ;;  %3478 = vmatprep.subr.bf16.mxu1 %v3911_v57  ;;  %v1738_v45 = vshrl.u32 %v1537_v40, 16  ;;  %v643_v37 = vshll.u32 %v563_v28, 16  ;;  %v625_v40 = vrot.slane %v623_v31, 5 }
  0xc5   :  { %3606 = vmatprep.subr.bf16.mxu0 %v3912_v7  ;;  %v1717_v48 = vrot.slane %v1716_v39, 4  ;;  %v1731_v52 = vrot.slane %v1730_v43, 4  ;;  %v622_v39 = vrot.slane %v620_v29, 4  ;;  %v631_v41 = vrot.slane %v629_v32, 5 }
  0xc6   :  { %3463 = vmatmul.mubr.bf16.gmra.mrb[12].mxu1 %v3910_v35  ;;  %v1740_v53 = vrot.slane %v1738_v45, 4  ;;  %v637_v35 = vshll.u32 %v562_v26, 16  ;;  %v636_v43 = vrot.slane %v634_v34, 4  ;;  %v645_v45 = vrot.slane %v643_v37, 5 }
  0xc7   :  { %3479 = vmatpush3.bf16.msra.mxu1 %v3911_v57  ;;  %v1722_v56 = vsel %vm4274_vm2, %v1717_v48, %v1721_v33  ;;  %v1754_v57 = vrot.slane %v1752_v49, 4  ;;  %v1736_v60 = vsel %vm4274_vm2, %v1731_v52, %v1735_v38  ;;  %v626_v47 = vor.u32 %v625_v40, %v622_v39  ;;  %v3917_v48 = vld [vmem:[#allocation2 + $0x18] ss:$8 sps:$4 sm:$0xff]  }
  0xc8   :  { %3607 = vmatpush3.bf16.msra.mxu0 %v3912_v7  ;;  %3480 = vmatprep.subr.bf16.mxu1 %v3913_v10  ;;  %v1744_v61 = vor.u32 %v1743_v54, %v1740_v53  ;;  %v3152_v62 = vcombine.low %v1722_v56, %v1736_v60  ;;  %v595_v7 = vshll.u32 %v556_v0, 16  ;;  %v639_v44 = vrot.slane %v637_v35, 5  ;;  %v3920_v53 = vld [vmem:[#allocation10 + $0x1c8] sm:$0xff]   ;;  %v564_v54 = vld [vmem:[#allocation2 + $0x20] sm:$0xf] }
  0xc9   :  { %3608 = vmatprep.subr.bf16.mxu0 %v3914_v17  ;;  %v1758_v63 = vor.u32 %v1757_v58, %v1754_v57  ;;  %v627_v51 = vrot.slane %v626_v47, 4  ;;  %v566_v57 = vld [vmem:[#allocation2 + $0x28] sm:$0xf]  ;;  %v567_v58 = vld [vmem:[#allocation2 + $0x2c] sm:$0x1]  ;;  %v651_v60 = vshll.u32 %v564_v54, 16 }
  0xca   :  { %v1745_v3 = vrot.slane %v1744_v61, 4  ;;  %3590 = vmatprep.mubr.bf16.mxu0 %v3152_v62  ;;  %v597_v15 = vrot.slane %v595_v7, 5  ;;  %v640_v50 = vor.u32 %v639_v44, %v636_v43  ;;  %v665_v0 = vshll.u32 %v566_v57, 16  ;;  %v3923_v39 = vld [vmem:[#allocation2 + $0x38] ss:$8 sps:$4 sm:$0xff]  }
  0xcb   :  { %3481 = vmatpush3.bf16.msra.mxu1 %v3913_v10  ;;  %v1759_v9 = vrot.slane %v1758_v63, 4  ;;  %v606_v10 = vshrl.u32 %v558_v2, 16  ;;  %v632_v56 = vsel %vm4274_vm2, %v627_v51, %v631_v41  ;;  %v662_v63 = vshrl.u32 %v566_v57, 16  ;;  %v3919_v2 = vld [vmem:[#allocation10 + $0xc8] sm:$0xff]   ;;  %v3930_v43 = vld [vmem:[#allocation10 + $0x1e0] sm:$0xff]  }
  0xcc   :  { %3609 = vmatpush3.bf16.msra.mxu0 %v3914_v17  ;;  %3498 = vmatprep.subr.bf16.mxu1 %v4302_v30  ;;  %v1750_v13 = vsel %vm4274_vm2, %v1745_v3, %v1749_v55  ;;  %v598_v23 = vor.u32 %v597_v15, %v594_v14  ;;  %v641_v52 = vrot.slane %v640_v50, 4  ;;  %v565_v55 = vld [vmem:[#allocation2 + $0x24] sm:$0x1]  ;;  %v653_v5 = vrot.slane %v651_v60, 5  ;;  %v568_v14 = vld [vmem:[#allocation2 + $0x30] sm:$0xf] }
  0xcd   :  { %3626 = vmatprep.subr.bf16.mxu0 %v4304_v36  ;;  %v1764_v17 = vsel %vm4274_vm2, %v1759_v9, %v1763_v59  ;;  %v608_v18 = vrot.slane %v606_v10, 4  ;;  %v648_v59 = vshrl.u32 %v564_v54, 16  ;;  %v657_v62 = vshll.u32 %v565_v55, 16  ;;  %v3921_v9 = vld [vmem:[#allocation2 + $0x28] ss:$8 sps:$4 sm:$0xff]  }
  0xce   :  { %v3153_v22 = vcombine.low %v1750_v13, %v1764_v17  ;;  %v599_v33 = vrot.slane %v598_v23, 4  ;;  %v646_v61 = vsel %vm4274_vm2, %v641_v52, %v645_v45  ;;  %v671_v6 = vshll.u32 %v567_v58, 16  ;;  %v3924_v10 = vld [vmem:[#allocation10 + $0x1d0] sm:$0xff]   ;;  %v572_v45 = vld [vmem:[#allocation2 + $0x48] sm:$0xf]  ;;  %v3928_v58 = vld [vmem:[#allocation10 + $0xe0] sm:$0xff]  }
  0xcf   :  { %v612_v27 = vor.u32 %v611_v19, %v608_v18  ;;  %v3099_v1 = vcombine.low %v632_v56, %v646_v61  ;;  %v650_v3 = vrot.slane %v648_v59, 4  ;;  %v664_v7 = vrot.slane %v662_v63, 4  ;;  %v569_v15 = vld [vmem:[#allocation2 + $0x34] sm:$0x1]  ;;  %v571_v18 = vld [vmem:[#allocation2 + $0x3c] sm:$0x1] }
  0xd0   :  { %3591 = vmatmul.mubr.bf16.gmra.mrb[12].mxu0 %v3153_v22  ;;  %v604_v42 = vsel %vm4274_vm2, %v599_v33, %v603_v16  ;;  %v667_v8 = vrot.slane %v665_v0, 5  ;;  %v659_v12 = vrot.slane %v657_v62, 5  ;;  %v673_v13 = vrot.slane %v671_v6, 5  ;;  %v3922_v16 = vld [vmem:[#allocation10 + $0xd0] sm:$0xff]   ;;  %v3925_v33 = vld [vmem:[#allocation10 + $0xd8] sm:$0xff]   ;;  %v3932_v62 = vld [vmem:[#allocation10 + $0x1e8] sm:$0xff]  }
  0xd1   :  { %v613_v38 = vrot.slane %v612_v27, 4  ;;  %3610 = vmatprep.mubr.bf16.mxu0 %v3915_v21  ;;  %v654_v11 = vor.u32 %v653_v5, %v650_v3  ;;  %v676_v19 = vshrl.u32 %v568_v14, 16  ;;  %v3926_v21 = vld [vmem:[#allocation10 + $0x1d8] sm:$0xff]   ;;  %v685_v23 = vshll.u32 %v569_v15, 16  ;;  %v573_v47 = vld [vmem:[#allocation2 + $0x4c] sm:$0x1] }
  0xd2   :  { %v668_v17 = vor.u32 %v667_v8, %v664_v7  ;;  %v699_v29 = vshll.u32 %v571_v18, 16  ;;  %v704_v51 = vshrl.u32 %v572_v45, 16  ;;  %v707_v52 = vshll.u32 %v572_v45, 16  ;;  %v3927_v61 = vld [vmem:[#allocation2 + $0x50] ss:$8 sps:$4 sm:$0xff]   ;;  %v3931_v5 = vld [vmem:[#allocation10 + $0xe8] sm:$0xff]  }
  0xd3   :  { %v618_v46 = vsel %vm4274_vm2, %v613_v38, %v617_v20  ;;  %v679_v20 = vshll.u32 %v568_v14, 16  ;;  %v655_v22 = vrot.slane %v654_v11, 4  ;;  %v678_v27 = vrot.slane %v676_v19, 4  ;;  %v576_v3 = vld [vmem:[#allocation2 + $0x58] sm:$0xf]  ;;  %v3936_v14 = vld [vmem:[#allocation10 + $0x1f0] sm:$0xff]  }
  0xd4   :  { %v3098_v49 = vcombine.low %v604_v42, %v618_v46  ;;  %v669_v26 = vrot.slane %v668_v17, 4  ;;  %v687_v37 = vrot.slane %v685_v23, 5  ;;  %v701_v38 = vrot.slane %v699_v29, 5  ;;  %v577_v7 = vld [vmem:[#allocation2 + $0x5c] sm:$0x1] }
  0xd5   :  { %v681_v28 = vrot.slane %v679_v20, 5  ;;  %v706_v59 = vrot.slane %v704_v51, 4  ;;  %v709_v60 = vrot.slane %v707_v52, 5  ;;  %v578_v8 = vld [vmem:[#allocation2 + $0x60] sm:$0xf]  ;;  %v732_v11 = vshrl.u32 %v576_v3, 16 }
  0xd6   :  { %3482 = vmatprep.mubr.bf16.mxu1 %v3098_v49  ;;  %v674_v34 = vsel %vm4274_vm2, %v669_v26, %v673_v13  ;;  %v575_v49 = vld [vmem:[#allocation2 + $0x54] sm:$0x1]  ;;  %v741_v13 = vshll.u32 %v577_v7, 16  ;;  %v749_v17 = vshll.u32 %v578_v8, 16  ;;  %v3937_v45 = vld [vmem:[#allocation10 + $0xf8] sm:$0xff]  }
  0xd7   :  { %3483 = vmatmul.mubr.bf16.vlgmr.msra.gmra.mrb[0].mxu1 %v3099_v1  ;;  %v682_v35 = vor.u32 %v681_v28, %v678_v27  ;;  %v727_v57 = vshll.u32 %v575_v49, 16  ;;  %v710_v6 = vor.u32 %v709_v60, %v706_v59  ;;  %v734_v19 = vrot.slane %v732_v11, 4  ;;  %v3938_v27 = vld [vmem:[#allocation10 + $0x1f8] sm:$0xff]  }
  0xd8   :  { %3611 = vmatmul.mubr.bf16.vlgmr.msra.gmra.mrb[0].mxu0 %v3917_v48  ;;  %3499 = vmatpush3.bf16.msra.mxu1 %v4302_v30  ;;  %v660_v30 = vsel %vm4274_vm2, %v655_v22, %v659_v12  ;;  %v574_v48 = vld [vmem:[#allocation2 + $0x50] sm:$0xf]  ;;  %v735_v12 = vshll.u32 %v576_v3, 16  ;;  %v585_v60 = vld [vmem:[#allocation2 + $0x7c] sm:$0x1] }
  0xd9   :  { %3627 = vmatpush3.bf16.msra.mxu0 %v4304_v36  ;;  %3614 = vmatprep.mubr.bf16.mxu0 %v3921_v9  ;;  %v570_v36 = vld [vmem:[#allocation2 + $0x38] sm:$0xf]  ;;  %v3100_v40 = vcombine.low %v660_v30, %v674_v34  ;;  %v683_v42 = vrot.slane %v682_v35, 4  ;;  %v718_v55 = vshrl.u32 %v574_v48, 16  ;;  %v721_v56 = vshll.u32 %v574_v48, 16  ;;  %v3934_v22 = vld [vmem:[#allocation10 + $0xf0] sm:$0xff]  }
  0xda   :  { %3628 = vmatprep.subr.bf16.mxu0 %v3920_v53  ;;  %3500 = vmatprep.subr.bf16.mxu1 %v3919_v2  ;;  %v690_v24 = vshrl.u32 %v570_v36, 16  ;;  %v693_v25 = vshll.u32 %v570_v36, 16  ;;  %v579_v9 = vld [vmem:[#allocation2 + $0x64] sm:$0x1]  ;;  %v711_v15 = vrot.slane %v710_v6, 4  ;;  %v737_v20 = vrot.slane %v735_v12, 5 }
  0xdb   :  { %3486 = vmatprep.mubr.bf16.mxu1 %v3100_v40  ;;  %v688_v46 = vsel %vm4274_vm2, %v683_v42, %v687_v37  ;;  %v720_v0 = vrot.slane %v718_v55, 4  ;;  %v723_v1 = vrot.slane %v721_v56, 5  ;;  %v755_v36 = vshll.u32 %v579_v9, 16  ;;  %v3929_v30 = vld [vmem:[#allocation2 + $0x60] ss:$8 sps:$4 sm:$0xff]  }
  0xdc   :  { %v692_v31 = vrot.slane %v690_v24, 4  ;;  %v695_v32 = vrot.slane %v693_v25, 5  ;;  %3501 = vmatpush3.bf16.msra.mxu1 %v3919_v2  ;;  %v729_v2 = vrot.slane %v727_v57, 5  ;;  %v751_v25 = vrot.slane %v749_v17, 5  ;;  %v580_v34 = vld [vmem:[#allocation2 + $0x68] sm:$0xf] }
  0xdd   :  { %3629 = vmatpush3.bf16.msra.mxu0 %v3920_v53  ;;  %3502 = vmatprep.subr.bf16.mxu1 %v3922_v16  ;;  %v713_v53 = vshll.u32 %v573_v47, 16  ;;  %v757_v26 = vrot.slane %v755_v36, 5  ;;  %v738_v29 = vor.u32 %v737_v20, %v734_v19  ;;  %v581_v37 = vld [vmem:[#allocation2 + $0x6c] sm:$0x1]  ;;  %v763_v42 = vshll.u32 %v580_v34, 16 }
  0xde   :  { %3630 = vmatprep.subr.bf16.mxu0 %v3924_v10  ;;  %v696_v41 = vor.u32 %v695_v32, %v692_v31  ;;  %v3933_v57 = vld [vmem:[#allocation2 + $0x70] ss:$8 sps:$4 sm:$0xff]   ;;  %v3935_v36 = vld [vmem:[#allocation2 + $0x80] ss:$8 sps:$4 sm:$0xff]  }
  0xdf   :  { %v715_v63 = vrot.slane %v713_v53, 5  ;;  %v765_v51 = vrot.slane %v763_v42, 5  ;;  %v3958_v42 = vld [vmem:[#allocation5 + $0x70] ss:$8 sps:$4 sm:$0xff]  }
  0xe0   :  { %3615 = vmatmul.mubr.bf16.gmra.mrb[4].mxu0 %v3923_v39  ;;  %v697_v44 = vrot.slane %v696_v41, 4  ;;  %3503 = vmatpush3.bf16.msra.mxu1 %v3922_v16  ;;  %v746_v16 = vshrl.u32 %v578_v8, 16  ;;  %v760_v39 = vshrl.u32 %v580_v34, 16  ;;  %v583_v41 = vld [vmem:[#allocation2 + $0x74] sm:$0x1] }
  0xe1   :  { %3631 = vmatpush3.bf16.msra.mxu0 %v3924_v10  ;;  %3504 = vmatprep.subr.bf16.mxu1 %v3925_v33  ;;  %v724_v10 = vor.u32 %v723_v1, %v720_v0  ;;  %v716_v23 = vsel %vm4274_vm2, %v711_v15, %v715_v63  ;;  %v783_v49 = vshll.u32 %v583_v41, 16  ;;  %v3952_v34 = vld [vmem:[#allocation5 + $0x50] ss:$8 sps:$4 sm:$0xff]  }
  0xe2   :  { %3632 = vmatprep.subr.bf16.mxu0 %v3926_v21  ;;  %v702_v50 = vsel %vm4274_vm2, %v697_v44, %v701_v38  ;;  %3618 = vmatprep.mubr.bf16.mxu0 %v3927_v61  ;;  %v748_v24 = vrot.slane %v746_v16, 4  ;;  %v582_v38 = vld [vmem:[#allocation2 + $0x70] sm:$0xf]  ;;  %v762_v47 = vrot.slane %v760_v39, 4  ;;  %v586_v61 = vld [vmem:[#allocation2 + $0x80] sm:$0xf] }
  0xe3   :  { %v3101_v54 = vcombine.low %v688_v46, %v702_v50  ;;  %v725_v18 = vrot.slane %v724_v10, 4  ;;  %v774_v44 = vshrl.u32 %v582_v38, 16  ;;  %v777_v48 = vshll.u32 %v582_v38, 16  ;;  %v3947_v38 = vld [vmem:[#allocation7 + $0x30] ss:$8 sps:$4 sm:$0xff]   ;;  %v4358_v41 = vld [vmem:[#allocation10 + $0x228] sm:$0xff]  }
  0xe4   :  { %3505 = vmatpush3.bf16.msra.mxu1 %v3925_v33  ;;  %v752_v32 = vor.u32 %v751_v25, %v748_v24  ;;  %v739_v33 = vrot.slane %v738_v29, 4  ;;  %v785_v56 = vrot.slane %v783_v49, 5  ;;  %v766_v59 = vor.u32 %v765_v51, %v762_v47  ;;  %v3939_v25 = vld [vmem:[#allocation7] ss:$8 sps:$4 sm:$0xff]  }
  0xe5   :  { %3633 = vmatpush3.bf16.msra.mxu0 %v3926_v21  ;;  %3487 = vmatmul.mubr.bf16.gmra.mrb[4].mxu1 %v3101_v54  ;;  %v743_v21 = vrot.slane %v741_v13, 5  ;;  %v730_v28 = vsel %vm4274_vm2, %v725_v18, %v729_v2  ;;  %v776_v53 = vrot.slane %v774_v44, 4  ;;  %v4342_v54 = vld [vmem:[#allocation10 + $0x200] sm:$0xff]   ;;  %v779_v55 = vrot.slane %v777_v48, 5  ;;  %v3951_v39 = vld [vmem:[#allocation7 + $0x48] ss:$8 sps:$4 sm:$0xff]  }
  0xe6   :  { %3634 = vmatprep.subr.bf16.mxu0 %v3930_v43  ;;  %3506 = vmatprep.subr.bf16.mxu1 %v3928_v58  ;;  %v3102_v31 = vcombine.low %v716_v23, %v730_v28  ;;  %v753_v35 = vrot.slane %v752_v32, 4  ;;  %v797_v2 = vshll.u32 %v585_v60, 16  ;;  %v767_v3 = vrot.slane %v766_v59, 4  ;;  %v3940_v23 = vld [vmem:[#allocation5 + $0x8] ss:$8 sps:$4 sm:$0xff]   ;;  %v3944_v28 = vld [vmem:[#allocation10 + $0x208] sm:$0xff]  }
  0xe7   :  { %v744_v40 = vsel %vm4274_vm2, %v739_v33, %v743_v21  ;;  %v780_v63 = vor.u32 %v779_v55, %v776_v53  ;;  %v805_v6 = vshll.u32 %v586_v61, 16  ;;  %v3946_v29 = vld [vmem:[#allocation5 + $0x28] ss:$8 sps:$4 sm:$0xff]   ;;  %v3948_v33 = vld [vmem:[#allocation5 + $0x38] ss:$8 sps:$4 sm:$0xff]  }
  0xe8   :  { %3507 = vmatpush3.bf16.msra.mxu1 %v3928_v58  ;;  %3619 = vmatmul.mubr.bf16.gmra.mrb[8].mxu0 %v3929_v30  ;;  %v758_v46 = vsel %vm4274_vm2, %v753_v35, %v757_v26  ;;  %v584_v58 = vld [vmem:[#allocation2 + $0x78] sm:$0xf]  ;;  %v799_v11 = vrot.slane %v797_v2, 5  ;;  %v3949_v30 = vld [vmem:[#allocation10 + $0x210] sm:$0xff]   ;;  %v3945_v32 = vld [vmem:[#allocation7 + $0x20] ss:$8 sps:$4 sm:$0xff]  }
  0xe9   :  { %3635 = vmatpush3.bf16.msra.mxu0 %v3930_v43  ;;  %3508 = vmatprep.subr.bf16.mxu1 %v3931_v5  ;;  %v769_v43 = vshll.u32 %v581_v37, 16  ;;  %v3103_v50 = vcombine.low %v744_v40, %v758_v46  ;;  %v788_v0 = vshrl.u32 %v584_v58, 16  ;;  %v791_v1 = vshll.u32 %v584_v58, 16  ;;  %v3950_v35 = vld [vmem:[#allocation10 + $0x218] sm:$0xff]   ;;  %v4356_v37 = vld [vmem:[#allocation10 + $0x220] sm:$0xff]  }
  0xea   :  { %3636 = vmatprep.subr.bf16.mxu0 %v3932_v62  ;;  %3490 = vmatprep.mubr.bf16.mxu1 %v3102_v31  ;;  %v781_v8 = vrot.slane %v780_v63, 4  ;;  %v3941_v31 = vld [vmem:[#allocation7 + $0x10] ss:$8 sps:$4 sm:$0xff]   ;;  %v2462_v44 = vld [vmem:[#allocation2 + $0xc] sm:$0x1] }
  0xeb   :  { %v771_v52 = vrot.slane %v769_v43, 5  ;;  %3622 = vmatprep.mubr.bf16.mxu0 %v3933_v57  ;;  %v790_v9 = vrot.slane %v788_v0, 4  ;;  %v793_v10 = vrot.slane %v791_v1, 5  ;;  %v3954_v40 = vld [vmem:[#allocation5 + $0x60] ss:$8 sps:$4 sm:$0xff]   ;;  %v2503_v51 = vshll.u32 %v2462_v44, 16 }
  0xec   :  { %3509 = vmatpush3.bf16.msra.mxu1 %v3931_v5  ;;  %v802_v5 = vshrl.u32 %v586_v61, 16  ;;  %v786_v16 = vsel %vm4274_vm2, %v781_v8, %v785_v56  ;;  %v2461_v43 = vld [vmem:[#allocation2 + $0x8] sm:$0xf]  ;;  %v2464_v46 = vld [vmem:[#allocation2 + $0x14] sm:$0x1] }
  0xed   :  { %3637 = vmatpush3.bf16.msra.mxu0 %v3932_v62  ;;  %3510 = vmatprep.subr.bf16.mxu1 %v3934_v22  ;;  %v587_v62 = vld [vmem:[#allocation2 + $0x84] sm:$0x1]  ;;  %v772_v12 = vsel %vm4274_vm2, %v767_v3, %v771_v52  ;;  %v794_v17 = vor.u32 %v793_v10, %v790_v9  ;;  %v2494_v47 = vshrl.u32 %v2461_v43, 16  ;;  %v2497_v48 = vshll.u32 %v2461_v43, 16  ;;  %v3953_v49 = vld [vmem:[#allocation7 + $0x58] ss:$8 sps:$4 sm:$0xff]  }
  0xee   :  { %3638 = vmatprep.subr.bf16.mxu0 %v3936_v14  ;;  %3491 = vmatmul.mubr.bf16.gmra.mrb[8].mxu1 %v3103_v50  ;;  %v811_v7 = vshll.u32 %v587_v62, 16  ;;  %v804_v13 = vrot.slane %v802_v5, 4  ;;  %v3104_v18 = vcombine.low %v772_v12, %v786_v16  ;;  %v4361_v50 = vld [vmem:[#allocation10 + $0x230] sm:$0xff]   ;;  %v2479_v60 = vld [vmem:[#allocation2 + $0x58] sm:$0xf]  ;;  %v2505_v62 = vrot.slane %v2503_v51, 5 }
  0xef   :  { %v795_v20 = vrot.slane %v794_v17, 4  ;;  %v2477_v55 = vld [vmem:[#allocation2 + $0x50] sm:$0xf]  ;;  %v2496_v57 = vrot.slane %v2494_v47, 4  ;;  %v2499_v58 = vrot.slane %v2497_v48, 5  ;;  %v2620_v10 = vshrl.u32 %v2479_v60, 16 }
  0xf0   :  { %3511 = vmatpush3.bf16.msra.mxu1 %v3934_v22  ;;  %v813_v15 = vrot.slane %v811_v7, 5  ;;  %3623 = vmatmul.mubr.bf16.gmra.mrb[12].mxu0 %v3935_v36  ;;  %v3957_v56 = vld [vmem:[#allocation7 + $0x68] ss:$8 sps:$4 sm:$0xff]   ;;  %v2478_v59 = vld [vmem:[#allocation2 + $0x54] sm:$0x1]  ;;  %v2606_v5 = vshrl.u32 %v2477_v55, 16 }
  0xf1   :  { %3639 = vmatpush3.bf16.msra.mxu0 %v3936_v14  ;;  %3512 = vmatprep.subr.bf16.mxu1 %v3937_v45  ;;  %v807_v14 = vrot.slane %v805_v6, 5  ;;  %v800_v22 = vsel %vm4274_vm2, %v795_v20, %v799_v11  ;;  %v3960_v61 = vld [vmem:[#allocation5 + $0x80] ss:$8 sps:$4 sm:$0xff]   ;;  %v2480_v2 = vld [vmem:[#allocation2 + $0x5c] sm:$0x1]  ;;  %v2500_v3 = vor.u32 %v2499_v58, %v2496_v57  ;;  %v2609_v6 = vshll.u32 %v2477_v55, 16 }
  0xf2   :  { %3640 = vmatprep.subr.bf16.mxu0 %v3938_v27  ;;  %3494 = vmatprep.mubr.bf16.mxu1 %v3104_v18  ;;  %v2615_v7 = vshll.u32 %v2478_v59, 16  ;;  %v2465_v8 = vld [vmem:[#allocation2 + $0x18] sm:$0xf]  ;;  %v2623_v11 = vshll.u32 %v2479_v60, 16  ;;  %v2629_v12 = vshll.u32 %v2480_v2, 16  ;;  %v2622_v20 = vrot.slane %v2620_v10, 4 }
  0xf3   :  { %v808_v19 = vor.u32 %v807_v14, %v804_v13  ;;  %3642 = vmatprep.mubr.bf16.mxu0 %v3940_v23  ;;  %v2466_v13 = vld [vmem:[#allocation2 + $0x1c] sm:$0x1]  ;;  %v2501_v14 = vrot.slane %v2500_v3, 4  ;;  %v2611_v16 = vrot.slane %v2609_v6, 5  ;;  %v2467_v36 = vld [vmem:[#allocation2 + $0x20] sm:$0xf] }
  0xf4   :  { %3513 = vmatpush3.bf16.msra.mxu1 %v3937_v45  ;;  %v2463_v45 = vld [vmem:[#allocation2 + $0x10] sm:$0xf]  ;;  %v2617_v17 = vrot.slane %v2615_v7, 5  ;;  %v4368_v18 = vld [vmem:[#allocation10 + $0x238] sm:$0xff]   ;;  %v2539_v44 = vshll.u32 %v2467_v36, 16 }
  0xf5   :  { %3641 = vmatpush3.bf16.msra.mxu0 %v3938_v27  ;;  %3690 = vmatprep.subr.bf16.mxu1 %v4342_v54  ;;  %v809_v21 = vrot.slane %v808_v19, 4  ;;  %v3942_v27 = vld [vmem:[#allocation5 + $0x18] ss:$8 sps:$4 sm:$0xff]   ;;  %v2508_v52 = vshrl.u32 %v2463_v45, 16  ;;  %v2511_v53 = vshll.u32 %v2463_v45, 16  ;;  %v2506_v23 = vsel %vm4274_vm2, %v2501_v14, %v2505_v62 }
  0xf6   :  { %3658 = vmatprep.subr.bf16.mxu0 %v4342_v54  ;;  %v2483_v48 = vld [vmem:[#allocation2 + $0x68] sm:$0xf] }
  0xf7   :  { %v814_v24 = vsel %vm4274_vm2, %v809_v21, %v813_v15  ;;  %v2510_v63 = vrot.slane %v2508_v52, 4  ;;  %v2513_v0 = vrot.slane %v2511_v53, 5  ;;  %v2608_v15 = vrot.slane %v2606_v5, 4  ;;  %v2471_v5 = vld [vmem:[#allocation2 + $0x30] sm:$0xf] }
  0xf8   :  { %v3105_v26 = vcombine.low %v800_v22, %v814_v24  ;;  %3643 = vmatmul.mubr.bf16.vlgmr.msra.gmra.mrb[0].mxu0 %v3942_v27  ;;  %v2625_v21 = vrot.slane %v2623_v11, 5  ;;  %v2631_v22 = vrot.slane %v2629_v12, 5  ;;  %v2541_v53 = vrot.slane %v2539_v44, 5 }
  0xf9   :  { %3659 = vmatpush3.bf16.msra.mxu0 %v4342_v54  ;;  %3646 = vmatprep.mubr.bf16.mxu0 %v3946_v29  ;;  %v2514_v9 = vor.u32 %v2513_v0, %v2510_v63  ;;  %v2612_v24 = vor.u32 %v2611_v16, %v2608_v15  ;;  %v2468_v29 = vld [vmem:[#allocation2 + $0x24] sm:$0x1]  ;;  %v2648_v63 = vshrl.u32 %v2483_v48, 16  ;;  %v2470_v0 = vld [vmem:[#allocation2 + $0x2c] sm:$0x1]  ;;  %v2651_v2 = vshll.u32 %v2483_v48, 16 }
  0xfa   :  { %3495 = vmatmul.mubr.bf16.gmra.mrb[12].mxu1 %v3105_v26  ;;  %3660 = vmatprep.subr.bf16.mxu0 %v3944_v28  ;;  %v2525_v26 = vshll.u32 %v2465_v8, 16  ;;  %v2545_v47 = vshll.u32 %v2468_v29, 16  ;;  %v2559_v15 = vshll.u32 %v2470_v0, 16 }
  0xfb   :  { %3514 = vmatprep.mubr.bf16.mxu1 %v3939_v25  ;;  %v2515_v19 = vrot.slane %v2514_v9, 4  ;;  %v2522_v25 = vshrl.u32 %v2465_v8, 16  ;;  %v2650_v9 = vrot.slane %v2648_v63, 4  ;;  %v2653_v11 = vrot.slane %v2651_v2, 5  ;;  %v2489_v63 = vld [vmem:[#allocation2 + $0x80] sm:$0xf] }
  0xfc   :  { %v2547_v58 = vrot.slane %v2545_v47, 5 }
  0xfd   :  { %3661 = vmatpush3.bf16.msra.mxu0 %v3944_v28 }
  0xfe   :  { %3662 = vmatprep.subr.bf16.mxu0 %v3949_v30 }
 0x100   :  { %3647 = vmatmul.mubr.bf16.gmra.mrb[4].mxu0 %v3948_v33 }
 0x101   :  { %3663 = vmatpush3.bf16.msra.mxu0 %v3949_v30  ;;  %3650 = vmatprep.mubr.bf16.mxu0 %v3952_v34  ;;  %v2613_v34 = vrot.slane %v2612_v24, 4  ;;  %v2486_v24 = vld [vmem:[#allocation2 + $0x74] sm:$0x1] }
 0x102   :  { %3515 = vmatmul.mubr.bf16.vlgmr.msra.gmra.mrb[0].mxu1 %v3941_v31  ;;  %3664 = vmatprep.subr.bf16.mxu0 %v3950_v35  ;;  %v2536_v31 = vshrl.u32 %v2467_v36, 16  ;;  %v2564_v36 = vshrl.u32 %v2471_v5, 16 }
 0x103   :  { %3698 = vmatpush3.bf16.msra.mxu1 %v4342_v54  ;;  %3518 = vmatprep.mubr.bf16.mxu1 %v3945_v32  ;;  %v2517_v54 = vshll.u32 %v2464_v46, 16  ;;  %v2481_v32 = vld [vmem:[#allocation2 + $0x60] sm:$0xf]  ;;  %v2618_v45 = vsel %vm4274_vm2, %v2613_v34, %v2617_v17 }
 0x104   :  { %3691 = vmatprep.subr.bf16.mxu1 %v3944_v28  ;;  %v2538_v43 = vrot.slane %v2536_v31, 4  ;;  %v2634_v51 = vshrl.u32 %v2481_v32, 16 }
 0x105   :  { %3665 = vmatpush3.bf16.msra.mxu0 %v3950_v35  ;;  %v2519_v1 = vrot.slane %v2517_v54, 5  ;;  %v2637_v54 = vshll.u32 %v2481_v32, 16  ;;  %v2488_v32 = vld [vmem:[#allocation2 + $0x7c] sm:$0x1] }
 0x106   :  { %3666 = vmatprep.subr.bf16.mxu0 %v4356_v37  ;;  %v2636_v59 = vrot.slane %v2634_v51, 4  ;;  %v2542_v60 = vor.u32 %v2541_v53, %v2538_v43 }
 0x107   :  { %3699 = vmatpush3.bf16.msra.mxu1 %v3944_v28  ;;  %v2520_v27 = vsel %vm4274_vm2, %v2515_v19, %v2519_v1  ;;  %v2626_v28 = vor.u32 %v2625_v21, %v2622_v20  ;;  %v2485_v19 = vld [vmem:[#allocation2 + $0x70] sm:$0xf]  ;;  %v2654_v21 = vor.u32 %v2653_v11, %v2650_v9 }
 0x108   :  { %3692 = vmatprep.subr.bf16.mxu1 %v3949_v30  ;;  %3651 = vmatmul.mubr.bf16.gmra.mrb[8].mxu0 %v3954_v40  ;;  %v3194_v33 = vcombine.low %v2506_v23, %v2520_v27  ;;  %v2543_v7 = vrot.slane %v2542_v60, 4  ;;  %v2567_v23 = vshll.u32 %v2471_v5, 16  ;;  %v2665_v34 = vshll.u32 %v2485_v19, 16  ;;  %v2491_v5 = vld [vmem:[#allocation2 + $0x88] sm:$0xf] }
 0x109   :  { %3667 = vmatpush3.bf16.msra.mxu0 %v4356_v37  ;;  %3654 = vmatprep.mubr.bf16.mxu0 %v3958_v42  ;;  %v2627_v40 = vrot.slane %v2626_v28, 4  ;;  %v2566_v28 = vrot.slane %v2564_v36, 4 }
 0x10a   :  { %3519 = vmatmul.mubr.bf16.gmra.mrb[4].mxu1 %v3947_v38  ;;  %3668 = vmatprep.subr.bf16.mxu0 %v4358_v41  ;;  %v2482_v38 = vld [vmem:[#allocation2 + $0x64] sm:$0x1]  ;;  %v2569_v31 = vrot.slane %v2567_v23, 5  ;;  %v2667_v44 = vrot.slane %v2665_v34, 5 }
 0x10b   :  { %3700 = vmatpush3.bf16.msra.mxu1 %v3949_v30  ;;  %3522 = vmatprep.mubr.bf16.mxu1 %v3951_v39  ;;  %v2531_v30 = vshll.u32 %v2466_v13, 16  ;;  %v3959_v39 = vld [vmem:[#allocation7 + $0x78] ss:$8 sps:$4 sm:$0xff]   ;;  %v2632_v52 = vsel %vm4274_vm2, %v2627_v40, %v2631_v22  ;;  %v2643_v55 = vshll.u32 %v2482_v38, 16  ;;  %v2472_v13 = vld [vmem:[#allocation2 + $0x34] sm:$0x1] }
 0x10c   :  { %3693 = vmatprep.subr.bf16.mxu1 %v3950_v35  ;;  %v2561_v22 = vrot.slane %v2559_v15, 5  ;;  %v2573_v29 = vshll.u32 %v2472_v13, 16  ;;  %v2690_v13 = vshrl.u32 %v2489_v63, 16 }
 0x10d   :  { %3669 = vmatpush3.bf16.msra.mxu0 %v4358_v41  ;;  %v2533_v42 = vrot.slane %v2531_v30, 5  ;;  %v2645_v62 = vrot.slane %v2643_v55, 5  ;;  %v2655_v30 = vrot.slane %v2654_v21, 4  ;;  %v2476_v55 = vld [vmem:[#allocation2 + $0x44] sm:$0x1] }
 0x10e   :  { %3670 = vmatprep.subr.bf16.mxu0 %v4361_v50 }
 0x10f   :  { %3701 = vmatpush3.bf16.msra.mxu1 %v3950_v35  ;;  %v2524_v35 = vrot.slane %v2522_v25, 4  ;;  %v2487_v25 = vld [vmem:[#allocation2 + $0x78] sm:$0xf] }
 0x110   :  { %3694 = vmatprep.subr.bf16.mxu1 %v4356_v37  ;;  %3655 = vmatmul.mubr.bf16.gmra.mrb[12].mxu0 %v3960_v61  ;;  %v2639_v61 = vrot.slane %v2637_v54, 5  ;;  %v2676_v38 = vshrl.u32 %v2487_v25, 16  ;;  %v2679_v53 = vshll.u32 %v2487_v25, 16  ;;  %v2685_v54 = vshll.u32 %v2488_v32, 16 }
 0x111   :  { %3671 = vmatpush3.bf16.msra.mxu0 %v4361_v50  ;;  %3674 = vmatprep.mubr.bf16.mxu0 %v3194_v33  ;;  %v2662_v33 = vshrl.u32 %v2485_v19, 16  ;;  %v2492_v19 = vld [vmem:[#allocation2 + $0x8c] sm:$0x1] }
 0x112   :  { %3523 = vmatmul.mubr.bf16.gmra.mrb[8].mxu1 %v3953_v49  ;;  %3672 = vmatprep.subr.bf16.mxu0 %v4368_v18  ;;  %v2484_v49 = vld [vmem:[#allocation2 + $0x6c] sm:$0x1]  ;;  %v2640_v8 = vor.u32 %v2639_v61, %v2636_v59  ;;  %v2713_v32 = vshll.u32 %v2492_v19, 16 }
 0x113   :  { %3702 = vmatpush3.bf16.msra.mxu1 %v4356_v37  ;;  %3526 = vmatprep.mubr.bf16.mxu1 %v3957_v56  ;;  %v2527_v37 = vrot.slane %v2525_v26, 5  ;;  %v2469_v56 = vld [vmem:[#allocation2 + $0x28] sm:$0xf]  ;;  %v2657_v3 = vshll.u32 %v2484_v49, 16  ;;  %v2664_v43 = vrot.slane %v2662_v33, 4  ;;  %v2678_v49 = vrot.slane %v2676_v38, 4 }
 0x114   :  { %3695 = vmatprep.subr.bf16.mxu1 %v4358_v41  ;;  %v2550_v6 = vshrl.u32 %v2469_v56, 16  ;;  %v2553_v10 = vshll.u32 %v2469_v56, 16  ;;  %v2641_v16 = vrot.slane %v2640_v8, 4 }
 0x115   :  { %v2528_v46 = vor.u32 %v2527_v37, %v2524_v35  ;;  %3673 = vmatpush3.bf16.msra.mxu0 %v4368_v18  ;;  %v2659_v12 = vrot.slane %v2657_v3, 5  ;;  %v2671_v37 = vshll.u32 %v2486_v24, 16 }
 0x116   :  { %v2552_v14 = vrot.slane %v2550_v6, 4  ;;  %v2555_v17 = vrot.slane %v2553_v10, 5  ;;  %v2646_v26 = vsel %vm4274_vm2, %v2641_v16, %v2645_v62  ;;  %v2681_v62 = vrot.slane %v2679_v53, 5  ;;  %v2490_v10 = vld [vmem:[#allocation2 + $0x84] sm:$0x1] }
 0x117   :  { %3703 = vmatpush3.bf16.msra.mxu1 %v4358_v41  ;;  %v3198_v41 = vcombine.low %v2618_v45, %v2632_v52  ;;  %v2529_v57 = vrot.slane %v2528_v46, 4  ;;  %v2660_v40 = vsel %vm4274_vm2, %v2655_v30, %v2659_v12  ;;  %v2474_v45 = vld [vmem:[#allocation2 + $0x3c] sm:$0x1]  ;;  %v2475_v46 = vld [vmem:[#allocation2 + $0x40] sm:$0xf]  ;;  %v2668_v52 = vor.u32 %v2667_v44, %v2664_v43 }
 0x118   :  { %3696 = vmatprep.subr.bf16.mxu1 %v4361_v50  ;;  %v2556_v27 = vor.u32 %v2555_v17, %v2552_v14  ;;  %v3199_v47 = vcombine.low %v2646_v26, %v2660_v40  ;;  %v2673_v61 = vrot.slane %v2671_v37, 5  ;;  %v2682_v6 = vor.u32 %v2681_v62, %v2678_v49 }
 0x119   :  { %v2534_v1 = vsel %vm4274_vm2, %v2529_v57, %v2533_v42  ;;  %v2570_v42 = vor.u32 %v2569_v31, %v2566_v28  ;;  %v2587_v57 = vshll.u32 %v2474_v45, 16  ;;  %v2669_v60 = vrot.slane %v2668_v52, 4 }
 0x11a   :  { %3527 = vmatmul.mubr.bf16.gmra.mrb[12].mxu1 %v3959_v39  ;;  %v2557_v35 = vrot.slane %v2556_v27, 4  ;;  %v2473_v39 = vld [vmem:[#allocation2 + $0x38] sm:$0xf]  ;;  %v2595_v9 = vshll.u32 %v2475_v46, 16  ;;  %v2601_v12 = vshll.u32 %v2476_v55, 16  ;;  %v2693_v14 = vshll.u32 %v2489_v63, 16 }
 0x11b   :  { %3704 = vmatpush3.bf16.msra.mxu1 %v4361_v50  ;;  %3682 = vmatprep.mubr.bf16.mxu1 %v3198_v41  ;;  %v2548_v50 = vsel %vm4274_vm2, %v2543_v7, %v2547_v58  ;;  %v2571_v51 = vrot.slane %v2570_v42, 4  ;;  %v2578_v56 = vshrl.u32 %v2473_v39, 16  ;;  %v2581_v41 = vshll.u32 %v2473_v39, 16 }
 0x11c   :  { %3697 = vmatprep.subr.bf16.mxu1 %v4368_v18  ;;  %v3195_v20 = vcombine.low %v2534_v1, %v2548_v50  ;;  %v2562_v48 = vsel %vm4274_vm2, %v2557_v35, %v2561_v22  ;;  %v2592_v58 = vshrl.u32 %v2475_v46, 16  ;;  %v2687_v1 = vrot.slane %v2685_v54, 5 }
 0x11d   :  { %v2580_v2 = vrot.slane %v2578_v56, 4  ;;  %v2583_v3 = vrot.slane %v2581_v41, 5  ;;  %v2589_v7 = vrot.slane %v2587_v57, 5  ;;  %v2674_v15 = vsel %vm4274_vm2, %v2669_v60, %v2673_v61 }
 0x11e   :  { %3675 = vmatmul.mubr.bf16.vlgmr.msra.gmra.mrb[0].mxu0 %v3195_v20  ;;  %v2594_v8 = vrot.slane %v2592_v58, 4  ;;  %v2683_v50 = vrot.slane %v2682_v6, 4  ;;  %v2597_v16 = vrot.slane %v2595_v9, 5  ;;  %v2704_v17 = vshrl.u32 %v2491_v5, 16 }
 0x11f   :  { %3705 = vmatpush3.bf16.msra.mxu1 %v4368_v18  ;;  %v2575_v18 = vrot.slane %v2573_v29, 5  ;;  %v2584_v11 = vor.u32 %v2583_v3, %v2580_v2  ;;  %v2692_v20 = vrot.slane %v2690_v13, 4  ;;  %v2695_v21 = vrot.slane %v2693_v14, 5  ;;  %v4428_v14 = vld [vmem:[#allocation11] ss:$0 sm:$0xff] }
 0x120   :  { %v2699_v22 = vshll.u32 %v2490_v10, 16  ;;  %v2688_v23 = vsel %vm4274_vm2, %v2683_v50, %v2687_v1  ;;  %v2598_v24 = vor.u32 %v2597_v16, %v2594_v8  ;;  %v2603_v25 = vrot.slane %v2601_v12, 5 }
 0x121   :  { %v2576_v59 = vsel %vm4274_vm2, %v2571_v51, %v2575_v18  ;;  %v2585_v36 = vrot.slane %v2584_v11, 4  ;;  %v3200_v26 = vcombine.low %v2674_v15, %v2688_v23  ;;  %v2696_v27 = vor.u32 %v2695_v21, %v2692_v20 }
 0x122   :  { %3683 = vmatmul.mubr.bf16.vlgmr.msra.gmra.mrb[16].mxu1 %v3199_v47  ;;  %v3196_v0 = vcombine.low %v2562_v48, %v2576_v59  ;;  %v2706_v28 = vrot.slane %v2704_v17, 4  ;;  %v2707_v29 = vshll.u32 %v2491_v5, 16  ;;  %v2599_v31 = vrot.slane %v2598_v24, 4 }
 0x123   :  { %v2590_v30 = vsel %vm4274_vm2, %v2585_v36, %v2589_v7  ;;  %3686 = vmatprep.mubr.bf16.mxu1 %v3200_v26  ;;  %v2697_v33 = vrot.slane %v2696_v27, 4  ;;  %v2701_v34 = vrot.slane %v2699_v22, 5  ;;  %v2715_v39 = vrot.slane %v2713_v32, 5 }
 0x124   :  { %3678 = vmatprep.mubr.bf16.mxu0 %v3196_v0  ;;  %v2709_v35 = vrot.slane %v2707_v29, 5  ;;  %v2604_v18 = vsel %vm4274_vm2, %v2599_v31, %v2603_v25 }
 0x125   :  { %v3197_v37 = vcombine.low %v2590_v30, %v2604_v18  ;;  %v2702_v40 = vsel %vm4274_vm2, %v2697_v33, %v2701_v34 }
 0x126   :  { %v2710_v38 = vor.u32 %v2709_v35, %v2706_v28 }
 0x127   :  { %3679 = vmatmul.mubr.bf16.gmra.mrb[4].mxu0 %v3197_v37 }
 0x128   :  { %v2711_v42 = vrot.slane %v2710_v38, 4 }
 0x12a   :  { %v2716_v43 = vsel %vm4274_vm2, %v2711_v42, %v2715_v39 }
 0x12b   :  { %v3201_v44 = vcombine.low %v2702_v40, %v2716_v43 }
 0x12d   :  { %3687 = vmatmul.mubr.bf16.gmra.mrb[20].mxu1 %v3201_v44 }
 0x1d5   :  { %v3516_v45 = vpop.f32.mrb[0].mxu1 }
 0x1d6   :  { %v1188_v46 = vpop.f32.mrb[1].mxu1 }
 0x1d7   :  { %v3517_v47 = vpop.f32.mrb[2].mxu1 }
 0x1d8   :  { %v1191_v48 = vpop.f32.mrb[3].mxu1 }
 0x1db   :  { %v3652_v53 = vpop.f32.mrb[8].mxu0 }
 0x1dc   :  { %v2414_v55 = vpop.f32.mrb[9].mxu0 }
 0x1dd   :  { %v4412_v49 = vpop.f32.mrb[4].mxu1  ;;  %v3653_v56 = vpop.f32.mrb[10].mxu0 }
 0x1de   :  { %v4414_v51 = vpop.f32.mrb[5].mxu1  ;;  %v2417_v41 = vpop.f32.mrb[11].mxu0 }
 0x1df   :  { %v4416_v52 = vpop.f32.mrb[6].mxu1 }
 0x1e0   :  { %v4418_v54 = vpop.f32.mrb[7].mxu1 }
 0x1e3   :  { %v3656_v61 = vpop.f32.mrb[12].mxu0 }
 0x1e4   :  { %v2430_v0 = vpop.f32.mrb[13].mxu0 }
 0x1e5   :  { %v3524_v4 = vpop.f32.mrb[8].mxu1  ;;  %v3657_v2 = vpop.f32.mrb[14].mxu0 }
 0x1e6   :  { %v3714_v57 = vadd.f32 %v3652_v53, %v3524_v4  ;;  %v1220_v58 = vpop.f32.mrb[9].mxu1  ;;  %v2433_v3 = vpop.f32.mrb[15].mxu0 }
 0x1e7   :  { %v3716_v59 = vadd.f32 %v2414_v55, %v1220_v58  ;;  %v3525_v60 = vpop.f32.mrb[10].mxu1 }
 0x1e8   :  { %v3718_v62 = vadd.f32 %v3653_v56, %v3525_v60  ;;  %v1223_v63 = vpop.f32.mrb[11].mxu1 }
 0x1e9   :  { %v3720_v1 = vadd.f32 %v2417_v41, %v1223_v63 }
 0x1ed   :  { %v3528_v5 = vpop.f32.mrb[12].mxu1 }
 0x1ee   :  { %v4420_v6 = vadd.f32 %v3656_v61, %v3528_v5  ;;  %v1236_v7 = vpop.f32.mrb[13].mxu1 }
 0x1ef   :  { %v4422_v8 = vadd.f32 %v2430_v0, %v1236_v7  ;;  %v3529_v9 = vpop.f32.mrb[14].mxu1 }
 0x1f0   :  { %v4424_v10 = vadd.f32 %v3657_v2, %v3529_v9  ;;  %v1239_v11 = vpop.f32.mrb[15].mxu1 }
 0x1f1   :  { %v4426_v12 = vadd.f32 %v2433_v3, %v1239_v11  ;;  %v3676_v13 = vpop.f32.mrb[0].mxu0 }
 0x1f2   :  { %v3706_v15 = vadd.f32 %v3676_v13, %v3516_v45  ;;  %v2848_v50 = vpop.f32.mrb[1].mxu0 }
 0x1f3   :  { %v3707_v16 = vadd.f32 %v2848_v50, %v1188_v46  ;;  %v3677_v17 = vpop.f32.mrb[2].mxu0 }
 0x1f4   :  { %v2936_v36 = vadd.f32 %v3706_v15, %v4428_v14  ;;  %v3708_v19 = vadd.f32 %v3677_v17, %v3517_v47  ;;  %v2851_v20 = vpop.f32.mrb[3].mxu0 }
 0x1f5   :  { %v2934_v21 = vadd.f32 %v3707_v16, %v4428_v14  ;;  %v3709_v22 = vadd.f32 %v2851_v20, %v1191_v48  ;;  %v3684_v24 = vpop.f32.mrb[16].mxu1 }
 0x1f6   :  { %vm2952_vm3 = vcmp.ge.f32.partialorder %v2936_v36, 0.0  ;;  %v2968_v23 = vmul.f32 0.2, %v2936_v36  ;;  %v2937_v25 = vadd.f32 %v3708_v19, %v4428_v14  ;;  %v3715_v26 = vadd.f32 %v3714_v57, %v3684_v24  ;;  %v2880_v28 = vpop.f32.mrb[17].mxu1 }
 0x1f7   :  { %vm2950_vm4 = vcmp.ge.f32.partialorder %v2934_v21, 0.0  ;;  %v2966_v27 = vmul.f32 0.2, %v2934_v21  ;;  %v2935_v29 = vadd.f32 %v3709_v22, %v4428_v14  ;;  %v3717_v31 = vadd.f32 %v3716_v59, %v2880_v28  ;;  %v3685_v33 = vpop.f32.mrb[18].mxu1 }
 0x1f8   :  { %v2984_v30 = vsel %vm2952_vm3, %v2936_v36, %v2968_v23  ;;  %vm2953_vm5 = vcmp.ge.f32.partialorder %v2937_v25, 0.0  ;;  %v2969_v32 = vmul.f32 0.2, %v2937_v25  ;;  %v2944_v35 = vadd.f32 %v3715_v26, %v4428_v14  ;;  %v2883_v37 = vpop.f32.mrb[19].mxu1 }
 0x1f9   :  { %v3000_v34 = vmul.f32 0.23570226, %v2984_v30  ;;  %v3719_v18 = vadd.f32 %v3718_v62, %v3685_v33  ;;  %v2982_v38 = vsel %vm2950_vm4, %v2934_v21, %v2966_v27  ;;  %v2942_v39 = vadd.f32 %v3717_v31, %v4428_v14 }
 0x1fa   :  { %v2985_v40 = vsel %vm2953_vm5, %v2937_v25, %v2969_v32  ;;  %vm2951_vm6 = vcmp.ge.f32.partialorder %v2935_v29, 0.0  ;;  %vm2960_vm7 = vcmp.ge.f32.partialorder %v2944_v35, 0.0  ;;  %v2976_v42 = vmul.f32 0.2, %v2944_v35  ;;  %v3680_v5 = vpop.f32.mrb[4].mxu0 }
 0x1fb   :  { %v3001_v43 = vmul.f32 0.23570226, %v2985_v40  ;;  %v2945_v44 = vadd.f32 %v3719_v18, %v4428_v14  ;;  %vm2958_vm8 = vcmp.ge.f32.partialorder %v2942_v39, 0.0  ;;  %v2974_v45 = vmul.f32 0.2, %v2942_v39  ;;  %v2864_v11 = vpop.f32.mrb[5].mxu0 }
 0x1fc   :  { %v2967_v46 = vmul.f32 0.2, %v2935_v29  ;;  %v3721_v47 = vadd.f32 %v3720_v1, %v2883_v37  ;;  %v2992_v48 = vsel %vm2960_vm7, %v2944_v35, %v2976_v42  ;;  %v2998_v57 = vmul.f32 0.23570226, %v2982_v38  ;;  %v3681_v15 = vpop.f32.mrb[6].mxu0 }
 0x1fd   :  { %v3219_v53 = vpack.c.bf16 %v3001_v43, %v3000_v34  ;;  %vm2961_vm9 = vcmp.ge.f32.partialorder %v2945_v44, 0.0  ;;  %v2977_v55 = vmul.f32 0.2, %v2945_v44  ;;  %v3008_v4 = vmul.f32 0.23570226, %v2992_v48  ;;  %v2867_v17 = vpop.f32.mrb[7].mxu0 }
 0x1fe   :  { %v2983_v56 = vsel %vm2951_vm6, %v2935_v29, %v2967_v46  ;;  %v2943_v41 = vadd.f32 %v3721_v47, %v4428_v14  ;;  %v2990_v60 = vsel %vm2958_vm8, %v2942_v39, %v2974_v45  ;;  %v3710_v9 = vadd.f32 %v3680_v5, %v4412_v49 }
 0x1ff   :  { %3251 = vst [vmem:[#allocation13 + $0x8] sm:$0xff] %v3219_v53   ;;  %v2993_v58 = vsel %vm2961_vm9, %v2945_v44, %v2977_v55  ;;  %v2999_v59 = vmul.f32 0.23570226, %v2983_v56  ;;  %v3006_v1 = vmul.f32 0.23570226, %v2990_v60  ;;  %v3711_v13 = vadd.f32 %v2864_v11, %v4414_v51 }
 0x200   :  { %v3009_v61 = vmul.f32 0.23570226, %v2993_v58  ;;  %vm2959_vm10 = vcmp.ge.f32.partialorder %v2943_v41, 0.0  ;;  %v2975_v62 = vmul.f32 0.2, %v2943_v41  ;;  %v2940_v50 = vadd.f32 %v3710_v9, %v4428_v14  ;;  %v3688_v21 = vpop.f32.mrb[20].mxu1 }
 0x201   :  { %v3214_v63 = vpack.c.bf16 %v2999_v59, %v2998_v57  ;;  %v3712_v16 = vadd.f32 %v3681_v15, %v4416_v52  ;;  %v2938_v36 = vadd.f32 %v3711_v13, %v4428_v14  ;;  %v3713_v19 = vadd.f32 %v2867_v17, %v4418_v54  ;;  %v2896_v23 = vpop.f32.mrb[21].mxu1 }
 0x202   :  { %v3239_v0 = vpack.c.bf16 %v3009_v61, %v3008_v4  ;;  %v2991_v2 = vsel %vm2959_vm10, %v2943_v41, %v2975_v62  ;;  %vm2956_vm11 = vcmp.ge.f32.partialorder %v2940_v50, 0.0  ;;  %v2972_v20 = vmul.f32 0.2, %v2940_v50  ;;  %v3689_v27 = vpop.f32.mrb[22].mxu1 }
 0x203   :  { %3215 = vst [vmem:[#allocation13] sm:$0xff] %v3214_v63   ;;  %v3007_v3 = vmul.f32 0.23570226, %v2991_v2  ;;  %v2941_v22 = vadd.f32 %v3712_v16, %v4428_v14  ;;  %v3723_v49 = vadd.f32 %v4420_v6, %v3688_v21  ;;  %vm2954_vm12 = vcmp.ge.f32.partialorder %v2938_v36, 0.0  ;;  %v2899_v30 = vpop.f32.mrb[23].mxu1 }
 0x204   :  { %3255 = vst [vmem:[#allocation13 + $0x28] sm:$0xff] %v3239_v0   ;;  %v2970_v51 = vmul.f32 0.2, %v2938_v36  ;;  %v2939_v24 = vadd.f32 %v3713_v19, %v4428_v14  ;;  %v2988_v25 = vsel %vm2956_vm11, %v2940_v50, %v2972_v20  ;;  %v3725_v52 = vadd.f32 %v4422_v8, %v2896_v23 }
 0x205   :  { %v3234_v7 = vpack.c.bf16 %v3007_v3, %v3006_v1  ;;  %vm2957_vm13 = vcmp.ge.f32.partialorder %v2941_v22, 0.0  ;;  %v2973_v26 = vmul.f32 0.2, %v2941_v22  ;;  %v3004_v28 = vmul.f32 0.23570226, %v2988_v25 }
 0x206   :  { %v2948_v54 = vadd.f32 %v3723_v49, %v4428_v14  ;;  %v3727_v29 = vadd.f32 %v4424_v10, %v3689_v27  ;;  %v2986_v31 = vsel %vm2954_vm12, %v2938_v36, %v2970_v51  ;;  %v2946_v6 = vadd.f32 %v3725_v52, %v4428_v14 }
 0x207   :  { %3254 = vst [vmem:[#allocation13 + $0x20] sm:$0xff] %v3234_v7   ;;  %v2989_v32 = vsel %vm2957_vm13, %v2941_v22, %v2973_v26  ;;  %vm2955_vm14 = vcmp.ge.f32.partialorder %v2939_v24, 0.0  ;;  %v2971_v18 = vmul.f32 0.2, %v2939_v24  ;;  %v3729_v37 = vadd.f32 %v4426_v12, %v2899_v30 }
 0x208   :  { %vm2964_vm15 = vcmp.ge.f32.partialorder %v2948_v54, 0.0  ;;  %v2980_v33 = vmul.f32 0.2, %v2948_v54  ;;  %v3005_v34 = vmul.f32 0.23570226, %v2989_v32  ;;  %v2949_v35 = vadd.f32 %v3727_v29, %v4428_v14 }
 0x209   :  { %vm2962_vm0 = vcmp.ge.f32.partialorder %v2946_v6, 0.0  ;;  %v2978_v8 = vmul.f32 0.2, %v2946_v6  ;;  %v2987_v40 = vsel %vm2955_vm14, %v2939_v24, %v2971_v18  ;;  %v2947_v42 = vadd.f32 %v3729_v37, %v4428_v14 }
 0x20a   :  { %v2996_v38 = vsel %vm2964_vm15, %v2948_v54, %v2980_v33  ;;  %v3229_v39 = vpack.c.bf16 %v3005_v34, %v3004_v28  ;;  %vm2965_vm1 = vcmp.ge.f32.partialorder %v2949_v35, 0.0  ;;  %v2981_v10 = vmul.f32 0.2, %v2949_v35 }
 0x20b   :  { %v3012_v43 = vmul.f32 0.23570226, %v2996_v38  ;;  %v3002_v44 = vmul.f32 0.23570226, %v2986_v31  ;;  %v3003_v46 = vmul.f32 0.23570226, %v2987_v40  ;;  %v2994_v47 = vsel %vm2962_vm0, %v2946_v6, %v2978_v8 }
 0x20c   :  { %3253 = vst [vmem:[#allocation13 + $0x18] sm:$0xff] %v3229_v39   ;;  %v2997_v45 = vsel %vm2965_vm1, %v2949_v35, %v2981_v10  ;;  %vm2963_vm2 = vcmp.ge.f32.partialorder %v2947_v42, 0.0  ;;  %v2979_v53 = vmul.f32 0.2, %v2947_v42  ;;  %v3010_v12 = vmul.f32 0.23570226, %v2994_v47 }
 0x20d   :  { %v3013_v48 = vmul.f32 0.23570226, %v2997_v45  ;;  %v3224_v55 = vpack.c.bf16 %v3003_v46, %v3002_v44 }
 0x20e   :  { %v2995_v41 = vsel %vm2963_vm2, %v2947_v42, %v2979_v53 }
 0x20f   :  { %v3249_v56 = vpack.c.bf16 %v3013_v48, %v3012_v43  ;;  %3252 = vst [vmem:[#allocation13 + $0x10] sm:$0xff] %v3224_v55   ;;  %v3011_v4 = vmul.f32 0.23570226, %v2995_v41 }
 0x211   :  { %3257 = vst [vmem:[#allocation13 + $0x38] sm:$0xff] %v3249_v56   ;;  %v3244_v57 = vpack.c.bf16 %v3011_v4, %v3010_v12 }
 0x213   :  { %3256 = vst [vmem:[#allocation13 + $0x30] sm:$0xff] %v3244_v57  }
 0x214   :  { %4106 = shalt.err (!%p4103_p10)
}
 0x215   :  { %s4107_s23 = scalar_lea.hbm %s4475_s6, 1024 }
 0x216   :  { %p4108_p11 = scmp.ne.s32.totalorder %s4475_s6, %s4107_s23  ;;  %p4111_p12 = scmp.lt.u32.totalorder %s4107_s23, %s4475_s6 }
 0x218   :  { %p4113_p13 = pnand %p4111_p12, %p4108_p11 }
 0x21a   :  { %4116 = shalt.err (!%p4113_p13)
}
 0x21b   :  { %3057 = dma.vmem_to_hbm [thread:$0]  %s3052_s0, 1024, %s4475_s6, [#allocation4], %s4129_s9, %s4129_s9, %s4130_s10  }
 0x21c   :  { %4125 = dma.done.wait [#allocation4], 1024  }
 0x21d   :  { %4126 = vsyncadd [#allocation4], 4294966272 }
 0x21e   :  { %3061 = vsyncpa [#allocation3], 1 }
 0x21f   :  { %3062 = vsyncpa [#allocation6], 1 }
 0x220   :  { %3063 = vsyncpa [#allocation9], 1 }
 0x221   :  { %3064 = vsyncpa [#allocation12], 1 }
 0x222   :  { %3065 = vsyncpa [#allocation4], 1 }

// kernel: to_style_forward.4
= control target key start
LH: loop header
LB: loop body
LE: loop exit
PB: predicated region body
PF: predicated region fallthrough
CT: control target
= control target key end

     0   :  { %11 = vsyncpa [#allocation3], 0  ;;  %s3194_s0 = inlined_call_operand.hbm [shape: bf16[2,5,5,128], index: 0, kind: input, shape index: {}]   ;;  %s3195_s1 = inlined_call_operand.hbm [shape: bf16[2,5,5,128], index: 1, kind: input, shape index: {}]   ;;  %s3196_s2 = inlined_call_operand.hbm [shape: bf16[2,5,5,128], index: 2, kind: input, shape index: {}]   ;;  %s3197_s3 = inlined_call_operand.hbm [shape: bf16[2,5,5,128], index: 3, kind: input, shape index: {}]   ;;  %s3198_s4 = inlined_call_operand.hbm [shape: bf16[9,128,128], index: 4, kind: input, shape index: {}]   ;;  %s3199_s5 = inlined_call_operand.hbm [shape: f32[1,128], index: 5, kind: input, shape index: {}]   ;;  %s3200_s6 = inlined_call_operand.hbm [shape: bf16[2,4,4,128], index: 6, kind: output, shape index: {}]  }
   0x1   :  { %12 = vsyncpa [#allocation6], 0 }
   0x2   :  { %13 = vsyncpa [#allocation9], 0 }
   0x3   :  { %14 = vsyncpa [#allocation12], 0 }
   0x4   :  { %15 = vsyncpa [#allocation4], 0  ;;  %s2933_s21 = smov [#allocation5]   ;;  %s2934_s23 = smov [#allocation8]  }
   0x5   :  { %s33_s22 = sshll.u32 %s2933_s21, 4  ;;  %s57_s24 = sshll.u32 %s2934_s23, 4  ;;  %s34_s22 = int_to_ptr.vmem [resolvable:$true] %s33_s22  ;;  %s2980_s24 = int_to_ptr.vmem [resolvable:$true] %s57_s24 }
   0x6   :  { %s2769_s27 = scalar_lea.hbm %s3195_s1, 640 }
   0x7   :  { %p2770_p0 = scmp.ne.s32.totalorder %s3195_s1, %s2769_s27  ;;  %p2773_p1 = scmp.lt.u32.totalorder %s2769_s27, %s3195_s1 }
   0x9   :  { %p2775_p2 = pnand %p2773_p1, %p2770_p0 }
   0xb   :  { %2778 = shalt.err (!%p2775_p2)
}
   0xc   :  { %s2779_s8 = scalar_lea.vmem %s34_s22, 640  ;;  %p2784_p4 = scmp.lt.s32.totalorder %s34_s22, %s34_s22 }
   0xd   :  { %p2780_p3 = scmp.ne.s32.totalorder %s34_s22, %s2779_s8  ;;  %p2785_p5 = scmp.lt.s32.totalorder %s2779_s8, %s2779_s8 }
   0xf   :  { %p2786_p6 = por %p2785_p5, %p2784_p4 }
  0x11   :  { %p2787_p7 = pnand %p2786_p6, %p2780_p3 }
  0x13   :  { %2790 = shalt.err (!%p2787_p7)
}
  0x14   :  { %s2935_s9 = smov 64   ;;  %s2936_s10 = smov 4  }
  0x15   :  { %39 = dma.hbm_to_vmem [thread:$0]  %s3195_s1, 640, %s34_s22, [#allocation6], %s2935_s9, %s2935_s9, %s2936_s10  }
  0x16   :  { %s2791_s15 = scalar_lea.hbm %s3197_s3, 640 }
  0x17   :  { %p2792_p8 = scmp.ne.s32.totalorder %s3197_s3, %s2791_s15  ;;  %p2795_p9 = scmp.lt.u32.totalorder %s2791_s15, %s3197_s3 }
  0x19   :  { %p2797_p10 = pnand %p2795_p9, %p2792_p8 }
  0x1b   :  { %2800 = shalt.err (!%p2797_p10)
}
  0x1c   :  { %s2801_s20 = scalar_lea.vmem %s2980_s24, 640  ;;  %p2806_p12 = scmp.lt.s32.totalorder %s2980_s24, %s2980_s24 }
  0x1d   :  { %p2802_p11 = scmp.ne.s32.totalorder %s2980_s24, %s2801_s20  ;;  %p2807_p13 = scmp.lt.s32.totalorder %s2801_s20, %s2801_s20 }
  0x1f   :  { %p2808_p0 = por %p2807_p13, %p2806_p12 }
  0x21   :  { %p2809_p1 = pnand %p2808_p0, %p2802_p11 }
  0x23   :  { %2812 = shalt.err (!%p2809_p1)
}
  0x24   :  { %63 = dma.hbm_to_vmem [thread:$0]  %s3197_s3, 640, %s2980_s24, [#allocation9], %s2935_s9, %s2935_s9, %s2936_s10  }
  0x25   :  { %s2937_s22 = smov [#allocation2]   ;;  %s2938_s25 = smov [#allocation7]  }
  0x26   :  { %s21_s23 = sshll.u32 %s2937_s22, 4  ;;  %s45_s26 = sshll.u32 %s2938_s25, 4  ;;  %s22_s23 = int_to_ptr.vmem [resolvable:$true] %s21_s23  ;;  %s3017_s26 = int_to_ptr.vmem [resolvable:$true] %s45_s26 }
  0x27   :  { %s2813_s29 = scalar_lea.hbm %s3194_s0, 640 }
  0x28   :  { %p2814_p2 = scmp.ne.s32.totalorder %s3194_s0, %s2813_s29  ;;  %p2817_p3 = scmp.lt.u32.totalorder %s2813_s29, %s3194_s0 }
  0x2a   :  { %p2819_p4 = pnand %p2817_p3, %p2814_p2 }
  0x2c   :  { %2822 = shalt.err (!%p2819_p4)
}
  0x2d   :  { %s2823_s3 = scalar_lea.vmem %s22_s23, 640  ;;  %p2828_p6 = scmp.lt.s32.totalorder %s22_s23, %s22_s23 }
  0x2e   :  { %p2824_p5 = scmp.ne.s32.totalorder %s22_s23, %s2823_s3  ;;  %p2829_p7 = scmp.lt.s32.totalorder %s2823_s3, %s2823_s3 }
  0x30   :  { %p2830_p8 = por %p2829_p7, %p2828_p6 }
  0x32   :  { %p2831_p9 = pnand %p2830_p8, %p2824_p5 }
  0x34   :  { %2834 = shalt.err (!%p2831_p9)
}
  0x35   :  { %27 = dma.hbm_to_vmem [thread:$0]  %s3194_s0, 640, %s22_s23, [#allocation3], %s2935_s9, %s2935_s9, %s2936_s10  }
  0x36   :  { %s2835_s15 = scalar_lea.hbm %s3196_s2, 640 }
  0x37   :  { %p2836_p10 = scmp.ne.s32.totalorder %s3196_s2, %s2835_s15  ;;  %p2839_p11 = scmp.lt.u32.totalorder %s2835_s15, %s3196_s2 }
  0x39   :  { %p2841_p12 = pnand %p2839_p11, %p2836_p10 }
  0x3b   :  { %2844 = shalt.err (!%p2841_p12)
}
  0x3c   :  { %s2845_s20 = scalar_lea.vmem %s3017_s26, 640  ;;  %p2850_p0 = scmp.lt.s32.totalorder %s3017_s26, %s3017_s26 }
  0x3d   :  { %p2846_p13 = scmp.ne.s32.totalorder %s3017_s26, %s2845_s20  ;;  %p2851_p1 = scmp.lt.s32.totalorder %s2845_s20, %s2845_s20 }
  0x3f   :  { %p2852_p2 = por %p2851_p1, %p2850_p0 }
  0x41   :  { %p2853_p3 = pnand %p2852_p2, %p2846_p13 }
  0x43   :  { %2856 = shalt.err (!%p2853_p3)
}
  0x44   :  { %51 = dma.hbm_to_vmem [thread:$0]  %s3196_s2, 640, %s3017_s26, [#allocation6], %s2935_s9, %s2935_s9, %s2936_s10  }
  0x45   :  { %s2939_s21 = smov [#allocation10]   ;;  %s2940_s23 = smov [#allocation11]  }
  0x46   :  { %s69_s22 = sshll.u32 %s2939_s21, 4  ;;  %s82_s25 = sshll.u32 %s2940_s23, 4  ;;  %s70_s22 = int_to_ptr.vmem [resolvable:$true] %s69_s22  ;;  %s83_s25 = int_to_ptr.vmem [resolvable:$true] %s82_s25 }
  0x47   :  { %s2857_s29 = scalar_lea.hbm %s3198_s4, 9216 }
  0x48   :  { %p2858_p4 = scmp.ne.s32.totalorder %s3198_s4, %s2857_s29  ;;  %p2861_p5 = scmp.lt.u32.totalorder %s2857_s29, %s3198_s4 }
  0x4a   :  { %p2863_p6 = pnand %p2861_p5, %p2858_p4 }
  0x4c   :  { %2866 = shalt.err (!%p2863_p6)
}
  0x4d   :  { %s2867_s2 = scalar_lea.vmem %s70_s22, 9216  ;;  %p2872_p8 = scmp.lt.s32.totalorder %s70_s22, %s70_s22 }
  0x4e   :  { %p2868_p7 = scmp.ne.s32.totalorder %s70_s22, %s2867_s2  ;;  %p2873_p9 = scmp.lt.s32.totalorder %s2867_s2, %s2867_s2 }
  0x50   :  { %p2874_p10 = por %p2873_p9, %p2872_p8 }
  0x52   :  { %p2875_p11 = pnand %p2874_p10, %p2868_p7 }
  0x54   :  { %2878 = shalt.err (!%p2875_p11)
}
  0x55   :  { %75 = dma.hbm_to_vmem [thread:$0]  %s3198_s4, 9216, %s70_s22, [#allocation9], %s2935_s9, %s2935_s9, %s2936_s10  }
  0x56   :  { %s2879_s13 = scalar_lea.hbm %s3199_s5, 16 }
  0x57   :  { %p2880_p12 = scmp.ne.s32.totalorder %s3199_s5, %s2879_s13  ;;  %p2883_p13 = scmp.lt.u32.totalorder %s2879_s13, %s3199_s5 }
  0x59   :  { %p2885_p0 = pnand %p2883_p13, %p2880_p12 }
  0x5b   :  { %2888 = shalt.err (!%p2885_p0)
}
  0x5c   :  { %s2889_s18 = scalar_lea.vmem %s83_s25, 16  ;;  %s2893_s19 = scalar_lea.vmem %s83_s25, 32 }
  0x5d   :  { %p2890_p1 = scmp.ne.s32.totalorder %s83_s25, %s2889_s18  ;;  %p2894_p2 = scmp.lt.s32.totalorder %s83_s25, %s83_s25 }
  0x5e   :  { %p2895_p3 = scmp.lt.s32.totalorder %s2893_s19, %s2889_s18 }
  0x60   :  { %p2896_p4 = por %p2895_p3, %p2894_p2 }
  0x62   :  { %p2897_p5 = pnand %p2896_p4, %p2890_p1 }
  0x64   :  { %2900 = shalt.err (!%p2897_p5)
}
  0x65   :  { %85 = dma.hbm_to_vmem [thread:$0]  %s3199_s5, 16, %s83_s25, [#allocation12]  }
  0x66   :  { %2923 = dma.done.wait [#allocation3], 640  }
  0x67   :  { %2924 = vsyncadd [#allocation3], 4294966656 }
  0x68   :  { %2925 = dma.done.wait [#allocation6], 1280  }
  0x69   :  { %2926 = vsyncadd [#allocation6], 4294966016 }
  0x6a   :  { %2927 = dma.done.wait [#allocation9], 9856  }
  0x6b   :  { %2928 = vsyncadd [#allocation9], 4294957440 }
  0x6c   :  { %2929 = dma.done.wait [#allocation12], 16  }
  0x6d   :  { %2930 = vsyncadd [#allocation12], 4294967280  ;;  %v2649_v0 = vld [vmem:[#allocation10 + $0x40] sm:$0xff]   ;;  %v2651_v2 = vld [vmem:[#allocation10 + $0x48] sm:$0xff]   ;;  %v2941_v6 = vmov 1983009808   ;;  %v167_v8 = vlaneseq }
  0x6e   :  { %v2650_v1 = vld [vmem:[#allocation10 + $0x100] sm:$0xff]   ;;  %2425 = vmatprep.subr.bf16.mxu1 %v2649_v0  ;;  %v2652_v3 = vld [vmem:[#allocation10 + $0x108] sm:$0xff]   ;;  %v2653_v4 = vld [vmem:[#allocation10 + $0x50] sm:$0xff]   ;;  %v165_v7 = vunpack.c.l.s4 %v2941_v6  ;;  %vm516_vm0 = vsmask.f32 1280  ;;  %s2942_s5 = smov [#allocation13]  }
  0x6f   :  { %2505 = vmatprep.subr.bf16.mxu0 %v2650_v1  ;;  %2426 = vmatpush3.bf16.msra.mxu1 %v2649_v0  ;;  %v2654_v5 = vld [vmem:[#allocation10 + $0x110] sm:$0xff]   ;;  %v2655_v9 = vld [vmem:[#allocation10 + $0x58] sm:$0xff]   ;;  %v168_v12 = vshrl.u32 %v167_v8, 7  ;;  %v2657_v13 = vld [vmem:[#allocation10 + $0x60] sm:$0xff]   ;;  %vm517_vm1 = vsmask.f32 3336 }
  0x70   :  { %2506 = vmatpush3.bf16.msra.mxu0 %v2650_v1  ;;  %2427 = vmatprep.subr.bf16.mxu1 %v2651_v2  ;;  %v2656_v10 = vld [vmem:[#allocation10 + $0x118] sm:$0xff]   ;;  %v166_v11 = vunpack.c.0.s8 %v165_v7  ;;  %v2658_v14 = vld [vmem:[#allocation10 + $0x120] sm:$0xff]   ;;  %v2659_v15 = vld [vmem:[#allocation10 + $0x68] sm:$0xff]   ;;  %vm519_vm2 = vsmask.f32 5392  ;;  %s2223_s10 = sshll.u32 %s2942_s5, 4  ;;  %s2224_s10 = int_to_ptr.vmem [resolvable:$true] %s2223_s10 }
  0x71   :  { %2507 = vmatprep.subr.bf16.mxu0 %v2652_v3  ;;  %v2660_v16 = vld [vmem:[#allocation10 + $0x128] sm:$0xff]   ;;  %v2746_v19 = vld.sshfl [vmem:[#allocation5 + $0x8] sm:$0xf pattern:$0x76325410]  ;;  %v2663_v25 = vld [vmem:[#allocation10 + $0x78] sm:$0xff]   ;;  %p2906_p7 = scmp.lt.s32.totalorder %s2224_s10, %s2224_s10 }
  0x72   :  { %v3081_v17 = vsub.s32 %v166_v11, %v168_v12  ;;  %v2745_v18 = vld.sshfl [vmem:[#allocation5] sm:$0xf pattern:$0x76325410]  ;;  %v2661_v20 = vld [vmem:[#allocation10 + $0x70] sm:$0xff]   ;;  %v2664_v26 = vld [vmem:[#allocation10 + $0x138] sm:$0xff]  }
  0x73   :  { %2428 = vmatpush3.bf16.msra.mxu1 %v2651_v2  ;;  %v2747_v21 = vld.sshfl [vmem:[#allocation8] sm:$0xf pattern:$0x76325410]  ;;  %v2662_v23 = vld [vmem:[#allocation10 + $0x130] sm:$0xff]   ;;  %v178_v24 = vcombine.low %v2745_v18, %v2746_v19  ;;  %v2667_v32 = vld [vmem:[#allocation10] sm:$0xff]  }
  0x74   :  { %2508 = vmatpush3.bf16.msra.mxu0 %v2652_v3  ;;  %2429 = vmatprep.subr.bf16.mxu1 %v2653_v4  ;;  %v2748_v22 = vld.sshfl [vmem:[#allocation8 + $0x8] sm:$0xf pattern:$0x76325410]  ;;  %v2675_v36 = vld [vmem:[#allocation10 + $0x8] sm:$0xff]   ;;  %v2677_v38 = vld [vmem:[#allocation10 + $0x10] sm:$0xff]  }
  0x75   :  { %2509 = vmatprep.subr.bf16.mxu0 %v2654_v5  ;;  %2441 = vmatprep.mubr.bf16.mxu1 %v178_v24  ;;  %v2749_v27 = vld.sshfl [vmem:[#allocation5 + $0x14] sm:$0xf pattern:$0x76325410]  ;;  %v1008_v29 = vcombine.low %v2747_v21, %v2748_v22  ;;  %v2676_v37 = vld [vmem:[#allocation10 + $0x148] sm:$0xff]   ;;  %v2678_v39 = vld [vmem:[#allocation10 + $0x150] sm:$0xff]  }
  0x76   :  { %v2750_v28 = vld.sshfl [vmem:[#allocation5 + $0x1c] sm:$0xf pattern:$0x76325410]  ;;  %v2679_v40 = vld [vmem:[#allocation10 + $0x18] sm:$0xff]   ;;  %vm518_vm4 = vmor %vm516_vm0, %vm517_vm1  ;;  %s2901_s20 = scalar_lea.vmem %s2224_s10, 256 }
  0x77   :  { %2430 = vmatpush3.bf16.msra.mxu1 %v2653_v4  ;;  %v2751_v30 = vld.sshfl [vmem:[#allocation8 + $0x14] sm:$0xf pattern:$0x76325410]  ;;  %2521 = vmatprep.mubr.bf16.mxu0 %v1008_v29  ;;  %v2670_v33 = vld [vmem:[#allocation10 + $0x140] sm:$0xff]   ;;  %v195_v34 = vcombine.low %v2749_v27, %v2750_v28  ;;  %v2680_v41 = vld [vmem:[#allocation10 + $0x158] sm:$0xff]   ;;  %p2902_p6 = scmp.ne.s32.totalorder %s2224_s10, %s2901_s20  ;;  %p2907_p8 = scmp.lt.s32.totalorder %s2901_s20, %s2901_s20 }
  0x78   :  { %2510 = vmatpush3.bf16.msra.mxu0 %v2654_v5  ;;  %2431 = vmatprep.subr.bf16.mxu1 %v2655_v9  ;;  %v2752_v31 = vld.sshfl [vmem:[#allocation8 + $0x1c] sm:$0xf pattern:$0x76325410]  ;;  %vm521_vm3 = vsmask.f32 7448  ;;  %vm3086_vm5 = vmor %vm518_vm4, %vm519_vm2 }
  0x79   :  { %2511 = vmatprep.subr.bf16.mxu0 %v2656_v10  ;;  %v1025_v35 = vcombine.low %v2751_v30, %v2752_v31  ;;  %v2753_v42 = vld.sshfl [vmem:[#allocation2] sm:$0xf pattern:$0x76325410]  ;;  %v2683_v1 = vld [vmem:[#allocation10 + $0x28] sm:$0xff]   ;;  %vm3093_vm6 = vmor %vm3086_vm5, %vm521_vm3  ;;  %p2908_p9 = por %p2907_p8, %p2906_p7 }
  0x7a   :  { %v2754_v43 = vld.sshfl [vmem:[#allocation2 + $0x8] sm:$0xf pattern:$0x76325410]  ;;  %v2681_v44 = vld [vmem:[#allocation10 + $0x20] sm:$0xff]   ;;  %v2686_v27 = vld [vmem:[#allocation10 + $0x170] sm:$0xff]  }
  0x7b   :  { %2432 = vmatpush3.bf16.msra.mxu1 %v2655_v9  ;;  %v2682_v45 = vld [vmem:[#allocation10 + $0x160] sm:$0xff]   ;;  %v2286_v46 = vld.sshfl [vmem:[#allocation7] sm:$0x13 pattern:$0x76325410]  ;;  %v319_v51 = vcombine.low %v2753_v42, %v2754_v43  ;;  %v2684_v6 = vld [vmem:[#allocation10 + $0x168] sm:$0xff]   ;;  %p2909_p10 = pnand %p2908_p9, %p2902_p6 }
  0x7c   :  { %2512 = vmatpush3.bf16.msra.mxu0 %v2656_v10  ;;  %2433 = vmatprep.subr.bf16.mxu1 %v2657_v13  ;;  %v2287_v47 = vld.sshfl [vmem:[#allocation7 + $0x4] sm:$0x13 pattern:$0x76325410]  ;;  %v1152_v48 = vcombine.high %v2286_v46, %v2286_v46  ;;  %v1210_v49 = vshrl.u32 %v2286_v46, 16  ;;  %v1213_v50 = vshll.u32 %v2286_v46, 16 }
  0x7d   :  { %2513 = vmatprep.subr.bf16.mxu0 %v2658_v14  ;;  %v2288_v52 = vld.sshfl [vmem:[#allocation7 + $0x8] sm:$0x13 pattern:$0x76325410]  ;;  %v1160_v53 = vcombine.high %v2287_v47, %v2287_v47  ;;  %v1224_v54 = vshrl.u32 %v2287_v47, 16  ;;  %v1227_v55 = vshll.u32 %v2287_v47, 16 }
  0x7e   :  { %v2289_v57 = vld.sshfl [vmem:[#allocation7 + $0xc] sm:$0x13 pattern:$0x76325410]  ;;  %v1168_v58 = vcombine.high %v2288_v52, %v2288_v52  ;;  %v1212_v59 = vrot.slane %v1210_v49, 6  ;;  %v1215_v60 = vrot.slane %v1213_v50, 7 }
  0x7f   :  { %2434 = vmatpush3.bf16.msra.mxu1 %v2657_v13  ;;  %v1176_v61 = vcombine.high %v2289_v57, %v2289_v57  ;;  %v1219_v62 = vshll.u32 %v1152_v48, 16  ;;  %v1226_v63 = vrot.slane %v1224_v54, 6  ;;  %v1229_v0 = vrot.slane %v1227_v55, 7  ;;  %v2687_v31 = vld [vmem:[#allocation10 + $0x38] sm:$0xff]  }
  0x80   :  { %2514 = vmatpush3.bf16.msra.mxu0 %v2658_v14  ;;  %2435 = vmatprep.subr.bf16.mxu1 %v2659_v15  ;;  %v1216_v2 = vor.u32 %v1215_v60, %v1212_v59  ;;  %v1233_v3 = vshll.u32 %v1160_v53, 16  ;;  %v1238_v4 = vshrl.u32 %v2288_v52, 16  ;;  %v1241_v5 = vshll.u32 %v2288_v52, 16 }
  0x81   :  { %2515 = vmatprep.subr.bf16.mxu0 %v2660_v16  ;;  %v1221_v8 = vrot.slane %v1219_v62, 7  ;;  %v1230_v9 = vor.u32 %v1229_v0, %v1226_v63  ;;  %v1247_v10 = vshll.u32 %v1168_v58, 16  ;;  %v1252_v11 = vshrl.u32 %v2289_v57, 16  ;;  %v2691_v58 = vld [vmem:[#allocation10 + $0x80] sm:$0xff]  }
  0x82   :  { %v1217_v12 = vrot.slane %v1216_v2, 2  ;;  %v1235_v13 = vrot.slane %v1233_v3, 7  ;;  %v1240_v14 = vrot.slane %v1238_v4, 6  ;;  %v1261_v24 = vshll.u32 %v1176_v61, 16  ;;  %v3112_v63 = vld [vmem:[#allocation10 + $0x180] sm:$0xff]  }
  0x83   :  { %2436 = vmatpush3.bf16.msra.mxu1 %v2659_v15  ;;  %v1243_v15 = vrot.slane %v1241_v5, 7  ;;  %v1231_v18 = vrot.slane %v1230_v9, 2  ;;  %v1254_v19 = vrot.slane %v1252_v11, 6 }
  0x84   :  { %2516 = vmatpush3.bf16.msra.mxu0 %v2660_v16  ;;  %2437 = vmatprep.subr.bf16.mxu1 %v2661_v20  ;;  %v2685_v16 = vld [vmem:[#allocation10 + $0x30] sm:$0xff]   ;;  %v1222_v21 = vsel %vm3093_vm6, %v1217_v12, %v1221_v8  ;;  %v2290_v30 = vld.sshfl [vmem:[#allocation7 + $0x14] sm:$0x13 pattern:$0x76325410] }
  0x85   :  { %2517 = vmatprep.subr.bf16.mxu0 %v2662_v23  ;;  %v1244_v22 = vor.u32 %v1243_v15, %v1240_v14  ;;  %v1236_v28 = vsel %vm3093_vm6, %v1231_v18, %v1235_v13  ;;  %v2293_v43 = vld.sshfl [vmem:[#allocation7 + $0x20] sm:$0x13 pattern:$0x76325410]  ;;  %v1269_v49 = vshll.u32 %v2290_v30, 16 }
  0x86   :  { %v1208_v48 = vcombine.high %v2293_v43, %v2293_v43  ;;  %v1308_v8 = vshrl.u32 %v2293_v43, 16  ;;  %v1311_v11 = vshll.u32 %v2293_v43, 16 }
  0x87   :  { %2438 = vmatpush3.bf16.msra.mxu1 %v2661_v20  ;;  %v1255_v20 = vshll.u32 %v2289_v57, 16  ;;  %v1271_v55 = vrot.slane %v1269_v49, 7 }
  0x88   :  { %2518 = vmatpush3.bf16.msra.mxu0 %v2662_v23  ;;  %2439 = vmatprep.subr.bf16.mxu1 %v2663_v25  ;;  %v1249_v23 = vrot.slane %v1247_v10, 7  ;;  %v1317_v12 = vshll.u32 %v1208_v48, 16  ;;  %v1310_v15 = vrot.slane %v1308_v8, 6 }
  0x89   :  { %2519 = vmatprep.subr.bf16.mxu0 %v2664_v26  ;;  %v1257_v29 = vrot.slane %v1255_v20, 7 }
  0x8b   :  { %2440 = vmatpush3.bf16.msra.mxu1 %v2663_v25  ;;  %v3099_v25 = vld.sshfl [vmem:[#allocation2 + $0x14] sm:$0xf pattern:$0x76325410] }
  0x8c   :  { %2520 = vmatpush3.bf16.msra.mxu0 %v2664_v26  ;;  %2445 = vmatprep.subr.bf16.mxu1 %v2667_v32  ;;  %v3101_v26 = vld.sshfl [vmem:[#allocation2 + $0x1c] sm:$0xf pattern:$0x76325410] }
  0x8d   :  { %2525 = vmatprep.subr.bf16.mxu0 %v2670_v33  ;;  %v336_v47 = vcombine.low %v3099_v25, %v3101_v26  ;;  %v1319_v26 = vrot.slane %v1317_v12, 7 }
  0x8e   :  { %2442 = vmatmul.mubr.bf16.vlgmr.msra.gmra.mrb[0].mxu1 %v195_v34  ;;  %v1338_v34 = vcombine.low %v1222_v21, %v1236_v28  ;;  %v1313_v21 = vrot.slane %v1311_v11, 7  ;;  %v2700_v11 = vld [vmem:[#allocation10 + $0x198] sm:$0xff]  }
  0x8f   :  { %2446 = vmatpush3.bf16.msra.mxu1 %v2667_v32  ;;  %2522 = vmatmul.mubr.bf16.vlgmr.msra.gmra.mrb[0].mxu0 %v1025_v35  ;;  %v1245_v32 = vrot.slane %v1244_v22, 2  ;;  %v2291_v35 = vld.sshfl [vmem:[#allocation7 + $0x18] sm:$0x13 pattern:$0x76325410] }
  0x90   :  { %2526 = vmatpush3.bf16.msra.mxu0 %v2670_v33  ;;  %2447 = vmatprep.subr.bf16.mxu1 %v2675_v36  ;;  %v1263_v33 = vrot.slane %v1261_v24, 7  ;;  %v1346_v42 = vrot.slane %v1338_v34, %v3081_v17  ;;  %v1280_v52 = vshrl.u32 %v2291_v35, 16  ;;  %v1283_v53 = vshll.u32 %v2291_v35, 16 }
  0x91   :  { %2527 = vmatprep.subr.bf16.mxu0 %v2676_v37  ;;  %2461 = vmatprep.mubr.bf16.mxu1 %v319_v51  ;;  %v1314_v25 = vor.u32 %v1313_v21, %v1310_v15  ;;  %v2254_v34 = vld.sshfl [vmem:[#allocation2] sm:$0x13 pattern:$0x76325410] }
  0x92   :  { %v1282_v61 = vrot.slane %v1280_v52, 6  ;;  %v1285_v62 = vrot.slane %v1283_v53, 7  ;;  %v2758_v15 = vld.sshfl [vmem:[#allocation2 + $0xc] sm:$0xf pattern:$0x76325410] }
  0x93   :  { %2448 = vmatpush3.bf16.msra.mxu1 %v2675_v36  ;;  %v1258_v36 = vor.u32 %v1257_v29, %v1254_v19  ;;  %v1315_v29 = vrot.slane %v1314_v25, 2  ;;  %v2259_v25 = vld.sshfl [vmem:[#allocation2 + $0x18] sm:$0x13 pattern:$0x76325410] }
  0x94   :  { %2528 = vmatpush3.bf16.msra.mxu0 %v2676_v37  ;;  %2449 = vmatprep.subr.bf16.mxu1 %v2677_v38  ;;  %v2292_v37 = vld.sshfl [vmem:[#allocation7 + $0x1c] sm:$0x13 pattern:$0x76325410]  ;;  %v1286_v5 = vor.u32 %v1285_v62, %v1282_v61 }
  0x95   :  { %2529 = vmatprep.subr.bf16.mxu0 %v2678_v39  ;;  %v1259_v46 = vrot.slane %v1258_v36, 2  ;;  %v1294_v57 = vshrl.u32 %v2292_v37, 16  ;;  %v1297_v3 = vshll.u32 %v2292_v37, 16  ;;  %v2696_v36 = vld [vmem:[#allocation10 + $0x188] sm:$0xff]  }
  0x96   :  { %v1287_v14 = vrot.slane %v1286_v5, 2 }
  0x97   :  { %2450 = vmatpush3.bf16.msra.mxu1 %v2677_v38  ;;  %v1184_v38 = vcombine.high %v2290_v30, %v2290_v30  ;;  %v1264_v54 = vsel %vm3093_vm6, %v1259_v46, %v1263_v33  ;;  %v1296_v2 = vrot.slane %v1294_v57, 6  ;;  %v1299_v10 = vrot.slane %v1297_v3, 7  ;;  %v2699_v33 = vld [vmem:[#allocation10 + $0x98] sm:$0xff]  }
  0x98   :  { %2530 = vmatpush3.bf16.msra.mxu0 %v2678_v39  ;;  %2451 = vmatprep.subr.bf16.mxu1 %v2679_v40  ;;  %v1192_v39 = vcombine.high %v2291_v35, %v2291_v35 }
  0x99   :  { %2531 = vmatprep.subr.bf16.mxu0 %v2680_v41  ;;  %v1275_v51 = vshll.u32 %v1184_v38, 16  ;;  %v1300_v19 = vor.u32 %v1299_v10, %v1296_v2  ;;  %v2255_v38 = vld.sshfl [vmem:[#allocation2 + $0x4] sm:$0x13 pattern:$0x76325410] }
  0x9a   :  { %v1289_v56 = vshll.u32 %v1192_v39, 16  ;;  %v459_v39 = vcombine.high %v2254_v34, %v2254_v34  ;;  %v467_v43 = vcombine.high %v2255_v38, %v2255_v38  ;;  %v2757_v10 = vld.sshfl [vmem:[#allocation2 + $0x4] sm:$0xf pattern:$0x76325410] }
  0x9b   :  { %2452 = vmatpush3.bf16.msra.mxu1 %v2679_v40  ;;  %v2688_v40 = vld [vmem:[#allocation10 + $0x178] sm:$0xff]   ;;  %v1277_v60 = vrot.slane %v1275_v51, 7  ;;  %v1301_v24 = vrot.slane %v1300_v19, 2 }
  0x9c   :  { %2532 = vmatpush3.bf16.msra.mxu0 %v2680_v41  ;;  %2453 = vmatprep.subr.bf16.mxu1 %v2681_v44  ;;  %v1250_v41 = vsel %vm3093_vm6, %v1245_v32, %v1249_v23  ;;  %v2697_v23 = vld [vmem:[#allocation10 + $0x90] sm:$0xff]   ;;  %v533_v52 = vshll.u32 %v459_v39, 16  ;;  %v547_v57 = vshll.u32 %v467_v43, 16  ;;  %v2707_v39 = vld [vmem:[#allocation10 + $0xb8] sm:$0xff]   ;;  %v594_v43 = vshrl.u32 %v2259_v25, 16 }
  0x9d   :  { %2533 = vmatprep.subr.bf16.mxu0 %v2682_v45  ;;  %v1339_v59 = vcombine.low %v1250_v41, %v1264_v54  ;;  %v527_v41 = vshll.u32 %v2254_v34, 16 }
  0x9e   :  { %v535_v61 = vrot.slane %v533_v52, 7  ;;  %v549_v3 = vrot.slane %v547_v57, 7 }
  0x9f   :  { %2454 = vmatpush3.bf16.msra.mxu1 %v2681_v44  ;;  %v1200_v44 = vcombine.high %v2292_v37, %v2292_v37  ;;  %v1353_v4 = vrot.slane %v1339_v59, %v3081_v17  ;;  %v2701_v37 = vld [vmem:[#allocation10 + $0xa0] sm:$0xff]  }
  0xa0   :  { %2534 = vmatpush3.bf16.msra.mxu0 %v2682_v45  ;;  %2455 = vmatprep.subr.bf16.mxu1 %v2683_v1  ;;  %v1266_v45 = vshrl.u32 %v2290_v30, 16  ;;  %v1320_v30 = vsel %vm3093_vm6, %v1315_v29, %v1319_v26  ;;  %v2702_v29 = vld [vmem:[#allocation10 + $0x1a0] sm:$0xff]  }
  0xa1   :  { %2535 = vmatprep.subr.bf16.mxu0 %v2684_v6  ;;  %v1354_v13 = vcombine.low %v1346_v42, %v1353_v4  ;;  %v2256_v42 = vld.sshfl [vmem:[#allocation2 + $0x8] sm:$0x13 pattern:$0x76325410] }
  0xa2   :  { %v1268_v50 = vrot.slane %v1266_v45, 6  ;;  %v541_v45 = vshll.u32 %v2255_v38, 16  ;;  %v475_v48 = vcombine.high %v2256_v42, %v2256_v42  ;;  %v555_v59 = vshll.u32 %v2256_v42, 16 }
  0xa3   :  { %2456 = vmatpush3.bf16.msra.mxu1 %v2683_v1  ;;  %v1291_v1 = vrot.slane %v1289_v56, 7  ;;  %2541 = vmatprep.mubr.bf16.mxu0 %v1354_v13 }
  0xa4   :  { %2536 = vmatpush3.bf16.msra.mxu0 %v2684_v6  ;;  %2457 = vmatprep.subr.bf16.mxu1 %v2685_v16  ;;  %v1272_v0 = vor.u32 %v1271_v55, %v1268_v50  ;;  %v1303_v6 = vshll.u32 %v1200_v44, 16  ;;  %v538_v44 = vshrl.u32 %v2255_v38, 16  ;;  %v529_v50 = vrot.slane %v527_v41, 7  ;;  %v2698_v55 = vld [vmem:[#allocation10 + $0x190] sm:$0xff]  }
  0xa5   :  { %2537 = vmatprep.subr.bf16.mxu0 %v2686_v27  ;;  %v1292_v22 = vsel %vm3093_vm6, %v1287_v14, %v1291_v1  ;;  %v543_v54 = vrot.slane %v541_v45, 7  ;;  %v557_v5 = vrot.slane %v555_v59, 7  ;;  %v597_v45 = vshll.u32 %v2259_v25, 16 }
  0xa6   :  { %v1273_v9 = vrot.slane %v1272_v0, 2  ;;  %v1305_v20 = vrot.slane %v1303_v6, 7  ;;  %v540_v53 = vrot.slane %v538_v44, 6  ;;  %v561_v0 = vshll.u32 %v475_v48, 16 }
  0xa7   :  { %2458 = vmatpush3.bf16.msra.mxu1 %v2685_v16  ;;  %v2695_v16 = vld [vmem:[#allocation10 + $0x88] sm:$0xff]   ;;  %v599_v52 = vrot.slane %v597_v45, 7  ;;  %v2721_v45 = vld [vmem:[#allocation10 + $0xe0] sm:$0xff]  }
  0xa8   :  { %2538 = vmatpush3.bf16.msra.mxu0 %v2686_v27  ;;  %2459 = vmatprep.subr.bf16.mxu1 %v2687_v31  ;;  %v1278_v18 = vsel %vm3093_vm6, %v1273_v9, %v1277_v60  ;;  %v1306_v28 = vsel %vm3093_vm6, %v1301_v24, %v1305_v20  ;;  %v2703_v60 = vld [vmem:[#allocation10 + $0xa8] sm:$0xff]   ;;  %v544_v62 = vor.u32 %v543_v54, %v540_v53  ;;  %v563_v13 = vrot.slane %v561_v0, 7 }
  0xa9   :  { %2539 = vmatprep.subr.bf16.mxu0 %v2688_v40  ;;  %v1355_v27 = vcombine.low %v1278_v18, %v1292_v22 }
  0xaa   :  { %v545_v6 = vrot.slane %v544_v62, 2 }
  0xab   :  { %2460 = vmatpush3.bf16.msra.mxu1 %v2687_v31  ;;  %v1356_v31 = vcombine.low %v1306_v28, %v1320_v30  ;;  %v1363_v32 = vrot.slane %v1355_v27, %v3081_v17 }
  0xac   :  { %2540 = vmatpush3.bf16.msra.mxu0 %v2688_v40  ;;  %2465 = vmatprep.subr.bf16.mxu1 %v2691_v58  ;;  %v524_v40 = vshrl.u32 %v2254_v34, 16  ;;  %v3131_v18 = vsel %vm3093_vm6, %v545_v6, %v549_v3  ;;  %v2706_v6 = vld [vmem:[#allocation10 + $0x1b0] sm:$0xff]  }
  0xad   :  { %2545 = vmatprep.subr.bf16.mxu0 %v3112_v63  ;;  %v1370_v35 = vrot.slane %v1356_v31, %v3081_v17  ;;  %v1525_v31 = vcombine.low %v2757_v10, %v2758_v15 }
  0xae   :  { %2462 = vmatmul.mubr.bf16.vlgmr.msra.gmra.mrb[0].mxu1 %v336_v47  ;;  %v2257_v47 = vld.sshfl [vmem:[#allocation2 + $0xc] sm:$0x13 pattern:$0x76325410]  ;;  %v526_v49 = vrot.slane %v524_v40, 6 }
  0xaf   :  { %2466 = vmatpush3.bf16.msra.mxu1 %v2691_v58  ;;  %v1371_v46 = vcombine.low %v1363_v32, %v1370_v35  ;;  %v483_v51 = vcombine.high %v2257_v47, %v2257_v47  ;;  %v552_v58 = vshrl.u32 %v2256_v42, 16  ;;  %v566_v1 = vshrl.u32 %v2257_v47, 16  ;;  %v2260_v32 = vld.sshfl [vmem:[#allocation2 + $0x1c] sm:$0x13 pattern:$0x76325410] }
  0xb0   :  { %2467 = vmatprep.subr.bf16.mxu1 %v2695_v16  ;;  %v530_v56 = vor.u32 %v529_v50, %v526_v49  ;;  %v569_v9 = vshll.u32 %v2257_v47, 16  ;;  %v608_v47 = vshrl.u32 %v2260_v32, 16 }
  0xb1   :  { %2542 = vmatmul.mubr.bf16.vlgmr.msra.gmra.mrb[0].mxu0 %v1371_v46  ;;  %v554_v4 = vrot.slane %v552_v58, 6  ;;  %v568_v8 = vrot.slane %v566_v1, 6  ;;  %v575_v14 = vshll.u32 %v483_v51, 16  ;;  %v596_v51 = vrot.slane %v594_v43, 6  ;;  %v2720_v43 = vld [vmem:[#allocation10 + $0x1d8] sm:$0xff]  }
  0xb2   :  { %2546 = vmatpush3.bf16.msra.mxu0 %v3112_v63  ;;  %v531_v2 = vrot.slane %v530_v56, 2  ;;  %v571_v19 = vrot.slane %v569_v9, 7  ;;  %2561 = vmatprep.mubr.bf16.mxu0 %v1525_v31  ;;  %v610_v54 = vrot.slane %v608_v47, 6  ;;  %v2704_v56 = vld [vmem:[#allocation10 + $0x1a8] sm:$0xff]  }
  0xb3   :  { %2468 = vmatpush3.bf16.msra.mxu1 %v2695_v16  ;;  %2547 = vmatprep.subr.bf16.mxu0 %v2696_v36  ;;  %v558_v12 = vor.u32 %v557_v5, %v554_v4  ;;  %v2705_v16 = vld [vmem:[#allocation10 + $0xb0] sm:$0xff]   ;;  %v577_v21 = vrot.slane %v575_v14, 7  ;;  %v600_v62 = vor.u32 %v599_v52, %v596_v51  ;;  %v2723_v47 = vld [vmem:[#allocation10 + $0xe8] sm:$0xff]  }
  0xb4   :  { %2469 = vmatprep.subr.bf16.mxu1 %v2697_v23  ;;  %v536_v63 = vsel %vm3093_vm6, %v531_v2, %v535_v61  ;;  %v572_v24 = vor.u32 %v571_v19, %v568_v8  ;;  %v2709_v61 = vld [vmem:[#allocation10 + $0xc0] sm:$0xff]  }
  0xb5   :  { %v559_v20 = vrot.slane %v558_v12, 2  ;;  %v652_v22 = vcombine.low %v536_v63, %v3131_v18  ;;  %v601_v8 = vrot.slane %v600_v62, 2  ;;  %v2759_v63 = vld.sshfl [vmem:[#allocation2 + $0x18] sm:$0xf pattern:$0x76325410] }
  0xb6   :  { %2548 = vmatpush3.bf16.msra.mxu0 %v2696_v36  ;;  %v573_v34 = vrot.slane %v572_v24, 2  ;;  %v2261_v36 = vld.sshfl [vmem:[#allocation2 + $0x20] sm:$0x13 pattern:$0x76325410] }
  0xb7   :  { %2470 = vmatpush3.bf16.msra.mxu1 %v2697_v23  ;;  %2549 = vmatprep.subr.bf16.mxu0 %v2698_v55  ;;  %v2258_v23 = vld.sshfl [vmem:[#allocation2 + $0x14] sm:$0x13 pattern:$0x76325410]  ;;  %v3136_v30 = vsel %vm3093_vm6, %v559_v20, %v563_v13  ;;  %v660_v35 = vrot.slane %v652_v22, %v3081_v17  ;;  %v515_v40 = vcombine.high %v2261_v36, %v2261_v36  ;;  %v625_v1 = vshll.u32 %v2261_v36, 16  ;;  %v2708_v20 = vld [vmem:[#allocation10 + $0x1b8] sm:$0xff]  }
  0xb8   :  { %2471 = vmatprep.subr.bf16.mxu1 %v2699_v33  ;;  %v491_v26 = vcombine.high %v2258_v23, %v2258_v23  ;;  %v580_v27 = vshrl.u32 %v2258_v23, 16  ;;  %v583_v28 = vshll.u32 %v2258_v23, 16  ;;  %v3141_v44 = vsel %vm3093_vm6, %v573_v34, %v577_v21  ;;  %v2760_v12 = vld.sshfl [vmem:[#allocation2 + $0x20] sm:$0xf pattern:$0x76325410] }
  0xb9   :  { %v653_v48 = vcombine.low %v3136_v30, %v3141_v44  ;;  %v631_v2 = vshll.u32 %v515_v40, 16  ;;  %v2762_v34 = vld.sshfl [vmem:[#allocation7 + $0x8] sm:$0xf pattern:$0x76325410]  ;;  %v2718_v40 = vld [vmem:[#allocation10 + $0x1d0] sm:$0xff]  }
  0xba   :  { %2550 = vmatpush3.bf16.msra.mxu0 %v2698_v55  ;;  %v582_v38 = vrot.slane %v580_v27, 6  ;;  %v585_v41 = vrot.slane %v583_v28, 7  ;;  %v589_v42 = vshll.u32 %v491_v26, 16  ;;  %v611_v55 = vshll.u32 %v2260_v32, 16  ;;  %v2712_v27 = vld [vmem:[#allocation10 + $0x1c0] sm:$0xff]  }
  0xbb   :  { %2472 = vmatpush3.bf16.msra.mxu1 %v2699_v33  ;;  %v499_v33 = vcombine.high %v2259_v25, %v2259_v25  ;;  %2551 = vmatprep.subr.bf16.mxu0 %v2700_v11  ;;  %v667_v57 = vrot.slane %v653_v48, %v3081_v17  ;;  %v2321_v48 = vld.sshfl [vmem:[#allocation2 + $0x10] sm:$0x13 pattern:$0x76325410] }
  0xbc   :  { %2473 = vmatprep.subr.bf16.mxu1 %v2701_v37  ;;  %v586_v49 = vor.u32 %v585_v41, %v582_v38  ;;  %v591_v50 = vrot.slane %v589_v42, 7  ;;  %v613_v0 = vrot.slane %v611_v55, 7  ;;  %v2719_v41 = vld [vmem:[#allocation10 + $0xd8] sm:$0xff]   ;;  %v1943_v51 = vshll.u32 %v2321_v48, 16 }
  0xbd   :  { %v603_v46 = vshll.u32 %v499_v33, 16  ;;  %v668_v3 = vcombine.low %v660_v35, %v667_v57  ;;  %v2761_v33 = vld.sshfl [vmem:[#allocation7] sm:$0xf pattern:$0x76325410]  ;;  %v2716_v35 = vld [vmem:[#allocation10 + $0x1c8] sm:$0xff]  }
  0xbe   :  { %2552 = vmatpush3.bf16.msra.mxu0 %v2700_v11  ;;  %v587_v58 = vrot.slane %v586_v49, 2  ;;  %v614_v9 = vor.u32 %v613_v0, %v610_v54  ;;  %v627_v11 = vrot.slane %v625_v1, 7  ;;  %v838_v38 = vcombine.low %v2761_v33, %v2762_v34  ;;  %v2325_v52 = vld.sshfl [vmem:[#allocation2 + $0x24] sm:$0x13 pattern:$0x76325410] }
  0xbf   :  { %2474 = vmatpush3.bf16.msra.mxu1 %v2701_v37  ;;  %v507_v37 = vcombine.high %v2260_v32, %v2260_v32  ;;  %v605_v53 = vrot.slane %v603_v46, 7  ;;  %2553 = vmatprep.subr.bf16.mxu0 %v2702_v29  ;;  %v1542_v32 = vcombine.low %v2759_v63, %v2760_v12  ;;  %v2722_v46 = vld [vmem:[#allocation10 + $0x1e0] sm:$0xff]   ;;  %v1864_v49 = vcombine.high %v2321_v48, %v2321_v48  ;;  %v2725_v0 = vld [vmem:[#allocation10 + $0xf0] sm:$0xff]  }
  0xc0   :  { %2475 = vmatprep.subr.bf16.mxu1 %v2703_v60  ;;  %v592_v4 = vsel %vm3093_vm6, %v587_v58, %v591_v50  ;;  %2481 = vmatprep.mubr.bf16.mxu1 %v668_v3  ;;  %v615_v14 = vrot.slane %v614_v9, 2  ;;  %v1940_v50 = vshrl.u32 %v2321_v48, 16  ;;  %v1996_v54 = vshrl.u32 %v2325_v52, 16 }
  0xc1   :  { %v617_v59 = vshll.u32 %v507_v37, 16  ;;  %v3150_v13 = vsel %vm3093_vm6, %v601_v8, %v605_v53  ;;  %v2763_v37 = vld.sshfl [vmem:[#allocation5 + $0x4] sm:$0xf pattern:$0x76325410]  ;;  %v1896_v53 = vcombine.high %v2325_v52, %v2325_v52  ;;  %v1999_v55 = vshll.u32 %v2325_v52, 16 }
  0xc2   :  { %2554 = vmatpush3.bf16.msra.mxu0 %v2702_v29  ;;  %v669_v19 = vcombine.low %v592_v4, %v3150_v13  ;;  %v2715_v29 = vld [vmem:[#allocation10 + $0xc8] sm:$0xff]   ;;  %v1942_v57 = vrot.slane %v1940_v50, 6  ;;  %v1945_v58 = vrot.slane %v1943_v51, 7 }
  0xc3   :  { %2476 = vmatpush3.bf16.msra.mxu1 %v2703_v60  ;;  %v622_v60 = vshrl.u32 %v2261_v36, 16  ;;  %v619_v10 = vrot.slane %v617_v59, 7  ;;  %2555 = vmatprep.subr.bf16.mxu0 %v2704_v56  ;;  %v2717_v36 = vld [vmem:[#allocation10 + $0xd0] sm:$0xff]   ;;  %v1949_v59 = vshll.u32 %v1864_v49, 16  ;;  %v2005_v62 = vshll.u32 %v1896_v53, 16 }
  0xc4   :  { %2477 = vmatprep.subr.bf16.mxu1 %v2705_v16  ;;  %v677_v26 = vrot.slane %v669_v19, %v3081_v17  ;;  %v1946_v1 = vor.u32 %v1945_v58, %v1942_v57  ;;  %v2766_v8 = vld.sshfl [vmem:[#allocation7 + $0x1c] sm:$0xf pattern:$0x76325410] }
  0xc5   :  { %v624_v5 = vrot.slane %v622_v60, 6  ;;  %v3155_v21 = vsel %vm3093_vm6, %v615_v14, %v619_v10  ;;  %v1998_v60 = vrot.slane %v1996_v54, 6  ;;  %v2007_v4 = vrot.slane %v2005_v62, 7 }
  0xc6   :  { %2556 = vmatpush3.bf16.msra.mxu0 %v2704_v56  ;;  %v2043_v23 = vcombine.low %v3150_v13, %v3155_v21  ;;  %v2724_v56 = vld [vmem:[#allocation10 + $0x1e8] sm:$0xff]   ;;  %v1947_v9 = vrot.slane %v1946_v1, 2  ;;  %v2767_v63 = vld.sshfl [vmem:[#allocation5 + $0x18] sm:$0xf pattern:$0x76325410] }
  0xc7   :  { %2478 = vmatpush3.bf16.msra.mxu1 %v2705_v16  ;;  %v628_v15 = vor.u32 %v627_v11, %v624_v5  ;;  %v633_v16 = vrot.slane %v631_v2, 7  ;;  %2557 = vmatprep.subr.bf16.mxu0 %v2706_v6  ;;  %v1951_v2 = vrot.slane %v1949_v59, 7  ;;  %v2726_v5 = vld [vmem:[#allocation10 + $0x1f0] sm:$0xff]   ;;  %v2727_v11 = vld [vmem:[#allocation10 + $0xf8] sm:$0xff]   ;;  %v2738_v13 = vld [vmem:[#allocation10 + $0x208] sm:$0xff]  }
  0xc8   :  { %2479 = vmatprep.subr.bf16.mxu1 %v2707_v39  ;;  %v2768_v12 = vld.sshfl [vmem:[#allocation5 + $0x20] sm:$0xf pattern:$0x76325410] }
  0xc9   :  { %v629_v22 = vrot.slane %v628_v15, 2  ;;  %v1952_v14 = vsel %vm3093_vm6, %v1947_v9, %v1951_v2  ;;  %v2026_v15 = vcombine.low %v3131_v18, %v3136_v30 }
  0xca   :  { %2558 = vmatpush3.bf16.msra.mxu0 %v2706_v6  ;;  %v2765_v6 = vld.sshfl [vmem:[#allocation7 + $0x14] sm:$0xf pattern:$0x76325410] }
  0xcb   :  { %2480 = vmatpush3.bf16.msra.mxu1 %v2707_v39  ;;  %v3161_v24 = vsel %vm3093_vm6, %v629_v22, %v633_v16  ;;  %2559 = vmatprep.subr.bf16.mxu0 %v2708_v20  ;;  %v2764_v39 = vld.sshfl [vmem:[#allocation5 + $0xc] sm:$0xf pattern:$0x76325410]  ;;  %v2027_v16 = vcombine.low %v3141_v44, %v1952_v14  ;;  %v2034_v18 = vrot.slane %v2026_v15, %v3081_v17  ;;  %v2735_v44 = vld [vmem:[#allocation10 + $0x200] sm:$0xff]  }
  0xcc   :  { %2485 = vmatprep.subr.bf16.mxu1 %v2709_v61  ;;  %v670_v25 = vcombine.low %v3155_v21, %v3161_v24  ;;  %v1696_v42 = vcombine.low %v2763_v37, %v2764_v39  ;;  %v855_v7 = vcombine.low %v2765_v6, %v2766_v8  ;;  %v2739_v21 = vld [vmem:[#allocation10 + $0x210] sm:$0xff]  }
  0xcd   :  { %v2041_v30 = vrot.slane %v2027_v16, %v3081_v17 }
  0xce   :  { %v684_v28 = vrot.slane %v670_v25, %v3081_v17  ;;  %2560 = vmatpush3.bf16.msra.mxu0 %v2708_v20  ;;  %v2728_v20 = vld [vmem:[#allocation10 + $0x1f8] sm:$0xff]   ;;  %v2051_v25 = vrot.slane %v2043_v23, %v3081_v17 }
  0xcf   :  { %2565 = vmatprep.subr.bf16.mxu0 %v2712_v27  ;;  %v2740_v23 = vld [vmem:[#allocation10 + $0x218] sm:$0xff]  }
  0xd0   :  { %v685_v31 = vcombine.low %v677_v26, %v684_v28  ;;  %v2042_v28 = vcombine.low %v2034_v18, %v2041_v30 }
  0xd1   :  { %2562 = vmatmul.mubr.bf16.vlgmr.msra.gmra.mrb[0].mxu0 %v1542_v32  ;;  %v2744_v32 = vld [vmem:[#allocation10 + $0x238] sm:$0xff]  }
  0xd2   :  { %2482 = vmatmul.mubr.bf16.vlgmr.msra.gmra.mrb[0].mxu1 %v685_v31  ;;  %2566 = vmatpush3.bf16.msra.mxu0 %v2712_v27  ;;  %v2743_v31 = vld [vmem:[#allocation10 + $0x230] sm:$0xff]  }
  0xd3   :  { %2486 = vmatpush3.bf16.msra.mxu1 %v2709_v61  ;;  %2567 = vmatprep.subr.bf16.mxu0 %v2716_v35  ;;  %v2001_v61 = vrot.slane %v1999_v55, 7 }
  0xd4   :  { %2487 = vmatprep.subr.bf16.mxu1 %v2715_v29  ;;  %2501 = vmatprep.mubr.bf16.mxu1 %v838_v38  ;;  %v2334_v38 = vld [vmem:[#allocation11] ss:$0 sm:$0xff] }
  0xd5   :  { %2581 = vmatprep.mubr.bf16.mxu0 %v1696_v42  ;;  %v2002_v3 = vor.u32 %v2001_v61, %v1998_v60 }
  0xd6   :  { %2568 = vmatpush3.bf16.msra.mxu0 %v2716_v35 }
  0xd7   :  { %2488 = vmatpush3.bf16.msra.mxu1 %v2715_v29  ;;  %2569 = vmatprep.subr.bf16.mxu0 %v2718_v40  ;;  %v2003_v10 = vrot.slane %v2002_v3, 2  ;;  %v2742_v29 = vld [vmem:[#allocation10 + $0x228] sm:$0xff]  }
  0xd8   :  { %2489 = vmatprep.subr.bf16.mxu1 %v2717_v36 }
  0xd9   :  { %v2008_v19 = vsel %vm3093_vm6, %v2003_v10, %v2007_v4 }
  0xda   :  { %2570 = vmatpush3.bf16.msra.mxu0 %v2718_v40  ;;  %v2044_v22 = vcombine.low %v3161_v24, %v2008_v19  ;;  %v1713_v24 = vcombine.low %v2767_v63, %v2768_v12 }
  0xdb   :  { %2490 = vmatpush3.bf16.msra.mxu1 %v2717_v36  ;;  %2571 = vmatprep.subr.bf16.mxu0 %v2720_v43 }
  0xdc   :  { %2491 = vmatprep.subr.bf16.mxu1 %v2719_v41  ;;  %v2058_v26 = vrot.slane %v2044_v22, %v3081_v17  ;;  %v2741_v17 = vld [vmem:[#allocation10 + $0x220] sm:$0xff]  }
  0xde   :  { %2572 = vmatpush3.bf16.msra.mxu0 %v2720_v43  ;;  %v2059_v27 = vcombine.low %v2051_v25, %v2058_v26 }
  0xdf   :  { %2492 = vmatpush3.bf16.msra.mxu1 %v2719_v41  ;;  %2573 = vmatprep.subr.bf16.mxu0 %v2722_v46 }
  0xe0   :  { %2493 = vmatprep.subr.bf16.mxu1 %v2721_v45 }
  0xe2   :  { %2574 = vmatpush3.bf16.msra.mxu0 %v2722_v46 }
  0xe3   :  { %2494 = vmatpush3.bf16.msra.mxu1 %v2721_v45  ;;  %2575 = vmatprep.subr.bf16.mxu0 %v2724_v56 }
  0xe4   :  { %2495 = vmatprep.subr.bf16.mxu1 %v2723_v47 }
  0xe6   :  { %2576 = vmatpush3.bf16.msra.mxu0 %v2724_v56 }
  0xe7   :  { %2496 = vmatpush3.bf16.msra.mxu1 %v2723_v47  ;;  %2577 = vmatprep.subr.bf16.mxu0 %v2726_v5 }
  0xe8   :  { %2497 = vmatprep.subr.bf16.mxu1 %v2725_v0 }
  0xea   :  { %2578 = vmatpush3.bf16.msra.mxu0 %v2726_v5 }
  0xeb   :  { %2498 = vmatpush3.bf16.msra.mxu1 %v2725_v0  ;;  %2579 = vmatprep.subr.bf16.mxu0 %v2728_v20 }
  0xec   :  { %2499 = vmatprep.subr.bf16.mxu1 %v2727_v11 }
  0xee   :  { %2580 = vmatpush3.bf16.msra.mxu0 %v2728_v20 }
  0xef   :  { %2500 = vmatpush3.bf16.msra.mxu1 %v2727_v11  ;;  %2585 = vmatprep.subr.bf16.mxu0 %v2735_v44 }
  0xf1   :  { %2582 = vmatmul.mubr.bf16.vlgmr.msra.gmra.mrb[0].mxu0 %v1713_v24 }
  0xf2   :  { %2502 = vmatmul.mubr.bf16.vlgmr.msra.gmra.mrb[0].mxu1 %v855_v7  ;;  %2586 = vmatpush3.bf16.msra.mxu0 %v2735_v44 }
  0xf3   :  { %2601 = vmatprep.mubr.bf16.mxu0 %v2042_v28  ;;  %2587 = vmatprep.subr.bf16.mxu0 %v2738_v13 }
  0xf6   :  { %2588 = vmatpush3.bf16.msra.mxu0 %v2738_v13 }
  0xf7   :  { %2589 = vmatprep.subr.bf16.mxu0 %v2739_v21 }
  0xfa   :  { %2590 = vmatpush3.bf16.msra.mxu0 %v2739_v21 }
  0xfb   :  { %2591 = vmatprep.subr.bf16.mxu0 %v2740_v23 }
  0xfe   :  { %2592 = vmatpush3.bf16.msra.mxu0 %v2740_v23 }
  0xff   :  { %2593 = vmatprep.subr.bf16.mxu0 %v2741_v17 }
 0x102   :  { %2594 = vmatpush3.bf16.msra.mxu0 %v2741_v17 }
 0x103   :  { %2595 = vmatprep.subr.bf16.mxu0 %v2742_v29 }
 0x106   :  { %2596 = vmatpush3.bf16.msra.mxu0 %v2742_v29 }
 0x107   :  { %2597 = vmatprep.subr.bf16.mxu0 %v2743_v31 }
 0x10a   :  { %2598 = vmatpush3.bf16.msra.mxu0 %v2743_v31 }
 0x10b   :  { %2599 = vmatprep.subr.bf16.mxu0 %v2744_v32 }
 0x10e   :  { %2600 = vmatpush3.bf16.msra.mxu0 %v2744_v32 }
 0x111   :  { %2602 = vmatmul.mubr.bf16.vlgmr.msra.gmra.mrb[0].mxu0 %v2059_v27 }
 0x1c5   :  { %v2503_v33 = vpop.f32.mrb[0].mxu1 }
 0x1c6   :  { %v940_v34 = vpop.f32.mrb[1].mxu1 }
 0x1c7   :  { %v2504_v35 = vpop.f32.mrb[2].mxu1 }
 0x1c8   :  { %v943_v36 = vpop.f32.mrb[3].mxu1 }
 0x1e4   :  { %v2603_v37 = vpop.f32.mrb[0].mxu0 }
 0x1e5   :  { %v2605_v39 = vadd.f32 %v2603_v37, %v2503_v33  ;;  %v2144_v40 = vpop.f32.mrb[1].mxu0 }
 0x1e6   :  { %v2606_v41 = vadd.f32 %v2144_v40, %v940_v34  ;;  %v2604_v42 = vpop.f32.mrb[2].mxu0 }
 0x1e7   :  { %v2172_v43 = vadd.f32 %v2605_v39, %v2334_v38  ;;  %v2607_v45 = vadd.f32 %v2604_v42, %v2504_v35  ;;  %v2147_v46 = vpop.f32.mrb[3].mxu0 }
 0x1e8   :  { %v2170_v47 = vadd.f32 %v2606_v41, %v2334_v38  ;;  %v2608_v48 = vadd.f32 %v2147_v46, %v943_v36 }
 0x1e9   :  { %vm2176_vm7 = vcmp.ge.f32.partialorder %v2172_v43, 0.0  ;;  %v2180_v49 = vmul.f32 0.2, %v2172_v43  ;;  %v2173_v50 = vadd.f32 %v2607_v45, %v2334_v38 }
 0x1ea   :  { %vm2174_vm8 = vcmp.ge.f32.partialorder %v2170_v47, 0.0  ;;  %v2178_v51 = vmul.f32 0.2, %v2170_v47  ;;  %v2171_v52 = vadd.f32 %v2608_v48, %v2334_v38 }
 0x1eb   :  { %v2184_v53 = vsel %vm2176_vm7, %v2172_v43, %v2180_v49  ;;  %vm2177_vm9 = vcmp.ge.f32.partialorder %v2173_v50, 0.0  ;;  %v2181_v54 = vmul.f32 0.2, %v2173_v50 }
 0x1ec   :  { %v2188_v55 = vmul.f32 0.23570226, %v2184_v53  ;;  %v2182_v56 = vsel %vm2174_vm8, %v2170_v47, %v2178_v51  ;;  %vm2175_vm10 = vcmp.ge.f32.partialorder %v2171_v52, 0.0  ;;  %v2179_v57 = vmul.f32 0.2, %v2171_v52 }
 0x1ed   :  { %v2186_v58 = vmul.f32 0.23570226, %v2182_v56  ;;  %v2185_v59 = vsel %vm2177_vm9, %v2173_v50, %v2181_v54 }
 0x1ee   :  { %v2196_v60 = vcombine.high %v2188_v55, %v2188_v55  ;;  %v2206_v61 = vpack.c.bf16 %v2188_v55, %v2188_v55  ;;  %v2189_v62 = vmul.f32 0.23570226, %v2185_v59  ;;  %v2183_v0 = vsel %vm2175_vm10, %v2171_v52, %v2179_v57 }
 0x1ef   :  { %v2194_v1 = vcombine.high %v2186_v58, %v2186_v58  ;;  %v2202_v2 = vpack.c.bf16 %v2186_v58, %v2186_v58  ;;  %v2187_v3 = vmul.f32 0.23570226, %v2183_v0 }
 0x1f0   :  { %v2207_v4 = vpack.c.bf16 %v2196_v60, %v2196_v60  ;;  %2214 = vst [vmem:[#allocation13 + $0x8] sm:$0x3] %v2206_v61  ;;  %v2197_v5 = vcombine.high %v2189_v62, %v2189_v62  ;;  %v2208_v6 = vpack.c.bf16 %v2189_v62, %v2189_v62 }
 0x1f1   :  { %v2203_v8 = vpack.c.bf16 %v2194_v1, %v2194_v1  ;;  %2210 = vst [vmem:[#allocation13] sm:$0x3] %v2202_v2  ;;  %v2195_v9 = vcombine.high %v2187_v3, %v2187_v3  ;;  %v2204_v10 = vpack.c.bf16 %v2187_v3, %v2187_v3 }
 0x1f2   :  { %2215 = vst [vmem:[#allocation13 + $0xa] sm:$0x3] %v2207_v4  ;;  %v2209_v11 = vpack.c.bf16 %v2197_v5, %v2197_v5  ;;  %2216 = vst [vmem:[#allocation13 + $0xc] sm:$0x3] %v2208_v6 }
 0x1f3   :  { %2211 = vst [vmem:[#allocation13 + $0x2] sm:$0x3] %v2203_v8  ;;  %v2205_v63 = vpack.c.bf16 %v2195_v9, %v2195_v9  ;;  %2212 = vst [vmem:[#allocation13 + $0x4] sm:$0x3] %v2204_v10 }
 0x1f4   :  { %2217 = vst [vmem:[#allocation13 + $0xe] sm:$0x3] %v2209_v11 }
 0x1f5   :  { %2213 = vst [vmem:[#allocation13 + $0x6] sm:$0x3] %v2205_v63 }
 0x1f6   :  { %2912 = shalt.err (!%p2909_p10)
}
 0x1f7   :  { %s2913_s21 = scalar_lea.hbm %s3200_s6, 256 }
 0x1f8   :  { %p2914_p11 = scmp.ne.s32.totalorder %s3200_s6, %s2913_s21  ;;  %p2917_p12 = scmp.lt.u32.totalorder %s2913_s21, %s3200_s6 }
 0x1fa   :  { %p2919_p13 = pnand %p2917_p12, %p2914_p11 }
 0x1fc   :  { %2922 = shalt.err (!%p2919_p13)
}
 0x1fd   :  { %s2943_s28 = smov 32   ;;  %s2944_s29 = smov 2  }
 0x1fe   :  { %2229 = dma.vmem_to_hbm [thread:$0]  %s2224_s10, 256, %s3200_s6, [#allocation4], %s2943_s28, %s2943_s28, %s2944_s29  }
 0x1ff   :  { %2931 = dma.done.wait [#allocation4], 256  }
 0x200   :  { %2932 = vsyncadd [#allocation4], 4294967040 }
 0x201   :  { %2233 = vsyncpa [#allocation3], 1 }
 0x202   :  { %2234 = vsyncpa [#allocation6], 1 }
 0x203   :  { %2235 = vsyncpa [#allocation9], 1 }
 0x204   :  { %2236 = vsyncpa [#allocation12], 1 }
 0x205   :  { %2237 = vsyncpa [#allocation4], 1 }

// kernel: to_style_forward.5
= control target key start
LH: loop header
LB: loop body
LE: loop exit
PB: predicated region body
PF: predicated region fallthrough
CT: control target
= control target key end

     0   :  { %13 = vsyncpa [#allocation3], 0  ;;  %s2902_s0 = inlined_call_operand.hbm [shape: bf16[2,3,3,128], index: 0, kind: input, shape index: {}]   ;;  %s2903_s1 = inlined_call_operand.hbm [shape: bf16[2,3,3,128], index: 1, kind: input, shape index: {}]   ;;  %s2904_s2 = inlined_call_operand.hbm [shape: bf16[2,3,3,128], index: 2, kind: input, shape index: {}]   ;;  %s2905_s3 = inlined_call_operand.hbm [shape: bf16[2,3,3,128], index: 3, kind: input, shape index: {}]   ;;  %s2906_s4 = inlined_call_operand.hbm [shape: bf16[9,128,128], index: 4, kind: input, shape index: {}]   ;;  %s2907_s5 = inlined_call_operand.hbm [shape: f32[1,128], index: 5, kind: input, shape index: {}]   ;;  %s2908_s6 = inlined_call_operand.hbm [shape: f32[128,128], index: 6, kind: input, shape index: {}]   ;;  %s2909_s7 = inlined_call_operand.hbm [shape: f32[1,128], index: 7, kind: input, shape index: {}]   ;;  %s2910_s8 = inlined_call_operand.hbm [shape: f32[2,1,128], index: 8, kind: output, shape index: {}]  }
   0x1   :  { %14 = vsyncpa [#allocation6], 0 }
   0x2   :  { %15 = vsyncpa [#allocation9], 0 }
   0x3   :  { %16 = vsyncpa [#allocation12], 0 }
   0x4   :  { %17 = vsyncpa [#allocation15], 0 }
   0x5   :  { %18 = vsyncpa [#allocation4], 0  ;;  %s2528_s27 = smov [#allocation5]   ;;  %s2529_s29 = smov [#allocation8]  }
   0x6   :  { %s36_s28 = sshll.u32 %s2528_s27, 4  ;;  %s60_s30 = sshll.u32 %s2529_s29, 4  ;;  %s37_s28 = int_to_ptr.vmem [resolvable:$true] %s36_s28  ;;  %s2594_s30 = int_to_ptr.vmem [resolvable:$true] %s60_s30 }
   0x7   :  { %s2318_s11 = scalar_lea.hbm %s2903_s1, 192 }
   0x8   :  { %p2319_p0 = scmp.ne.s32.totalorder %s2903_s1, %s2318_s11  ;;  %p2322_p1 = scmp.lt.u32.totalorder %s2318_s11, %s2903_s1 }
   0xa   :  { %p2324_p2 = pnand %p2322_p1, %p2319_p0 }
   0xc   :  { %2327 = shalt.err (!%p2324_p2)
}
   0xd   :  { %s2328_s16 = scalar_lea.vmem %s37_s28, 192  ;;  %p2333_p4 = scmp.lt.s32.totalorder %s37_s28, %s37_s28 }
   0xe   :  { %p2329_p3 = scmp.ne.s32.totalorder %s37_s28, %s2328_s16  ;;  %p2334_p5 = scmp.lt.s32.totalorder %s2328_s16, %s2328_s16 }
  0x10   :  { %p2335_p6 = por %p2334_p5, %p2333_p4 }
  0x12   :  { %p2336_p7 = pnand %p2335_p6, %p2329_p3 }
  0x14   :  { %2339 = shalt.err (!%p2336_p7)
}
  0x15   :  { %s2530_s17 = smov 32   ;;  %s2531_s18 = smov 2  }
  0x16   :  { %42 = dma.hbm_to_vmem [thread:$0]  %s2903_s1, 192, %s37_s28, [#allocation6], %s2530_s17, %s2530_s17, %s2531_s18  }
  0x17   :  { %s2340_s23 = scalar_lea.hbm %s2905_s3, 192 }
  0x18   :  { %p2341_p8 = scmp.ne.s32.totalorder %s2905_s3, %s2340_s23  ;;  %p2344_p9 = scmp.lt.u32.totalorder %s2340_s23, %s2905_s3 }
  0x1a   :  { %p2346_p10 = pnand %p2344_p9, %p2341_p8 }
  0x1c   :  { %2349 = shalt.err (!%p2346_p10)
}
  0x1d   :  { %s2350_s29 = scalar_lea.vmem %s2594_s30, 192  ;;  %p2355_p12 = scmp.lt.s32.totalorder %s2594_s30, %s2594_s30 }
  0x1e   :  { %p2351_p11 = scmp.ne.s32.totalorder %s2594_s30, %s2350_s29  ;;  %p2356_p13 = scmp.lt.s32.totalorder %s2350_s29, %s2350_s29 }
  0x20   :  { %p2357_p0 = por %p2356_p13, %p2355_p12 }
  0x22   :  { %p2358_p1 = pnand %p2357_p0, %p2351_p11 }
  0x24   :  { %2361 = shalt.err (!%p2358_p1)
}
  0x25   :  { %66 = dma.hbm_to_vmem [thread:$0]  %s2905_s3, 192, %s2594_s30, [#allocation9], %s2530_s17, %s2530_s17, %s2531_s18  }
  0x26   :  { %s2532_s9 = smov [#allocation11]   ;;  %s2533_s11 = smov [#allocation2]  }
  0x27   :  { %s85_s10 = sshll.u32 %s2532_s9, 4  ;;  %s24_s12 = sshll.u32 %s2533_s11, 4  ;;  %s86_s10 = int_to_ptr.vmem [resolvable:$true] %s85_s10  ;;  %s2631_s12 = int_to_ptr.vmem [resolvable:$true] %s24_s12 }
  0x28   :  { %s2362_s15 = scalar_lea.hbm %s2907_s5, 16 }
  0x29   :  { %p2363_p2 = scmp.ne.s32.totalorder %s2907_s5, %s2362_s15  ;;  %p2366_p3 = scmp.lt.u32.totalorder %s2362_s15, %s2907_s5 }
  0x2b   :  { %p2368_p4 = pnand %p2366_p3, %p2363_p2 }
  0x2d   :  { %2371 = shalt.err (!%p2368_p4)
}
  0x2e   :  { %s2372_s3 = scalar_lea.vmem %s86_s10, 16  ;;  %s2376_s30 = scalar_lea.vmem %s86_s10, 32 }
  0x2f   :  { %p2373_p5 = scmp.ne.s32.totalorder %s86_s10, %s2372_s3  ;;  %p2377_p6 = scmp.lt.s32.totalorder %s86_s10, %s86_s10 }
  0x30   :  { %p2378_p7 = scmp.lt.s32.totalorder %s2376_s30, %s2372_s3 }
  0x32   :  { %p2379_p8 = por %p2378_p7, %p2377_p6 }
  0x34   :  { %p2380_p9 = pnand %p2379_p8, %p2373_p5 }
  0x36   :  { %2383 = shalt.err (!%p2380_p9)
}
  0x37   :  { %88 = dma.hbm_to_vmem [thread:$0]  %s2907_s5, 16, %s86_s10, [#allocation12]  }
  0x38   :  { %s2384_s26 = scalar_lea.hbm %s2902_s0, 192 }
  0x39   :  { %p2385_p10 = scmp.ne.s32.totalorder %s2902_s0, %s2384_s26  ;;  %p2388_p11 = scmp.lt.u32.totalorder %s2384_s26, %s2902_s0 }
  0x3b   :  { %p2390_p12 = pnand %p2388_p11, %p2385_p10 }
  0x3d   :  { %2393 = shalt.err (!%p2390_p12)
}
  0x3e   :  { %s2394_s9 = scalar_lea.vmem %s2631_s12, 192  ;;  %p2399_p0 = scmp.lt.s32.totalorder %s2631_s12, %s2631_s12 }
  0x3f   :  { %p2395_p13 = scmp.ne.s32.totalorder %s2631_s12, %s2394_s9  ;;  %p2400_p1 = scmp.lt.s32.totalorder %s2394_s9, %s2394_s9 }
  0x41   :  { %p2401_p2 = por %p2400_p1, %p2399_p0 }
  0x43   :  { %p2402_p3 = pnand %p2401_p2, %p2395_p13 }
  0x45   :  { %2405 = shalt.err (!%p2402_p3)
}
  0x46   :  { %30 = dma.hbm_to_vmem [thread:$0]  %s2902_s0, 192, %s2631_s12, [#allocation3], %s2530_s17, %s2530_s17, %s2531_s18  }
  0x47   :  { %s2534_s11 = smov [#allocation7]   ;;  %s2535_s14 = smov [#allocation10]  }
  0x48   :  { %s48_s13 = sshll.u32 %s2534_s11, 4  ;;  %s72_s15 = sshll.u32 %s2535_s14, 4  ;;  %s49_s13 = int_to_ptr.vmem [resolvable:$true] %s48_s13  ;;  %s2665_s15 = int_to_ptr.vmem [resolvable:$true] %s72_s15 }
  0x49   :  { %s2406_s20 = scalar_lea.hbm %s2904_s2, 192 }
  0x4a   :  { %p2407_p4 = scmp.ne.s32.totalorder %s2904_s2, %s2406_s20  ;;  %p2410_p5 = scmp.lt.u32.totalorder %s2406_s20, %s2904_s2 }
  0x4c   :  { %p2412_p6 = pnand %p2410_p5, %p2407_p4 }
  0x4e   :  { %2415 = shalt.err (!%p2412_p6)
}
  0x4f   :  { %s2416_s0 = scalar_lea.vmem %s49_s13, 192  ;;  %p2421_p8 = scmp.lt.s32.totalorder %s49_s13, %s49_s13 }
  0x50   :  { %p2417_p7 = scmp.ne.s32.totalorder %s49_s13, %s2416_s0  ;;  %p2422_p9 = scmp.lt.s32.totalorder %s2416_s0, %s2416_s0 }
  0x52   :  { %p2423_p10 = por %p2422_p9, %p2421_p8 }
  0x54   :  { %p2424_p11 = pnand %p2423_p10, %p2417_p7 }
  0x56   :  { %2427 = shalt.err (!%p2424_p11)
}
  0x57   :  { %54 = dma.hbm_to_vmem [thread:$0]  %s2904_s2, 192, %s49_s13, [#allocation6], %s2530_s17, %s2530_s17, %s2531_s18  }
  0x58   :  { %s2428_s26 = scalar_lea.hbm %s2906_s4, 9216 }
  0x59   :  { %p2429_p12 = scmp.ne.s32.totalorder %s2906_s4, %s2428_s26  ;;  %p2432_p13 = scmp.lt.u32.totalorder %s2428_s26, %s2906_s4 }
  0x5b   :  { %p2434_p0 = pnand %p2432_p13, %p2429_p12 }
  0x5d   :  { %2437 = shalt.err (!%p2434_p0)
}
  0x5e   :  { %s2438_s9 = scalar_lea.vmem %s2665_s15, 9216  ;;  %p2443_p2 = scmp.lt.s32.totalorder %s2665_s15, %s2665_s15 }
  0x5f   :  { %p2439_p1 = scmp.ne.s32.totalorder %s2665_s15, %s2438_s9  ;;  %p2444_p3 = scmp.lt.s32.totalorder %s2438_s9, %s2438_s9 }
  0x61   :  { %p2445_p4 = por %p2444_p3, %p2443_p2 }
  0x63   :  { %p2446_p5 = pnand %p2445_p4, %p2439_p1 }
  0x65   :  { %2449 = shalt.err (!%p2446_p5)
}
  0x66   :  { %s2536_s2 = smov 64   ;;  %s2537_s17 = smov 4  }
  0x67   :  { %78 = dma.hbm_to_vmem [thread:$0]  %s2906_s4, 9216, %s2665_s15, [#allocation9], %s2536_s2, %s2536_s2, %s2537_s17  }
  0x68   :  { %s2538_s10 = smov [#allocation13]   ;;  %s2450_s16 = scalar_lea.hbm %s2908_s6, 2048 }
  0x69   :  { %s94_s11 = sshll.u32 %s2538_s10, 4  ;;  %p2451_p6 = scmp.ne.s32.totalorder %s2908_s6, %s2450_s16  ;;  %s95_s11 = int_to_ptr.vmem [resolvable:$true] %s94_s11 }
  0x6a   :  { %p2454_p7 = scmp.lt.u32.totalorder %s2450_s16, %s2908_s6 }
  0x6c   :  { %p2456_p8 = pnand %p2454_p7, %p2451_p6 }
  0x6e   :  { %2459 = shalt.err (!%p2456_p8)
}
  0x6f   :  { %s2460_s30 = scalar_lea.vmem %s95_s11, 2048  ;;  %p2465_p10 = scmp.lt.s32.totalorder %s95_s11, %s95_s11 }
  0x70   :  { %p2461_p9 = scmp.ne.s32.totalorder %s95_s11, %s2460_s30  ;;  %p2466_p11 = scmp.lt.s32.totalorder %s2460_s30, %s2460_s30 }
  0x72   :  { %p2467_p12 = por %p2466_p11, %p2465_p10 }
  0x74   :  { %p2468_p13 = pnand %p2467_p12, %p2461_p9 }
  0x76   :  { %2471 = shalt.err (!%p2468_p13)
}
  0x77   :  { %s2539_s4 = smov 128   ;;  %s2540_s15 = smov 8  }
  0x78   :  { %100 = dma.hbm_to_vmem [thread:$0]  %s2908_s6, 2048, %s95_s11, [#allocation12], %s2539_s4, %s2539_s4, %s2540_s15  }
  0x79   :  { %s2541_s12 = smov [#allocation14]   ;;  %s2472_s26 = scalar_lea.hbm %s2909_s7, 16 }
  0x7a   :  { %s107_s23 = sshll.u32 %s2541_s12, 4  ;;  %p2473_p0 = scmp.ne.s32.totalorder %s2909_s7, %s2472_s26  ;;  %s108_s23 = int_to_ptr.vmem [resolvable:$true] %s107_s23 }
  0x7b   :  { %p2476_p1 = scmp.lt.u32.totalorder %s2472_s26, %s2909_s7 }
  0x7d   :  { %p2478_p2 = pnand %p2476_p1, %p2473_p0 }
  0x7f   :  { %2481 = shalt.err (!%p2478_p2)
}
  0x80   :  { %s2482_s9 = scalar_lea.vmem %s108_s23, 16  ;;  %s2486_s6 = scalar_lea.vmem %s108_s23, 32 }
  0x81   :  { %p2483_p3 = scmp.ne.s32.totalorder %s108_s23, %s2482_s9  ;;  %p2487_p4 = scmp.lt.s32.totalorder %s108_s23, %s108_s23 }
  0x82   :  { %p2488_p5 = scmp.lt.s32.totalorder %s2486_s6, %s2482_s9 }
  0x84   :  { %p2489_p6 = por %p2488_p5, %p2487_p4 }
  0x86   :  { %p2490_p7 = pnand %p2489_p6, %p2483_p3 }
  0x88   :  { %2493 = shalt.err (!%p2490_p7)
}
  0x89   :  { %110 = dma.hbm_to_vmem [thread:$0]  %s2909_s7, 16, %s108_s23, [#allocation15]  }
  0x8a   :  { %2516 = dma.done.wait [#allocation3], 192  }
  0x8b   :  { %2517 = vsyncadd [#allocation3], 4294967104 }
  0x8c   :  { %2518 = dma.done.wait [#allocation6], 384  }
  0x8d   :  { %2519 = vsyncadd [#allocation6], 4294966912 }
  0x8e   :  { %2520 = dma.done.wait [#allocation9], 9408  }
  0x8f   :  { %2521 = vsyncadd [#allocation9], 4294957888 }
  0x90   :  { %2522 = dma.done.wait [#allocation12], 2064  }
  0x91   :  { %2523 = vsyncadd [#allocation12], 4294965232 }
  0x92   :  { %2524 = dma.done.wait [#allocation15], 16  }
  0x93   :  { %2525 = vsyncadd [#allocation15], 4294967280  ;;  %v2542_v0 = vmov 0.0   ;;  %vm2543_vm0 = vmmov 0   ;;  %v2246_v1 = vld [vmem:[#allocation10 + $0x40] sm:$0xff]   ;;  %v2248_v3 = vld [vmem:[#allocation10 + $0x48] sm:$0xff]   ;;  %v186_v9 = vlaneseq }
  0x94   :  { %1986 = vmatprep.subr.bf16.mxu0 %v2542_v0  ;;  %2006 = vmatprep.subr.bf16.mxu1 %v2542_v0  ;;  %v2247_v2 = vld [vmem:[#allocation10] sm:$0xff]   ;;  %v2249_v4 = vld [vmem:[#allocation10 + $0x8] sm:$0xff]   ;;  %v2250_v5 = vld [vmem:[#allocation10 + $0x50] sm:$0xff]   ;;  %v2544_v7 = vmov 1966171168   ;;  %s2546_s7 = smov [#allocation16]  }
  0x95   :  { %2002 = vmatprep.mubr.msk.bf16.mxu0 %vm2543_vm0, %v2542_v0  ;;  %2022 = vmatprep.mubr.msk.bf16.mxu1 %vm2543_vm0, %v2542_v0  ;;  %v2251_v6 = vld [vmem:[#allocation10 + $0x10] sm:$0xff]   ;;  %v184_v8 = vunpack.c.l.s4 %v2544_v7  ;;  %v2252_v10 = vld [vmem:[#allocation10 + $0x58] sm:$0xff]   ;;  %vm451_vm1 = vsmask.f32 256  ;;  %vm452_vm2 = vsmask.f32 1284 }
  0x96   :  { %1987 = vmatpush3.bf16.msra.mxu0 %v2246_v1  ;;  %2007 = vmatpush3.bf16.msra.mxu1 %v2247_v2  ;;  %v2253_v11 = vld [vmem:[#allocation10 + $0x18] sm:$0xff]   ;;  %v187_v13 = vshrl.u32 %v186_v9, 7  ;;  %v2254_v14 = vld [vmem:[#allocation10 + $0x60] sm:$0xff]   ;;  %v2256_v16 = vld [vmem:[#allocation10 + $0x68] sm:$0xff]   ;;  %vm454_vm4 = vsmask.f32 2312 }
  0x97   :  { %1988 = vmatprep.subr.bf16.mxu0 %v2542_v0  ;;  %2008 = vmatprep.subr.bf16.mxu1 %v2542_v0  ;;  %v185_v12 = vunpack.c.0.s8 %v184_v8  ;;  %v2255_v15 = vld [vmem:[#allocation10 + $0x20] sm:$0xff]   ;;  %v156_v17 = vld [vmem:[#allocation5] sm:$0x1]  ;;  %v157_v18 = vld [vmem:[#allocation5 + $0x2] sm:$0x1]  ;;  %s1772_s18 = sshll.u32 %s2546_s7, 4  ;;  %s1773_s18 = int_to_ptr.vmem [resolvable:$true] %s1772_s18 }
  0x98   :  { %v158_v19 = vld [vmem:[#allocation5 + $0x6] sm:$0x1]  ;;  %v159_v20 = vld [vmem:[#allocation5 + $0x8] sm:$0x1]  ;;  %v181_v21 = vcombine.low %v156_v17, %v157_v18  ;;  %v136_v23 = vld [vmem:[#allocation2] sm:$0x1]  ;;  %p2499_p9 = scmp.lt.s32.totalorder %s1773_s18, %s1773_s18 }
  0x99   :  { %v2737_v22 = vsub.s32 %v185_v12, %v187_v13  ;;  %v137_v24 = vld [vmem:[#allocation2 + $0x2] sm:$0x1]  ;;  %v182_v25 = vcombine.low %v158_v19, %v159_v20  ;;  %v138_v26 = vld [vmem:[#allocation2 + $0x6] sm:$0x1]  ;;  %v139_v27 = vld [vmem:[#allocation2 + $0x8] sm:$0x1] }
  0x9a   :  { %1989 = vmatpush3.bf16.msra.mxu0 %v2248_v3  ;;  %2009 = vmatpush3.bf16.msra.mxu1 %v2249_v4  ;;  %v298_v28 = vcombine.low %v136_v23, %v137_v24  ;;  %v2257_v29 = vld [vmem:[#allocation10 + $0x28] sm:$0xff]   ;;  %v299_v30 = vcombine.low %v138_v26, %v139_v27  ;;  %vm453_vm3 = vmor %vm451_vm1, %vm452_vm2  ;;  %v2258_v33 = vld [vmem:[#allocation10 + $0x70] sm:$0xff]   ;;  %vm456_vm6 = vsmask.f32 3340  ;;  %vm458_vm8 = vsmask.f32 4368 }
  0x9b   :  { %1990 = vmatprep.subr.bf16.mxu0 %v2542_v0  ;;  %2010 = vmatprep.subr.bf16.mxu1 %v2542_v0  ;;  %v189_v31 = vrot.slane %v181_v21, %v2737_v22  ;;  %v196_v32 = vrot.slane %v182_v25, %v2737_v22  ;;  %v2259_v36 = vld [vmem:[#allocation10 + $0x30] sm:$0xff]   ;;  %vm455_vm5 = vmor %vm453_vm3, %vm454_vm4  ;;  %v2260_v38 = vld [vmem:[#allocation10 + $0x78] sm:$0xff]   ;;  %vm460_vm10 = vsmask.f32 5396  ;;  %vm462_vm11 = vsmask.f32 6424 }
  0x9c   :  { %v306_v34 = vrot.slane %v298_v28, %v2737_v22  ;;  %v313_v35 = vrot.slane %v299_v30, %v2737_v22  ;;  %v2261_v40 = vld [vmem:[#allocation10 + $0x38] sm:$0xff]   ;;  %vm457_vm7 = vmor %vm455_vm5, %vm456_vm6  ;;  %v2262_v43 = vld [vmem:[#allocation10 + $0x80] sm:$0xff]   ;;  %vm464_vm13 = vsmask.f32 7452  ;;  %vm1620_vm1 = vcmask 1043456   ;;  %s2494_s5 = scalar_lea.vmem %s1773_s18, 32 }
  0x9d   :  { %v197_v37 = vcombine.low %v189_v31, %v196_v32  ;;  %v2263_v44 = vld [vmem:[#allocation10 + $0xc0] sm:$0xff]   ;;  %vm459_vm9 = vmor %vm457_vm7, %vm458_vm8  ;;  %v2264_v45 = vld [vmem:[#allocation10 + $0x88] sm:$0xff]   ;;  %vm1663_vm2 = vcmask 1041409   ;;  %p2495_p8 = scmp.ne.s32.totalorder %s1773_s18, %s2494_s5  ;;  %p2500_p10 = scmp.lt.s32.totalorder %s2494_s5, %s2494_s5 }
  0x9e   :  { %1991 = vmatpush3.bf16.msra.mxu0 %v2250_v5  ;;  %2011 = vmatpush3.bf16.msra.mxu1 %v2251_v6  ;;  %v314_v39 = vcombine.low %v306_v34, %v313_v35  ;;  %v2265_v46 = vld [vmem:[#allocation10 + $0xc8] sm:$0xff]   ;;  %v1804_v47 = vld.sshfl [vmem:[#allocation2] sm:$0x11 pattern:$0x75316420]  ;;  %vm461_vm12 = vmor %vm459_vm9, %vm460_vm10 }
  0x9f   :  { %1992 = vmatprep.subr.bf16.mxu0 %v2542_v0  ;;  %2012 = vmatprep.subr.bf16.mxu1 %v2542_v0  ;;  %v204_v41 = vrot.slane %v197_v37, %v2737_v22  ;;  %v1805_v48 = vld.sshfl [vmem:[#allocation2 + $0x2] sm:$0x11 pattern:$0x75316420]  ;;  %v426_v49 = vcombine.high %v1804_v47, %v1804_v47  ;;  %vm463_vm14 = vmor %vm461_vm12, %vm462_vm11  ;;  %v2268_v57 = vld [vmem:[#allocation10 + $0x98] sm:$0xff]   ;;  %v467_v58 = vshrl.u32 %v1804_v47, 16  ;;  %p2501_p11 = por %p2500_p10, %p2499_p9 }
  0xa0   :  { %v321_v42 = vrot.slane %v314_v39, %v2737_v22  ;;  %v1806_v50 = vld.sshfl [vmem:[#allocation2 + $0x6] sm:$0x11 pattern:$0x75316420]  ;;  %v434_v51 = vcombine.high %v1805_v48, %v1805_v48  ;;  %v476_v60 = vshrl.u32 %v1805_v48, 16  ;;  %v2269_v62 = vld [vmem:[#allocation10 + $0xd8] sm:$0xff]   ;;  %vm2765_vm15 = vmor %vm463_vm14, %vm464_vm13 }
  0xa1   :  { %v2266_v52 = vld [vmem:[#allocation10 + $0x90] sm:$0xff]   ;;  %v1807_v53 = vld.sshfl [vmem:[#allocation2 + $0x8] sm:$0x11 pattern:$0x75316420]  ;;  %v442_v54 = vcombine.high %v1806_v50, %v1806_v50  ;;  %v472_v59 = vshll.u32 %v426_v49, 16  ;;  %p2502_p12 = pnand %p2501_p11, %p2495_p8 }
  0xa2   :  { %1993 = vmatpush3.bf16.msra.mxu0 %v2252_v10  ;;  %2013 = vmatpush3.bf16.msra.mxu1 %v2253_v11  ;;  %v2267_v55 = vld [vmem:[#allocation10 + $0xd0] sm:$0xff]   ;;  %v450_v56 = vcombine.high %v1807_v53, %v1807_v53  ;;  %v485_v61 = vshrl.u32 %v1806_v50, 16  ;;  %v481_v1 = vshll.u32 %v434_v51, 16  ;;  %v494_v3 = vshrl.u32 %v1807_v53, 16  ;;  %v2270_v5 = vld [vmem:[#allocation10 + $0xa0] sm:$0xff]   ;;  %v2272_v17 = vld [vmem:[#allocation10 + $0xa8] sm:$0xff]  }
  0xa3   :  { %1994 = vmatprep.subr.bf16.mxu0 %v2542_v0  ;;  %2014 = vmatprep.subr.bf16.mxu1 %v2542_v0  ;;  %v490_v2 = vshll.u32 %v442_v54, 16  ;;  %v2271_v6 = vld [vmem:[#allocation10 + $0xe0] sm:$0xff]   ;;  %v633_v7 = vld [vmem:[#allocation7] sm:$0x1]  ;;  %v634_v8 = vld [vmem:[#allocation7 + $0x2] sm:$0x1]  ;;  %v474_v9 = vsel %vm2765_vm15, %v467_v58, %v472_v59 }
  0xa4   :  { %v499_v4 = vshll.u32 %v450_v56, 16  ;;  %v2775_v10 = vsel %vm2765_vm15, %v476_v60, %v481_v1  ;;  %v635_v13 = vld [vmem:[#allocation7 + $0x6] sm:$0x1]  ;;  %v658_v18 = vcombine.low %v633_v7, %v634_v8  ;;  %v2274_v24 = vld [vmem:[#allocation10 + $0xb0] sm:$0xff]   ;;  %v2277_v31 = vld [vmem:[#allocation10 + $0xf8] sm:$0xff]  }
  0xa5   :  { %v492_v11 = vsel %vm2765_vm15, %v485_v61, %v490_v2  ;;  %v2273_v20 = vld [vmem:[#allocation10 + $0xe8] sm:$0xff]   ;;  %v2275_v27 = vld [vmem:[#allocation10 + $0xf0] sm:$0xff]   ;;  %v2279_v35 = vld [vmem:[#allocation10 + $0x140] sm:$0xff]  }
  0xa6   :  { %1995 = vmatpush3.bf16.msra.mxu0 %v2254_v14  ;;  %2015 = vmatpush3.bf16.msra.mxu1 %v2255_v15  ;;  %v2781_v12 = vsel %vm2765_vm15, %v494_v3, %v499_v4  ;;  %v636_v14 = vld [vmem:[#allocation7 + $0x8] sm:$0x1]  ;;  %v519_v15 = vcombine.low %v474_v9, %v2775_v10  ;;  %v666_v25 = vrot.slane %v658_v18, %v2737_v22  ;;  %v1837_v37 = vld.sshfl [vmem:[#allocation7 + $0x2] sm:$0x11 pattern:$0x75316420] }
  0xa7   :  { %1996 = vmatprep.subr.bf16.mxu0 %v2542_v0  ;;  %2016 = vmatprep.subr.bf16.mxu1 %v2542_v0  ;;  %v659_v19 = vcombine.low %v635_v13, %v636_v14  ;;  %v1838_v39 = vld.sshfl [vmem:[#allocation7 + $0x6] sm:$0x11 pattern:$0x75316420]  ;;  %v2284_v48 = vld [vmem:[#allocation10 + $0x118] sm:$0xff]   ;;  %v961_v50 = vshrl.u32 %v1837_v37, 16 }
  0xa8   :  { %v527_v21 = vrot.slane %v519_v15, %v2737_v22  ;;  %v2285_v51 = vld [vmem:[#allocation10 + $0x158] sm:$0xff]   ;;  %v970_v53 = vshrl.u32 %v1838_v39, 16  ;;  %v2286_v58 = vld [vmem:[#allocation10 + $0x120] sm:$0xff]   ;;  %v772_v59 = vld [vmem:[#allocation8] sm:$0x1] }
  0xa9   :  { %v673_v26 = vrot.slane %v659_v19, %v2737_v22  ;;  %v773_v60 = vld [vmem:[#allocation8 + $0x2] sm:$0x1]  ;;  %v774_v61 = vld [vmem:[#allocation8 + $0x6] sm:$0x1]  ;;  %v2287_v2 = vld [vmem:[#allocation10 + $0x160] sm:$0xff]  }
  0xaa   :  { %1997 = vmatpush3.bf16.msra.mxu0 %v2256_v16  ;;  %2017 = vmatpush3.bf16.msra.mxu1 %v2257_v29  ;;  %v520_v16 = vcombine.low %v492_v11, %v2781_v12  ;;  %v2276_v29 = vld [vmem:[#allocation10 + $0xb8] sm:$0xff]   ;;  %v2288_v8 = vld [vmem:[#allocation10 + $0x128] sm:$0xff]   ;;  %v2291_v19 = vld [vmem:[#allocation10 + $0x170] sm:$0xff]  }
  0xab   :  { %1998 = vmatprep.subr.bf16.mxu0 %v2542_v0  ;;  %2018 = vmatprep.subr.bf16.mxu1 %v2542_v0  ;;  %v674_v30 = vcombine.low %v666_v25, %v673_v26  ;;  %v2289_v13 = vld [vmem:[#allocation10 + $0x168] sm:$0xff]  }
  0xac   :  { %v534_v23 = vrot.slane %v520_v16, %v2737_v22  ;;  %v2290_v16 = vld [vmem:[#allocation10 + $0x130] sm:$0xff]  }
  0xad   :  { %v681_v34 = vrot.slane %v674_v30, %v2737_v22 }
  0xae   :  { %1999 = vmatpush3.bf16.msra.mxu0 %v2258_v33  ;;  %2019 = vmatpush3.bf16.msra.mxu1 %v2259_v36  ;;  %v535_v28 = vcombine.low %v527_v21, %v534_v23  ;;  %v2278_v33 = vld [vmem:[#allocation10 + $0x100] sm:$0xff]   ;;  %v1836_v36 = vld.sshfl [vmem:[#allocation7] sm:$0x11 pattern:$0x75316420] }
  0xaf   :  { %2000 = vmatprep.subr.bf16.mxu0 %v2542_v0  ;;  %2020 = vmatprep.subr.bf16.mxu1 %v2542_v0  ;;  %v952_v49 = vshrl.u32 %v1836_v36, 16  ;;  %v1871_v21 = vld.sshfl [vmem:[#allocation2 + $0xa] sm:$0x11 pattern:$0x75316420] }
  0xb0   :  { %v542_v32 = vrot.slane %v535_v28, %v2737_v22  ;;  %v1437_v26 = vcombine.high %v1871_v21, %v1871_v21  ;;  %v2292_v28 = vld [vmem:[#allocation10 + $0x138] sm:$0xff]  }
  0xb2   :  { %2001 = vmatpush3.bf16.msra.mxu0 %v2260_v38  ;;  %2021 = vmatpush3.bf16.msra.mxu1 %v2261_v40  ;;  %v2280_v38 = vld [vmem:[#allocation10 + $0x108] sm:$0xff]   ;;  %v1839_v40 = vld.sshfl [vmem:[#allocation7 + $0x8] sm:$0x11 pattern:$0x75316420] }
  0xb3   :  { %2026 = vmatprep.subr.bf16.mxu0 %v2542_v0  ;;  %2046 = vmatprep.subr.bf16.mxu1 %v2542_v0  ;;  %v950_v47 = vcombine.high %v1839_v40, %v1839_v40 }
  0xb5   :  { %2003 = vmatmul.mubr.bf16.vlgmr.msra.gmra.mrb[0].mxu0 %v204_v41  ;;  %2023 = vmatmul.mubr.bf16.vlgmr.msra.gmra.mrb[0].mxu1 %v321_v42  ;;  %v2281_v41 = vld [vmem:[#allocation10 + $0x148] sm:$0xff]   ;;  %v926_v42 = vcombine.high %v1836_v36, %v1836_v36 }
  0xb6   :  { %2027 = vmatpush3.bf16.msra.mxu0 %v2262_v43  ;;  %2047 = vmatpush3.bf16.msra.mxu1 %v2263_v44  ;;  %v2282_v43 = vld [vmem:[#allocation10 + $0x110] sm:$0xff]   ;;  %v934_v44 = vcombine.high %v1837_v37, %v1837_v37  ;;  %v2294_v37 = vld [vmem:[#allocation10 + $0x180] sm:$0xff]  }
  0xb7   :  { %2028 = vmatprep.subr.bf16.mxu0 %v2542_v0  ;;  %2048 = vmatprep.subr.bf16.mxu1 %v2542_v0 }
  0xb8   :  { %2042 = vmatprep.mubr.msk.bf16.mxu0 %vm2543_vm0, %v2542_v0  ;;  %2062 = vmatprep.mubr.msk.bf16.mxu1 %vm2543_vm0, %v2542_v0  ;;  %v966_v54 = vshll.u32 %v934_v44, 16  ;;  %v2299_v44 = vld [vmem:[#allocation10 + $0x1d0] sm:$0xff]  }
  0xba   :  { %2029 = vmatpush3.bf16.msra.mxu0 %v2264_v45  ;;  %2049 = vmatpush3.bf16.msra.mxu1 %v2265_v46  ;;  %v2283_v45 = vld [vmem:[#allocation10 + $0x150] sm:$0xff]   ;;  %v942_v46 = vcombine.high %v1838_v39, %v1838_v39  ;;  %v968_v3 = vsel %vm2765_vm15, %v961_v50, %v966_v54  ;;  %v1260_v54 = vld [vmem:[#allocation5 + $0x4] sm:$0x1] }
  0xbb   :  { %2030 = vmatprep.subr.bf16.mxu0 %v2542_v0  ;;  %2050 = vmatprep.subr.bf16.mxu1 %v2542_v0  ;;  %v1120_v50 = vld [vmem:[#allocation2 + $0x4] sm:$0x1] }
  0xbc   :  { %v975_v56 = vshll.u32 %v942_v46, 16  ;;  %v2301_v46 = vld [vmem:[#allocation10 + $0x1d8] sm:$0xff]  }
  0xbe   :  { %2031 = vmatpush3.bf16.msra.mxu0 %v2266_v52  ;;  %2051 = vmatpush3.bf16.msra.mxu1 %v2267_v55  ;;  %v957_v52 = vshll.u32 %v926_v42, 16  ;;  %v979_v55 = vshrl.u32 %v1839_v40, 16  ;;  %v977_v4 = vsel %vm2765_vm15, %v970_v53, %v975_v56  ;;  %v2295_v40 = vld [vmem:[#allocation10 + $0x1c0] sm:$0xff]   ;;  %v1259_v53 = vld [vmem:[#allocation5 + $0x2] sm:$0x1] }
  0xbf   :  { %2032 = vmatprep.subr.bf16.mxu0 %v2542_v0  ;;  %2052 = vmatprep.subr.bf16.mxu1 %v2542_v0  ;;  %v1262_v56 = vld [vmem:[#allocation5 + $0xa] sm:$0x1] }
  0xc0   :  { %v959_v1 = vsel %vm2765_vm15, %v952_v49, %v957_v52  ;;  %v1119_v49 = vld [vmem:[#allocation2 + $0x2] sm:$0x1]  ;;  %v1122_v52 = vld [vmem:[#allocation2 + $0xa] sm:$0x1] }
  0xc1   :  { %v1004_v9 = vcombine.low %v959_v1, %v968_v3  ;;  %v2306_v3 = vld [vmem:[#allocation10 + $0x1b0] sm:$0xff]  }
  0xc2   :  { %2033 = vmatpush3.bf16.msra.mxu0 %v2268_v57  ;;  %2053 = vmatpush3.bf16.msra.mxu1 %v2269_v62  ;;  %v984_v57 = vshll.u32 %v950_v47, 16  ;;  %v775_v62 = vld [vmem:[#allocation8 + $0x8] sm:$0x1]  ;;  %v2302_v47 = vld [vmem:[#allocation10 + $0x1a0] sm:$0xff]  }
  0xc3   :  { %2034 = vmatprep.subr.bf16.mxu0 %v2542_v0  ;;  %2054 = vmatprep.subr.bf16.mxu1 %v2542_v0  ;;  %v798_v7 = vcombine.low %v774_v61, %v775_v62  ;;  %v2305_v62 = vld [vmem:[#allocation10 + $0x1e8] sm:$0xff]  }
  0xc5   :  { %v812_v15 = vrot.slane %v798_v7, %v2737_v22 }
  0xc6   :  { %2035 = vmatpush3.bf16.msra.mxu0 %v2270_v5  ;;  %2055 = vmatpush3.bf16.msra.mxu1 %v2271_v6  ;;  %v986_v5 = vsel %vm2765_vm15, %v979_v55, %v984_v57  ;;  %v797_v6 = vcombine.low %v772_v59, %v773_v60  ;;  %v1261_v55 = vld [vmem:[#allocation5 + $0x8] sm:$0x1]  ;;  %v1144_v57 = vcombine.low %v1119_v49, %v1120_v50  ;;  %v2304_v59 = vld [vmem:[#allocation10 + $0x1a8] sm:$0xff]  }
  0xc7   :  { %2036 = vmatprep.subr.bf16.mxu0 %v2542_v0  ;;  %2056 = vmatprep.subr.bf16.mxu1 %v2542_v0  ;;  %v1005_v11 = vcombine.low %v977_v4, %v986_v5  ;;  %v1284_v60 = vcombine.low %v1259_v53, %v1260_v54  ;;  %v1285_v61 = vcombine.low %v1261_v55, %v1262_v56  ;;  %v1650_v49 = vld [vmem:[#allocation13 + $0x60] sm:$0xff]  ;;  %v1651_v50 = vld [vmem:[#allocation13 + $0x68] sm:$0xff]  ;;  %v1653_v53 = vld [vmem:[#allocation13 + $0x78] sm:$0xff] }
  0xc8   :  { %v805_v14 = vrot.slane %v797_v6, %v2737_v22  ;;  %v1152_v1 = vrot.slane %v1144_v57, %v2737_v22  ;;  %v2307_v6 = vld [vmem:[#allocation10 + $0x1f0] sm:$0xff]  }
  0xc9   :  { %v1019_v18 = vrot.slane %v1005_v11, %v2737_v22  ;;  %v1292_v4 = vrot.slane %v1284_v60, %v2737_v22  ;;  %v1299_v5 = vrot.slane %v1285_v61, %v2737_v22  ;;  %v2309_v11 = vld [vmem:[#allocation10 + $0x1f8] sm:$0xff]  }
  0xca   :  { %2037 = vmatpush3.bf16.msra.mxu0 %v2272_v17  ;;  %2057 = vmatpush3.bf16.msra.mxu1 %v2273_v20  ;;  %v1012_v17 = vrot.slane %v1004_v9, %v2737_v22  ;;  %v1869_v20 = vld.sshfl [vmem:[#allocation2 + $0x4] sm:$0x11 pattern:$0x75316420]  ;;  %v813_v25 = vcombine.low %v805_v14, %v812_v15  ;;  %v2310_v14 = vld [vmem:[#allocation10 + $0x200] sm:$0xff]  }
  0xcb   :  { %2038 = vmatprep.subr.bf16.mxu0 %v2542_v0  ;;  %2058 = vmatprep.subr.bf16.mxu1 %v2542_v0  ;;  %v1421_v23 = vcombine.high %v1869_v20, %v1869_v20  ;;  %v1300_v9 = vcombine.low %v1292_v4, %v1299_v5 }
  0xcd   :  { %v1453_v30 = vshll.u32 %v1421_v23, 16  ;;  %v1307_v15 = vrot.slane %v1300_v9, %v2737_v22  ;;  %v2317_v23 = vld [vmem:[#allocation10 + $0x238] sm:$0xff]  }
  0xce   :  { %2039 = vmatpush3.bf16.msra.mxu0 %v2274_v24  ;;  %2059 = vmatpush3.bf16.msra.mxu1 %v2275_v27  ;;  %v1448_v24 = vshrl.u32 %v1869_v20, 16  ;;  %v1466_v27 = vshrl.u32 %v1871_v21, 16  ;;  %v2315_v20 = vld [vmem:[#allocation10 + $0x228] sm:$0xff]   ;;  %v2316_v21 = vld [vmem:[#allocation10 + $0x230] sm:$0xff]  }
  0xcf   :  { %2040 = vmatprep.subr.bf16.mxu0 %v2542_v0  ;;  %2060 = vmatprep.subr.bf16.mxu1 %v2542_v0 }
  0xd2   :  { %2041 = vmatpush3.bf16.msra.mxu0 %v2276_v29  ;;  %2061 = vmatpush3.bf16.msra.mxu1 %v2277_v31  ;;  %v1020_v29 = vcombine.low %v1012_v17, %v1019_v18  ;;  %v2293_v31 = vld [vmem:[#allocation10 + $0x178] sm:$0xff]   ;;  %v2312_v17 = vld [vmem:[#allocation10 + $0x210] sm:$0xff]  }
  0xd3   :  { %2066 = vmatprep.subr.bf16.mxu0 %v2542_v0  ;;  %2086 = vmatprep.subr.bf16.mxu1 %v2542_v0  ;;  %v2313_v18 = vld [vmem:[#allocation10 + $0x218] sm:$0xff]  }
  0xd5   :  { %2043 = vmatmul.mubr.bf16.vlgmr.msra.gmra.mrb[4].mxu0 %v542_v32  ;;  %2063 = vmatmul.mubr.bf16.vlgmr.msra.gmra.mrb[4].mxu1 %v681_v34  ;;  %v1471_v32 = vshll.u32 %v1437_v26, 16  ;;  %v820_v34 = vrot.slane %v813_v25, %v2737_v22  ;;  %v1638_v25 = vld [vmem:[#allocation13] sm:$0xff]  ;;  %v1639_v26 = vld [vmem:[#allocation13 + $0x8] sm:$0xff] }
  0xd6   :  { %2067 = vmatpush3.bf16.msra.mxu0 %v2278_v33  ;;  %2087 = vmatpush3.bf16.msra.mxu1 %v2279_v35  ;;  %v1455_v33 = vsel %vm2765_vm15, %v1448_v24, %v1453_v30  ;;  %v1641_v30 = vld [vmem:[#allocation13 + $0x18] sm:$0xff] }
  0xd7   :  { %2068 = vmatprep.subr.bf16.mxu0 %v2542_v0  ;;  %2088 = vmatprep.subr.bf16.mxu1 %v2542_v0  ;;  %v1473_v35 = vsel %vm2765_vm15, %v1466_v27, %v1471_v32  ;;  %v1491_v36 = vcombine.low %v2775_v10, %v1455_v33  ;;  %v2296_v10 = vld [vmem:[#allocation10 + $0x188] sm:$0xff]   ;;  %v2545_v27 = vmov 0.0|0.0  }
  0xd8   :  { %2082 = vmatprep.mubr.msk.bf16.mxu0 %vm2543_vm0, %v2542_v0  ;;  %2102 = vmatprep.mubr.msk.bf16.mxu1 %vm2543_vm0, %v2542_v0  ;;  %v1492_v39 = vcombine.low %v2781_v12, %v1473_v35  ;;  %v2297_v12 = vld [vmem:[#allocation10 + $0x1c8] sm:$0xff]  }
  0xda   :  { %2069 = vmatpush3.bf16.msra.mxu0 %v2280_v38  ;;  %2089 = vmatpush3.bf16.msra.mxu1 %v2281_v41  ;;  %v1027_v38 = vrot.slane %v1020_v29, %v2737_v22  ;;  %v2841_v41 = vrot.slane %v1491_v36, %v2737_v22  ;;  %v2845_v63 = vrot.slane %v1492_v39, %v2737_v22  ;;  %v1640_v29 = vld [vmem:[#allocation13 + $0x10] sm:$0xff] }
  0xdb   :  { %2070 = vmatprep.subr.bf16.mxu0 %v2542_v0  ;;  %2090 = vmatprep.subr.bf16.mxu1 %v2542_v0 }
  0xdc   :  { %v1507_v42 = vcombine.low %v2841_v41, %v2845_v63 }
  0xde   :  { %2071 = vmatpush3.bf16.msra.mxu0 %v2282_v43  ;;  %2091 = vmatpush3.bf16.msra.mxu1 %v2283_v45  ;;  %v2298_v43 = vld [vmem:[#allocation10 + $0x190] sm:$0xff]   ;;  %v2300_v45 = vld [vmem:[#allocation10 + $0x198] sm:$0xff]   ;;  %v1514_v24 = vrot.slane %v1507_v42, %v2737_v22 }
  0xdf   :  { %2072 = vmatprep.subr.bf16.mxu0 %v2542_v0  ;;  %2092 = vmatprep.subr.bf16.mxu1 %v2542_v0  ;;  %v1645_v42 = vld [vmem:[#allocation13 + $0x38] sm:$0xff] }
  0xe2   :  { %2073 = vmatpush3.bf16.msra.mxu0 %v2284_v48  ;;  %2093 = vmatpush3.bf16.msra.mxu1 %v2285_v51  ;;  %v2303_v48 = vld [vmem:[#allocation10 + $0x1e0] sm:$0xff]   ;;  %v1121_v51 = vld [vmem:[#allocation2 + $0x8] sm:$0x1] }
  0xe3   :  { %2074 = vmatprep.subr.bf16.mxu0 %v2542_v0  ;;  %2094 = vmatprep.subr.bf16.mxu1 %v2542_v0 }
  0xe6   :  { %2075 = vmatpush3.bf16.msra.mxu0 %v2286_v58  ;;  %2095 = vmatpush3.bf16.msra.mxu1 %v2287_v2  ;;  %v1145_v58 = vcombine.low %v1121_v51, %v1122_v52  ;;  %v2220_v51 = vpack.c.bf16 %v1651_v50, %v1650_v49  ;;  %v1652_v52 = vld [vmem:[#allocation13 + $0x70] sm:$0xff]  ;;  %v1885_v50 = vld [vmem:[#allocation14] ss:$0 sm:$0xff] }
  0xe7   :  { %2076 = vmatprep.subr.bf16.mxu0 %v2542_v0  ;;  %2096 = vmatprep.subr.bf16.mxu1 %v2542_v0  ;;  %v2223_v54 = vpack.c.bf16 %v1653_v53, %v1652_v52 }
  0xe8   :  { %v1159_v2 = vrot.slane %v1145_v58, %v2737_v22 }
  0xea   :  { %2077 = vmatpush3.bf16.msra.mxu0 %v2288_v8  ;;  %2097 = vmatpush3.bf16.msra.mxu1 %v2289_v13  ;;  %v1160_v7 = vcombine.low %v1152_v1, %v1159_v2  ;;  %v2308_v8 = vld [vmem:[#allocation10 + $0x1b8] sm:$0xff]  }
  0xeb   :  { %2078 = vmatprep.subr.bf16.mxu0 %v2542_v0  ;;  %2098 = vmatprep.subr.bf16.mxu1 %v2542_v0 }
  0xec   :  { %v1167_v13 = vrot.slane %v1160_v7, %v2737_v22 }
  0xee   :  { %2079 = vmatpush3.bf16.msra.mxu0 %v2290_v16  ;;  %2099 = vmatpush3.bf16.msra.mxu1 %v2291_v19  ;;  %v2311_v16 = vld [vmem:[#allocation10 + $0x208] sm:$0xff]   ;;  %v2314_v19 = vld [vmem:[#allocation10 + $0x220] sm:$0xff]  }
  0xef   :  { %2080 = vmatprep.subr.bf16.mxu0 %v2542_v0  ;;  %2100 = vmatprep.subr.bf16.mxu1 %v2542_v0 }
  0xf2   :  { %2081 = vmatpush3.bf16.msra.mxu0 %v2292_v28  ;;  %2101 = vmatpush3.bf16.msra.mxu1 %v2293_v31  ;;  %v2202_v28 = vpack.c.bf16 %v1639_v26, %v1638_v25  ;;  %v2205_v31 = vpack.c.bf16 %v1641_v30, %v1640_v29 }
  0xf3   :  { %2106 = vmatprep.subr.bf16.mxu0 %v2542_v0  ;;  %2126 = vmatprep.subr.bf16.mxu1 %v2542_v0 }
  0xf5   :  { %2083 = vmatmul.mubr.bf16.vlgmr.msra.gmra.mrb[8].mxu0 %v820_v34  ;;  %2103 = vmatmul.mubr.bf16.vlgmr.msra.gmra.mrb[8].mxu1 %v1027_v38  ;;  %v1643_v38 = vld [vmem:[#allocation13 + $0x28] sm:$0xff] }
  0xf6   :  { %2107 = vmatpush3.bf16.msra.mxu0 %v2294_v37  ;;  %2127 = vmatpush3.bf16.msra.mxu1 %v2295_v40  ;;  %v1642_v37 = vld [vmem:[#allocation13 + $0x20] sm:$0xff] }
  0xf7   :  { %2108 = vmatprep.subr.bf16.mxu0 %v2542_v0  ;;  %2128 = vmatprep.subr.bf16.mxu1 %v2542_v0  ;;  %v2208_v41 = vpack.c.bf16 %v1643_v38, %v1642_v37 }
  0xf8   :  { %2122 = vmatprep.mubr.msk.bf16.mxu0 %vm2543_vm0, %v2542_v0  ;;  %2142 = vmatprep.mubr.msk.bf16.mxu1 %vm2543_vm0, %v2542_v0 }
  0xfa   :  { %2109 = vmatpush3.bf16.msra.mxu0 %v2296_v10  ;;  %2129 = vmatpush3.bf16.msra.mxu1 %v2297_v12  ;;  %v1644_v10 = vld [vmem:[#allocation13 + $0x30] sm:$0xff] }
  0xfb   :  { %2110 = vmatprep.subr.bf16.mxu0 %v2542_v0  ;;  %2130 = vmatprep.subr.bf16.mxu1 %v2542_v0  ;;  %v2211_v12 = vpack.c.bf16 %v1645_v42, %v1644_v10 }
  0xfe   :  { %2111 = vmatpush3.bf16.msra.mxu0 %v2298_v43  ;;  %2131 = vmatpush3.bf16.msra.mxu1 %v2299_v44  ;;  %v1646_v43 = vld [vmem:[#allocation13 + $0x40] sm:$0xff]  ;;  %v1647_v44 = vld [vmem:[#allocation13 + $0x48] sm:$0xff] }
  0xff   :  { %2112 = vmatprep.subr.bf16.mxu0 %v2542_v0  ;;  %2132 = vmatprep.subr.bf16.mxu1 %v2542_v0 }
 0x102   :  { %2113 = vmatpush3.bf16.msra.mxu0 %v2300_v45  ;;  %2133 = vmatpush3.bf16.msra.mxu1 %v2301_v46  ;;  %v2214_v45 = vpack.c.bf16 %v1647_v44, %v1646_v43  ;;  %v1648_v46 = vld [vmem:[#allocation13 + $0x50] sm:$0xff] }
 0x103   :  { %2114 = vmatprep.subr.bf16.mxu0 %v2542_v0  ;;  %2134 = vmatprep.subr.bf16.mxu1 %v2542_v0 }
 0x106   :  { %2115 = vmatpush3.bf16.msra.mxu0 %v2302_v47  ;;  %2135 = vmatpush3.bf16.msra.mxu1 %v2303_v48  ;;  %v1649_v47 = vld [vmem:[#allocation13 + $0x58] sm:$0xff] }
 0x107   :  { %2116 = vmatprep.subr.bf16.mxu0 %v2542_v0  ;;  %2136 = vmatprep.subr.bf16.mxu1 %v2542_v0  ;;  %v2217_v48 = vpack.c.bf16 %v1649_v47, %v1648_v46 }
 0x10a   :  { %2117 = vmatpush3.bf16.msra.mxu0 %v2304_v59  ;;  %2137 = vmatpush3.bf16.msra.mxu1 %v2305_v62 }
 0x10b   :  { %2118 = vmatprep.subr.bf16.mxu0 %v2542_v0  ;;  %2138 = vmatprep.subr.bf16.mxu1 %v2542_v0 }
 0x10e   :  { %2119 = vmatpush3.bf16.msra.mxu0 %v2306_v3  ;;  %2139 = vmatpush3.bf16.msra.mxu1 %v2307_v6 }
 0x10f   :  { %2120 = vmatprep.subr.bf16.mxu0 %v2542_v0  ;;  %2140 = vmatprep.subr.bf16.mxu1 %v2542_v0 }
 0x112   :  { %2121 = vmatpush3.bf16.msra.mxu0 %v2308_v8  ;;  %2141 = vmatpush3.bf16.msra.mxu1 %v2309_v11 }
 0x113   :  { %2146 = vmatprep.subr.bf16.mxu0 %v2542_v0  ;;  %2201 = vmatprep.subr.bf16.mxu1 %v2545_v27 }
 0x115   :  { %2123 = vmatmul.mubr.bf16.vlgmr.msra.gmra.mrb[12].mxu0 %v1167_v13  ;;  %2143 = vmatmul.mubr.bf16.vlgmr.msra.gmra.mrb[12].mxu1 %v1307_v15 }
 0x116   :  { %2147 = vmatpush3.bf16.msra.mxu0 %v2310_v14  ;;  %2162 = vmatprep.mubr.msk.bf16.mxu0 %vm2543_vm0, %v2542_v0 }
 0x117   :  { %2148 = vmatprep.subr.bf16.mxu0 %v2542_v0  ;;  %2198 = vmatprep.mubr.msk.f32.mxu1 %vm2543_vm0, %v2542_v0 }
 0x118   :  { %2203 = vmatpush3.bf16.msra.mxu1 %v2202_v28 }
 0x119   :  { %2204 = vmatprep.subr.bf16.mxu1 %v2545_v27 }
 0x11a   :  { %2149 = vmatpush3.bf16.msra.mxu0 %v2311_v16 }
 0x11b   :  { %2150 = vmatprep.subr.bf16.mxu0 %v2542_v0 }
 0x11c   :  { %2206 = vmatpush3.bf16.msra.mxu1 %v2205_v31 }
 0x11d   :  { %2207 = vmatprep.subr.bf16.mxu1 %v2545_v27 }
 0x11e   :  { %2151 = vmatpush3.bf16.msra.mxu0 %v2312_v17 }
 0x11f   :  { %2152 = vmatprep.subr.bf16.mxu0 %v2542_v0 }
 0x120   :  { %2209 = vmatpush3.bf16.msra.mxu1 %v2208_v41 }
 0x121   :  { %2210 = vmatprep.subr.bf16.mxu1 %v2545_v27 }
 0x122   :  { %2153 = vmatpush3.bf16.msra.mxu0 %v2313_v18 }
 0x123   :  { %2154 = vmatprep.subr.bf16.mxu0 %v2542_v0 }
 0x124   :  { %2212 = vmatpush3.bf16.msra.mxu1 %v2211_v12 }
 0x125   :  { %2213 = vmatprep.subr.bf16.mxu1 %v2545_v27 }
 0x126   :  { %2155 = vmatpush3.bf16.msra.mxu0 %v2314_v19 }
 0x127   :  { %2156 = vmatprep.subr.bf16.mxu0 %v2542_v0 }
 0x128   :  { %2215 = vmatpush3.bf16.msra.mxu1 %v2214_v45 }
 0x129   :  { %2216 = vmatprep.subr.bf16.mxu1 %v2545_v27 }
 0x12a   :  { %2157 = vmatpush3.bf16.msra.mxu0 %v2315_v20 }
 0x12b   :  { %2158 = vmatprep.subr.bf16.mxu0 %v2542_v0 }
 0x12c   :  { %2218 = vmatpush3.bf16.msra.mxu1 %v2217_v48 }
 0x12d   :  { %2219 = vmatprep.subr.bf16.mxu1 %v2545_v27 }
 0x12e   :  { %2159 = vmatpush3.bf16.msra.mxu0 %v2316_v21 }
 0x12f   :  { %2160 = vmatprep.subr.bf16.mxu0 %v2542_v0 }
 0x130   :  { %2221 = vmatpush3.bf16.msra.mxu1 %v2220_v51 }
 0x131   :  { %2222 = vmatprep.subr.bf16.mxu1 %v2545_v27  ;;  %v1884_v27 = vld [vmem:[#allocation11] ss:$0 sm:$0xff] }
 0x132   :  { %2161 = vmatpush3.bf16.msra.mxu0 %v2317_v23 }
 0x134   :  { %2224 = vmatpush3.bf16.msra.mxu1 %v2223_v54 }
 0x135   :  { %2163 = vmatmul.mubr.bf16.vlgmr.msra.gmra.mrb[16].mxu0 %v1514_v24 }
 0x188   :  { %v288_v32 = vpop.f32.mrb[0].mxu0  ;;  %v405_v0 = vpop.f32.mrb[0].mxu1 }
 0x189   :  { %v2004_v33 = vpop.f32.mrb[1].mxu0  ;;  %v406_v34 = vadd.f32 %v405_v0, %v288_v32  ;;  %v2024_v36 = vpop.f32.mrb[1].mxu1 }
 0x18a   :  { %v291_v35 = vpop.f32.mrb[2].mxu0  ;;  %v408_v40 = vpop.f32.mrb[2].mxu1 }
 0x18b   :  { %v2005_v39 = vpop.f32.mrb[3].mxu0  ;;  %v2025_v63 = vpop.f32.mrb[3].mxu1 }
 0x1a8   :  { %v626_v55 = vpop.f32.mrb[4].mxu0  ;;  %v765_v58 = vpop.f32.mrb[4].mxu1 }
 0x1a9   :  { %v632_v56 = vadd.f32 %v626_v55, %v406_v34  ;;  %v2044_v57 = vpop.f32.mrb[5].mxu0  ;;  %v2064_v60 = vpop.f32.mrb[5].mxu1 }
 0x1aa   :  { %v629_v59 = vpop.f32.mrb[6].mxu0  ;;  %v768_v1 = vpop.f32.mrb[6].mxu1 }
 0x1ab   :  { %v771_v61 = vadd.f32 %v765_v58, %v632_v56  ;;  %v2045_v62 = vpop.f32.mrb[7].mxu0  ;;  %v2065_v2 = vpop.f32.mrb[7].mxu1 }
 0x1c8   :  { %v904_v3 = vpop.f32.mrb[8].mxu0  ;;  %v1111_v6 = vpop.f32.mrb[8].mxu1 }
 0x1c9   :  { %v910_v4 = vadd.f32 %v904_v3, %v771_v61  ;;  %v2084_v5 = vpop.f32.mrb[9].mxu0  ;;  %v2104_v8 = vpop.f32.mrb[9].mxu1 }
 0x1ca   :  { %v907_v7 = vpop.f32.mrb[10].mxu0  ;;  %v1114_v13 = vpop.f32.mrb[10].mxu1 }
 0x1cb   :  { %v1117_v9 = vadd.f32 %v1111_v6, %v910_v4  ;;  %v2085_v11 = vpop.f32.mrb[11].mxu0  ;;  %v2105_v14 = vpop.f32.mrb[11].mxu1 }
 0x1e8   :  { %v1251_v15 = vpop.f32.mrb[12].mxu0  ;;  %v1391_v18 = vpop.f32.mrb[12].mxu1 }
 0x1e9   :  { %v1257_v16 = vadd.f32 %v1251_v15, %v1117_v9  ;;  %v2124_v17 = vpop.f32.mrb[13].mxu0  ;;  %v2144_v20 = vpop.f32.mrb[13].mxu1 }
 0x1ea   :  { %v1254_v19 = vpop.f32.mrb[14].mxu0  ;;  %v1394_v24 = vpop.f32.mrb[14].mxu1 }
 0x1eb   :  { %v1397_v21 = vadd.f32 %v1391_v18, %v1257_v16  ;;  %v2125_v23 = vpop.f32.mrb[15].mxu0  ;;  %v2145_v25 = vpop.f32.mrb[15].mxu1 }
 0x208   :  { %v1598_v26 = vpop.f32.mrb[16].mxu0 }
 0x209   :  { %v1604_v28 = vadd.f32 %v1598_v26, %v1397_v21  ;;  %v2164_v29 = vpop.f32.mrb[17].mxu0 }
 0x20a   :  { %v1601_v30 = vpop.f32.mrb[18].mxu0 }
 0x20b   :  { %v1612_v31 = vadd.f32 %v1884_v27, %v1604_v28  ;;  %v2165_v32 = vpop.f32.mrb[19].mxu0 }
 0x20d   :  { %vm1613_vm0 = vcmp.ge.f32.partialorder %v1612_v31, 0.0  ;;  %v1614_v33 = vmul.f32 0.2, %v1612_v31 }
 0x20f   :  { %v1615_v0 = vsel %vm1613_vm0, %v1612_v31, %v1614_v33 }
 0x210   :  { %v1616_v34 = vmul.f32 0.23570226, %v1615_v0 }
 0x212   :  { %v1618_v35 = vcombine.high %v1616_v34, %v1616_v34  ;;  %v1621_v36 = vsel %vm1620_vm1, %v1616_v34, 0.0 }
 0x213   :  { %v1622_v37 = vrot.slane %v1621_v36, 4 }
 0x214   :  { %v1628_v38 = vsel %vm1620_vm1, %v1618_v35, 0.0 }
 0x215   :  { %v1623_v39 = vadd.f32 %v1622_v37, %v1621_v36  ;;  %v1629_v40 = vrot.slane %v1628_v38, 4 }
 0x217   :  { %v1624_v41 = vrot.slane %v1623_v39, 2  ;;  %v1630_v63 = vadd.f32 %v1629_v40, %v1628_v38 }
 0x219   :  { %v1625_v10 = vadd.f32 %v1624_v41, %v1623_v39  ;;  %v1631_v42 = vrot.slane %v1630_v63, 2 }
 0x21b   :  { %v1626_v12 = vrot.slane %v1625_v10, 1  ;;  %v1632_v43 = vadd.f32 %v1631_v42, %v1630_v63 }
 0x21d   :  { %v1627_v44 = vadd.f32 %v1626_v12, %v1625_v10  ;;  %v1633_v45 = vrot.slane %v1632_v43, 1 }
 0x21f   :  { %v1634_v46 = vadd.f32 %v1633_v45, %v1632_v43  ;;  %v1636_v47 = vmul.f32 0.25, %v1627_v44 }
 0x221   :  { %v1637_v48 = vmul.f32 0.25, %v1634_v46 }
 0x223   :  { %v1664_v49 = vsel %vm1663_vm2, %v1637_v48, %v1636_v47 }
 0x224   :  { %2199 = vmatmul.mubr.f32.vlgmr.msra.gmra.mrb[16].mxu1 %v1664_v49 }
 0x2f7   :  { %v1732_v51 = vpop.f32.mrb[16].mxu1 }
 0x2f8   :  { %v1733_v52 = vadd.f32 %v1885_v50, %v1732_v51  ;;  %v2200_v53 = vpop.f32.mrb[17].mxu1 }
 0x2fa   :  { %vm1736_vm3 = vcmp.ge.f32.partialorder %v1733_v52, 0.0  ;;  %v1737_v54 = vmul.f32 0.2, %v1733_v52 }
 0x2fc   :  { %v1738_v55 = vsel %vm1736_vm3, %v1733_v52, %v1737_v54 }
 0x2fd   :  { %v1739_v56 = vmul.f32 0.70710677, %v1738_v55 }
 0x2ff   :  { %v1747_v57 = vrot.slane %v1739_v56, %v2737_v22 }
 0x301   :  { %v1748_v58 = vcombine.high %v1747_v57, %v1747_v57  ;;  %1886 = vst.sshfl [vmem:[#allocation16] sm:$0x1 pattern:$0x73625140] %v1747_v57 }
 0x303   :  { %1887 = vst.sshfl [vmem:[#allocation16 + $0x1] sm:$0x1 pattern:$0x73625140] %v1748_v58 }
 0x304   :  { %2505 = shalt.err (!%p2502_p12)
}
 0x305   :  { %s2506_s13 = scalar_lea.hbm %s2910_s8, 32 }
 0x306   :  { %p2507_p13 = scmp.ne.s32.totalorder %s2910_s8, %s2506_s13  ;;  %p2510_p0 = scmp.lt.u32.totalorder %s2506_s13, %s2910_s8 }
 0x308   :  { %p2512_p1 = pnand %p2510_p0, %p2507_p13 }
 0x30a   :  { %2515 = shalt.err (!%p2512_p1)
}
 0x30b   :  { %s2547_s21 = smov 16   ;;  %s2548_s3 = smov 1  }
 0x30c   :  { %1778 = dma.vmem_to_hbm [thread:$0]  %s1773_s18, 32, %s2910_s8, [#allocation4], %s2547_s21, %s2547_s21, %s2548_s3  }
 0x30d   :  { %2526 = dma.done.wait [#allocation4], 32  }
 0x30e   :  { %2527 = vsyncadd [#allocation4], 4294967264 }
 0x30f   :  { %1782 = vsyncpa [#allocation3], 1 }
 0x310   :  { %1783 = vsyncpa [#allocation6], 1 }
 0x311   :  { %1784 = vsyncpa [#allocation9], 1 }
 0x312   :  { %1785 = vsyncpa [#allocation12], 1 }
 0x313   :  { %1786 = vsyncpa [#allocation15], 1 }
 0x314   :  { %1787 = vsyncpa [#allocation4], 1 }

</bundles_post_ra>
